<compile_context>
chip_gen: v7x
topology: tpu7x:2x2x1
jax: 0.10.0
libtpu: 0.0.40
codegen_flags: <defaults>
</compile_context>

<pallas_src>
import functools

import jax
import jax.numpy as jnp
from jax import lax
from jax.experimental import pallas as pl
from jax.experimental.pallas import tpu as pltpu


# ---------------------------------------------------------------------------
# Kernel 1: conv (folded-K matmul) + per-(block, tile) BN partial statistics.
#   x_ref    : (B_blk, Hp_pad, Wp, C_in)   padded NHWC images (bf16)
#   w_ref    : (C_out, k*k*C_in)  [fold]   or (k*k, C_out, C_in) [per-tap]
#   y_ref    : (B_blk, C_out, HW_t_pad)    conv output, channels on sublanes,
#                                          spatial on lanes (bf16, lane dense)
#   stats_ref: (1, 1, C_out, 2)            [sum, sum_of_squares] (f32)
#   scratch  : (HW_t, k*k*C_in) VMEM slab  (fold mode only)
# ---------------------------------------------------------------------------
def _conv_stats_kernel(x_ref, w_ref, y_ref, stats_ref, *scratch, k, stride,
                       H_tile, W_out, H_out, HW_t_pad, C_in, fold):
    t = pl.program_id(1)
    B_blk, C_out = y_ref.shape[0], y_ref.shape[1]
    HW_t = H_tile * W_out
    row0 = t * (H_tile * stride)          # first padded-input row of this tile
    slab_ref = scratch[0] if fold else None

    # Rows >= H_out (last ragged spatial tile only) are excluded from the BN
    # statistics and zeroed in the stored output.
    need_mask = (H_out % H_tile) != 0
    if need_mask:
        pos = lax.broadcasted_iota(jnp.int32, (1, HW_t), 1)
        valid = (t * H_tile + pos // W_out) < H_out

    s_tot = jnp.zeros((C_out, 1), jnp.float32)
    ss_tot = jnp.zeros((C_out, 1), jnp.float32)

    for b in range(B_blk):
        acc = None
        for ih in range(k):
            # TODO(synk): for stride > 1 verify the strided sublane pl.ds
            # lowers to a strided vld (check MLIR dump); test config is stride=1.
            sl_h = (pl.ds(row0 + ih, H_tile) if stride == 1
                    else pl.ds(row0 + ih, H_tile, stride))
            for iw in range(k):
                sl_w = (pl.ds(iw, W_out) if stride == 1
                        else pl.ds(iw, W_out, stride))
                tap = ih * k + iw
                # Shifted window (in-VMEM im2col slice). NOTE: the reshape is a
                # pure relayout no-op only when W_out % 8 == 0.
                part = x_ref[b, sl_h, sl_w, :].reshape(HW_t, C_in)
                if fold:
                    slab_ref[:, pl.ds(tap * C_in, C_in)] = part
                else:
                    d = lax.dot_general(
                        w_ref[tap], part,
                        dimension_numbers=(((1,), (1,)), ((), ())),
                        preferred_element_type=jnp.float32)
                    acc = d if acc is None else acc + d
        if fold:
            # Single MXU matmul with contraction depth K = k*k*C_in.
            acc = lax.dot_general(
                w_ref[...], slab_ref[...],
                dimension_numbers=(((1,), (1,)), ((), ())),
                preferred_element_type=jnp.float32)

        if need_mask:
            acc = jnp.where(valid, acc, 0.0)

        # BN partial statistics from the f32 accumulator (before downcast).
        s_tot = s_tot + jnp.sum(acc, axis=1, keepdims=True)
        ss_tot = ss_tot + jnp.sum(acc * acc, axis=1, keepdims=True)

        # Single full-width (lane-dense) store of the bf16 intermediate.
        if HW_t_pad != HW_t:
            acc = jnp.concatenate(
                [acc, jnp.zeros((C_out, HW_t_pad - HW_t), acc.dtype)], axis=1)
        y_ref[b] = acc.astype(y_ref.dtype)

    stats_ref[0, 0] = jnp.concatenate([s_tot, ss_tot], axis=1)


# ---------------------------------------------------------------------------
# Kernel 2: fused BatchNorm affine + activation (elementwise, lane dense).
# ---------------------------------------------------------------------------
def _bn_act_kernel(y_ref, scale_ref, bias_ref, o_ref, *, activate):
    z = y_ref[...].astype(jnp.float32) * scale_ref[...] + bias_ref[...]
    if activate == "relu":
        z = jnp.maximum(z, 0.0)
    elif activate == "leaky":
        z = jnp.where(z >= 0.0, z, 0.1 * z)
    elif activate == "mish":
        z = z * jnp.tanh(jax.nn.softplus(z))
    elif activate == "swish":
        z = z * jax.nn.sigmoid(z)
    # None / 'linear': identity
    o_ref[...] = z.astype(o_ref.dtype)


def _largest_divisor_fitting(n, fits):
    for d in range(n, 0, -1):
        if n % d == 0 and fits(d):
            return d
    return 1


# ---------------------------------------------------------------------------
# Wrapper: ConvBlock forward (NCHW in, NCHW out)
# ---------------------------------------------------------------------------
def conv_block_forward(x, weight, gamma, beta, *, stride=1, pad=-1, norm="bn",
                       activate="leaky", eps=1e-5,
                       compute_dtype=jnp.bfloat16,
                       intermediate_dtype=jnp.bfloat16,
                       vmem_budget_bytes=12 * 1024 * 1024,
                       vmem_limit_bytes=48 * 1024 * 1024):
    """x: (N, C_in, H, W) NCHW f32; weight: (C_out, C_in, kh, kw) OIHW."""
    N, C_in, H, W = x.shape
    C_out, _, kh, kw = weight.shape
    assert kh == kw, "square kernels only"
    k = kh
    padding = k // 2 if pad == -1 else pad

    H_out = (H + 2 * padding - k) // stride + 1
    W_out = (W + 2 * padding - k) // stride + 1
    HW = H_out * W_out
    Hp, Wp = H + 2 * padding, W + 2 * padding
    K = k * k * C_in
    # Fold every tap into one MXU contraction while K fits the MXU depth; for
    # deep layers (K > 256) the per-tap K = C_in already saturates it.
    fold = K <= 256

    in_bytes = jnp.finfo(compute_dtype).bits // 8
    inter_bytes = jnp.finfo(intermediate_dtype).bits // 8

    # ---- choose (batch block, output-row tile) under an explicit VMEM budget
    def footprint(B_blk, H_tile):
        HW_t = H_tile * W_out
        HW_t_pad = pl.cdiv(HW_t, 128) * 128
        num_t = pl.cdiv(H_out, H_tile)
        Hp_pad = max(Hp, (num_t * H_tile - 1) * stride + k)
        x_b = 2 * B_blk * Hp_pad * Wp * C_in * in_bytes       # double-buffered
        y_b = 2 * B_blk * C_out * HW_t_pad * inter_bytes      # double-buffered
        w_b = 2 * C_out * K * in_bytes
        acc_b = C_out * HW_t_pad * 4                          # f32 accumulator
        slab_b = HW_t * max(K, 128) * in_bytes                # folded-K scratch
        return x_b + y_b + w_b + acc_b + slab_b

    H_tile = H_out
    while H_tile > 1 and footprint(1, H_tile) > vmem_budget_bytes:
        H_tile = -(-H_tile // 2)                              # ceil halve
    B_blk = _largest_divisor_fitting(
        N, lambda d: footprint(d, H_tile) <= vmem_budget_bytes)

    num_t = pl.cdiv(H_out, H_tile)
    num_nb = N // B_blk
    HW_t = H_tile * W_out
    HW_t_pad = pl.cdiv(HW_t, 128) * 128
    Hp_pad = max(Hp, (num_t * H_tile - 1) * stride + k)
    HW_total = num_t * HW_t_pad

    # ---- glue: NCHW -> zero-padded NHWC bf16; weights -> folded/tap layout --
    # TODO(synk): keep chained ConvBlocks in a consistent padded-NHWC/bf16
    # layout so this transpose+pad pass (an extra HBM round trip) disappears.
    x_pad = jnp.pad(jnp.transpose(x, (0, 2, 3, 1)),
                    ((0, 0), (padding, Hp_pad - H - padding),
                     (padding, padding), (0, 0))).astype(compute_dtype)
    if fold:
        w_arr = jnp.transpose(weight, (0, 2, 3, 1)).reshape(C_out, K)
        w_spec = pl.BlockSpec((C_out, K), lambda nb, t: (0, 0))
    else:
        w_arr = jnp.transpose(weight, (2, 3, 0, 1)).reshape(k * k, C_out, C_in)
        w_spec = pl.BlockSpec((k * k, C_out, C_in), lambda nb, t: (0, 0, 0))
    w_arr = w_arr.astype(compute_dtype)

    scratch_shapes = [pltpu.VMEM((HW_t, K), compute_dtype)] if fold else []

    # --- Pallas kernel 1: conv + per-(block, tile) BN statistics -------------
    y, stats = pl.pallas_call(
        functools.partial(_conv_stats_kernel, k=k, stride=stride,
                          H_tile=H_tile, W_out=W_out, H_out=H_out,
                          HW_t_pad=HW_t_pad, C_in=C_in, fold=fold),
        out_shape=(jax.ShapeDtypeStruct((N, C_out, HW_total), intermediate_dtype),
                   jax.ShapeDtypeStruct((num_nb, num_t, C_out, 2), jnp.float32)),
        grid_spec=pltpu.PrefetchScalarGridSpec(
            num_scalar_prefetch=0,
            grid=(num_nb, num_t),
            in_specs=[
                # Padded image(s) of the batch block; the block index does not
                # depend on t, so it is DMA'd once per batch block.
                pl.BlockSpec((B_blk, Hp_pad, Wp, C_in),
                             lambda nb, t: (nb, 0, 0, 0)),
                w_spec,
            ],
            out_specs=[
                pl.BlockSpec((B_blk, C_out, HW_t_pad), lambda nb, t: (nb, 0, t)),
                pl.BlockSpec((1, 1, C_out, 2), lambda nb, t: (nb, t, 0, 0)),
            ],
            scratch_shapes=scratch_shapes),
        compiler_params=pltpu.CompilerParams(
            dimension_semantics=("parallel", "parallel"),
            vmem_limit_bytes=vmem_limit_bytes),
    )(x_pad, w_arr)

    # ---- tiny (C_out,)-sized glue: fold BN into per-channel scale/bias ------
    if norm == "bn":
        count = N * HW
        s = jnp.sum(stats[..., 0], axis=(0, 1))
        ss = jnp.sum(stats[..., 1], axis=(0, 1))
        mean = s / count
        # TODO(synk): E[y^2]-E[y]^2 can cancel for huge N*H*W; switch to
        # mean-shifted per-tile sums for production feature-map sizes.
        var = jnp.maximum(ss / count - mean * mean, 0.0)   # biased var (BN fwd)
        scale = gamma.astype(jnp.float32) * lax.rsqrt(var + eps)
        bias = beta.astype(jnp.float32) - mean * scale
    else:
        scale = jnp.ones((C_out,), jnp.float32)
        bias = jnp.zeros((C_out,), jnp.float32)
    scale = scale.reshape(1, C_out, 1)
    bias = bias.reshape(1, C_out, 1)

    # --- Pallas kernel 2: fused normalize + activation (mem-bound) -----------
    HW2 = min(HW_total, 4096)
    while HW_total % HW2 != 0:
        HW2 -= 128
    B2 = _largest_divisor_fitting(
        N, lambda d: 2 * d * C_out * HW2 * (inter_bytes + 4) <= vmem_budget_bytes)

    y_act = pl.pallas_call(
        functools.partial(_bn_act_kernel, activate=activate),
        out_shape=jax.ShapeDtypeStruct((N, C_out, HW_total), jnp.float32),
        grid_spec=pltpu.PrefetchScalarGridSpec(
            num_scalar_prefetch=0,
            grid=(N // B2, HW_total // HW2),
            in_specs=[pl.BlockSpec((B2, C_out, HW2), lambda nb, h: (nb, 0, h)),
                      pl.BlockSpec((1, C_out, 1), lambda nb, h: (0, 0, 0)),
                      pl.BlockSpec((1, C_out, 1), lambda nb, h: (0, 0, 0))],
            out_specs=pl.BlockSpec((B2, C_out, HW2), lambda nb, h: (nb, 0, h))),
        compiler_params=pltpu.CompilerParams(
            dimension_semantics=("parallel", "parallel"),
            vmem_limit_bytes=vmem_limit_bytes),
    )(y, scale, bias)

    # ---- assemble NCHW output (pad rows / pad lanes sliced off) -------------
    out = y_act.reshape(N, C_out, num_t, HW_t_pad)[:, :, :, :HW_t]
    out = out.reshape(N, C_out, num_t * H_tile, W_out)[:, :, :H_out, :]
    return out


# ---------------------------------------------------------------------------
# Pure-JAX reference (mirrors the PyTorch forward; optional bf16 intermediate)
# ---------------------------------------------------------------------------
def _reference(x, weight, gamma, beta, *, stride, padding, activate, eps=1e-5,
               compute_dtype=jnp.bfloat16, intermediate_dtype=None):
    xq = x.astype(compute_dtype).astype(jnp.float32)
    wq = weight.astype(compute_dtype).astype(jnp.float32)
    y = lax.conv_general_dilated(
        xq, wq, window_strides=(stride, stride),
        padding=((padding, padding), (padding, padding)),
        dimension_numbers=("NCHW", "OIHW", "NCHW"),
        precision=lax.Precision.HIGHEST)
    mean = jnp.mean(y, axis=(0, 2, 3), keepdims=True)
    var = jnp.mean((y - mean) ** 2, axis=(0, 2, 3), keepdims=True)
    if intermediate_dtype is not None:
        y = y.astype(intermediate_dtype).astype(jnp.float32)
    y = (y - mean) * lax.rsqrt(var + eps)
    y = y * gamma.reshape(1, -1, 1, 1) + beta.reshape(1, -1, 1, 1)
    if activate == "leaky":
        y = jnp.where(y >= 0.0, y, 0.1 * y)
    elif activate == "relu":
        y = jnp.maximum(y, 0.0)
    return y


if __name__ == "__main__":
    key = jax.random.PRNGKey(0)
    k_x, k_w = jax.random.split(key)

    # ConvBlock(in_channels=4, out_channels=8, kernel_size=3, stride=1,
    #           pad=-1, norm='bn', activate='leaky')
    N, C_in, H, W = 2, 4, 16, 16
    C_out, ksize = 8, 3

    x = jax.random.normal(k_x, (N, C_in, H, W), jnp.float32)
    weight = 0.1 * jax.random.normal(k_w, (C_out, C_in, ksize, ksize), jnp.float32)
    gamma = 1.0 + 0.1 * jnp.arange(C_out, dtype=jnp.float32)
    beta = 0.05 * jnp.arange(C_out, dtype=jnp.float32)

    out = conv_block_forward(x, weight, gamma, beta,
                             stride=1, pad=-1, norm="bn", activate="leaky")
    out = jax.block_until_ready(out)
    assert out.shape == (N, C_out, H, W), out.shape
    assert bool(jnp.isfinite(out).all())

    # Reference matching the kernel's precision pipeline (bf16 conv inputs,
    # f32 accumulation / stats, bf16 intermediate activation tensor).
    ref_match = _reference(x, weight, gamma, beta, stride=1, padding=ksize // 2,
                           activate="leaky", intermediate_dtype=jnp.bfloat16)
    # Full-f32 reference (module semantics); looser tolerance covers the bf16
    # rounding of the intermediate activation tensor.
    ref_f32 = _reference(x, weight, gamma, beta, stride=1, padding=ksize // 2,
                         activate="leaky", intermediate_dtype=None)

    err_match = float(jnp.max(jnp.abs(out - ref_match)))
    err_f32 = float(jnp.max(jnp.abs(out - ref_f32)))
    assert err_match < 2e-3, err_match
    assert err_f32 < 5e-2, err_f32

    print("KERNEL_OK")
</pallas_src>

<mosaic_0001>
module attributes {stable_mosaic.version = 11 : i64} {
  func.func @_conv_stats_kernel(%arg0: i32, %arg1: i32, %arg2: memref<2x18x18x4xbf16, #tpu.memory_space<vmem>>, %arg3: memref<8x36xbf16, #tpu.memory_space<vmem>>, %arg4: memref<2x8x256xbf16, #tpu.memory_space<vmem>>, %arg5: memref<1x1x8x2xf32, #tpu.memory_space<vmem>>, %arg6: memref<256x36xbf16, #tpu.memory_space<vmem>>) attributes {dimension_semantics = [#tpu.dimension_semantics<parallel>, #tpu.dimension_semantics<parallel>], iteration_bounds = array<i64: 1, 1>, scalar_prefetch = 0 : i64, scratch_operands = 1 : i64, tpu.core_type = #tpu.core_type<tc>, window_params = [{transform_indices = @transform_0, window_bounds = array<i64: 2, 18, 18, 4>}, {pipeline_mode = #tpu.pipeline_mode<synchronous>, transform_indices = @transform_1, window_bounds = array<i64: 8, 36>}, {transform_indices = @transform_2, window_bounds = array<i64: 2, 8, 256>}, {transform_indices = @transform_3, window_bounds = array<i64: 1, 1, 8, 2>}]} {
    %c16_i32 = arith.constant 16 : i32
    %0 = arith.muli %arg1, %c16_i32 : i32
    %cst = arith.constant 0.000000e+00 : f32
    %1 = vector.broadcast %cst : f32 to vector<8x1xf32>
    %cst_0 = arith.constant 0.000000e+00 : f32
    %2 = vector.broadcast %cst_0 : f32 to vector<8x1xf32>
    %c0_i32 = arith.constant 0 : i32
    %3 = arith.addi %0, %c0_i32 : i32
    %c0 = arith.constant 0 : index
    %4 = arith.index_cast %3 : i32 to index
    %c0_1 = arith.constant 0 : index
    %c0_2 = arith.constant 0 : index
    %5 = vector.load %arg2[%c0, %4, %c0_1, %c0_2] : memref<2x18x18x4xbf16, #tpu.memory_space<vmem>>, vector<1x16x16x4xbf16>
    %6 = vector.shape_cast %5 : vector<1x16x16x4xbf16> to vector<16x16x4xbf16>
    %7 = vector.shape_cast %6 : vector<16x16x4xbf16> to vector<256x4xbf16>
    %c0_3 = arith.constant 0 : index
    %c0_4 = arith.constant 0 : index
    %8 = vector.load %arg6[%c0_3, %c0_4] : memref<256x36xbf16, #tpu.memory_space<vmem>>, vector<256x4xbf16>
    tpu.vector_store %arg6[%c0_3, %c0_4], %7 {strides = array<i32>} : memref<256x36xbf16, #tpu.memory_space<vmem>>, vector<256x4xbf16>,
    %c0_5 = arith.constant 0 : index
    %9 = arith.index_cast %3 : i32 to index
    %c1 = arith.constant 1 : index
    %c0_6 = arith.constant 0 : index
    %10 = vector.load %arg2[%c0_5, %9, %c1, %c0_6] : memref<2x18x18x4xbf16, #tpu.memory_space<vmem>>, vector<1x16x16x4xbf16>
    %11 = vector.shape_cast %10 : vector<1x16x16x4xbf16> to vector<16x16x4xbf16>
    %12 = vector.shape_cast %11 : vector<16x16x4xbf16> to vector<256x4xbf16>
    %c0_7 = arith.constant 0 : index
    %c4 = arith.constant 4 : index
    %13 = vector.load %arg6[%c0_7, %c4] : memref<256x36xbf16, #tpu.memory_space<vmem>>, vector<256x4xbf16>
    tpu.vector_store %arg6[%c0_7, %c4], %12 {strides = array<i32>} : memref<256x36xbf16, #tpu.memory_space<vmem>>, vector<256x4xbf16>,
    %c0_8 = arith.constant 0 : index
    %14 = arith.index_cast %3 : i32 to index
    %c2 = arith.constant 2 : index
    %c0_9 = arith.constant 0 : index
    %15 = vector.load %arg2[%c0_8, %14, %c2, %c0_9] : memref<2x18x18x4xbf16, #tpu.memory_space<vmem>>, vector<1x16x16x4xbf16>
    %16 = vector.shape_cast %15 : vector<1x16x16x4xbf16> to vector<16x16x4xbf16>
    %17 = vector.shape_cast %16 : vector<16x16x4xbf16> to vector<256x4xbf16>
    %c0_10 = arith.constant 0 : index
    %c8 = arith.constant 8 : index
    %18 = vector.load %arg6[%c0_10, %c8] : memref<256x36xbf16, #tpu.memory_space<vmem>>, vector<256x4xbf16>
    tpu.vector_store %arg6[%c0_10, %c8], %17 {strides = array<i32>} : memref<256x36xbf16, #tpu.memory_space<vmem>>, vector<256x4xbf16>,
    %c1_i32 = arith.constant 1 : i32
    %19 = arith.addi %0, %c1_i32 : i32
    %c0_11 = arith.constant 0 : index
    %20 = arith.index_cast %19 : i32 to index
    %c0_12 = arith.constant 0 : index
    %c0_13 = arith.constant 0 : index
    %21 = vector.load %arg2[%c0_11, %20, %c0_12, %c0_13] : memref<2x18x18x4xbf16, #tpu.memory_space<vmem>>, vector<1x16x16x4xbf16>
    %22 = vector.shape_cast %21 : vector<1x16x16x4xbf16> to vector<16x16x4xbf16>
    %23 = vector.shape_cast %22 : vector<16x16x4xbf16> to vector<256x4xbf16>
    %c0_14 = arith.constant 0 : index
    %c12 = arith.constant 12 : index
    %24 = vector.load %arg6[%c0_14, %c12] : memref<256x36xbf16, #tpu.memory_space<vmem>>, vector<256x4xbf16>
    tpu.vector_store %arg6[%c0_14, %c12], %23 {strides = array<i32>} : memref<256x36xbf16, #tpu.memory_space<vmem>>, vector<256x4xbf16>,
    %c0_15 = arith.constant 0 : index
    %25 = arith.index_cast %19 : i32 to index
    %c1_16 = arith.constant 1 : index
    %c0_17 = arith.constant 0 : index
    %26 = vector.load %arg2[%c0_15, %25, %c1_16, %c0_17] : memref<2x18x18x4xbf16, #tpu.memory_space<vmem>>, vector<1x16x16x4xbf16>
    %27 = vector.shape_cast %26 : vector<1x16x16x4xbf16> to vector<16x16x4xbf16>
    %28 = vector.shape_cast %27 : vector<16x16x4xbf16> to vector<256x4xbf16>
    %c0_18 = arith.constant 0 : index
    %c16 = arith.constant 16 : index
    %29 = vector.load %arg6[%c0_18, %c16] : memref<256x36xbf16, #tpu.memory_space<vmem>>, vector<256x4xbf16>
    tpu.vector_store %arg6[%c0_18, %c16], %28 {strides = array<i32>} : memref<256x36xbf16, #tpu.memory_space<vmem>>, vector<256x4xbf16>,
    %c0_19 = arith.constant 0 : index
    %30 = arith.index_cast %19 : i32 to index
    %c2_20 = arith.constant 2 : index
    %c0_21 = arith.constant 0 : index
    %31 = vector.load %arg2[%c0_19, %30, %c2_20, %c0_21] : memref<2x18x18x4xbf16, #tpu.memory_space<vmem>>, vector<1x16x16x4xbf16>
    %32 = vector.shape_cast %31 : vector<1x16x16x4xbf16> to vector<16x16x4xbf16>
    %33 = vector.shape_cast %32 : vector<16x16x4xbf16> to vector<256x4xbf16>
    %c0_22 = arith.constant 0 : index
    %c20 = arith.constant 20 : index
    %34 = vector.load %arg6[%c0_22, %c20] : memref<256x36xbf16, #tpu.memory_space<vmem>>, vector<256x4xbf16>
    tpu.vector_store %arg6[%c0_22, %c20], %33 {strides = array<i32>} : memref<256x36xbf16, #tpu.memory_space<vmem>>, vector<256x4xbf16>,
    %c2_i32 = arith.constant 2 : i32
    %35 = arith.addi %0, %c2_i32 : i32
    %c0_23 = arith.constant 0 : index
    %36 = arith.index_cast %35 : i32 to index
    %c0_24 = arith.constant 0 : index
    %c0_25 = arith.constant 0 : index
    %37 = vector.load %arg2[%c0_23, %36, %c0_24, %c0_25] : memref<2x18x18x4xbf16, #tpu.memory_space<vmem>>, vector<1x16x16x4xbf16>
    %38 = vector.shape_cast %37 : vector<1x16x16x4xbf16> to vector<16x16x4xbf16>
    %39 = vector.shape_cast %38 : vector<16x16x4xbf16> to vector<256x4xbf16>
    %c0_26 = arith.constant 0 : index
    %c24 = arith.constant 24 : index
    %40 = vector.load %arg6[%c0_26, %c24] : memref<256x36xbf16, #tpu.memory_space<vmem>>, vector<256x4xbf16>
    tpu.vector_store %arg6[%c0_26, %c24], %39 {strides = array<i32>} : memref<256x36xbf16, #tpu.memory_space<vmem>>, vector<256x4xbf16>,
    %c0_27 = arith.constant 0 : index
    %41 = arith.index_cast %35 : i32 to index
    %c1_28 = arith.constant 1 : index
    %c0_29 = arith.constant 0 : index
    %42 = vector.load %arg2[%c0_27, %41, %c1_28, %c0_29] : memref<2x18x18x4xbf16, #tpu.memory_space<vmem>>, vector<1x16x16x4xbf16>
    %43 = vector.shape_cast %42 : vector<1x16x16x4xbf16> to vector<16x16x4xbf16>
    %44 = vector.shape_cast %43 : vector<16x16x4xbf16> to vector<256x4xbf16>
    %c0_30 = arith.constant 0 : index
    %c28 = arith.constant 28 : index
    %45 = vector.load %arg6[%c0_30, %c28] : memref<256x36xbf16, #tpu.memory_space<vmem>>, vector<256x4xbf16>
    tpu.vector_store %arg6[%c0_30, %c28], %44 {strides = array<i32>} : memref<256x36xbf16, #tpu.memory_space<vmem>>, vector<256x4xbf16>,
    %c0_31 = arith.constant 0 : index
    %46 = arith.index_cast %35 : i32 to index
    %c2_32 = arith.constant 2 : index
    %c0_33 = arith.constant 0 : index
    %47 = vector.load %arg2[%c0_31, %46, %c2_32, %c0_33] : memref<2x18x18x4xbf16, #tpu.memory_space<vmem>>, vector<1x16x16x4xbf16>
    %48 = vector.shape_cast %47 : vector<1x16x16x4xbf16> to vector<16x16x4xbf16>
    %49 = vector.shape_cast %48 : vector<16x16x4xbf16> to vector<256x4xbf16>
    %c0_34 = arith.constant 0 : index
    %c32 = arith.constant 32 : index
    %50 = vector.load %arg6[%c0_34, %c32] : memref<256x36xbf16, #tpu.memory_space<vmem>>, vector<256x4xbf16>
    tpu.vector_store %arg6[%c0_34, %c32], %49 {strides = array<i32>} : memref<256x36xbf16, #tpu.memory_space<vmem>>, vector<256x4xbf16>,
    %c0_35 = arith.constant 0 : index
    %c0_36 = arith.constant 0 : index
    %51 = vector.load %arg3[%c0_35, %c0_36] : memref<8x36xbf16, #tpu.memory_space<vmem>>, vector<8x36xbf16>
    %c0_37 = arith.constant 0 : index
    %c0_38 = arith.constant 0 : index
    %52 = vector.load %arg6[%c0_37, %c0_38] : memref<256x36xbf16, #tpu.memory_space<vmem>>, vector<256x36xbf16>
    %cst_39 = arith.constant dense<0.000000e+00> : vector<8x256xf32>
    %53 = tpu.matmul %51, %52, %cst_39 {dimension_numbers = #tpu.dot_dimension_numbers<[1], [1], [0], [0], [0, 0, 1, 0], [], []>} : vector<8x36xbf16>, vector<256x36xbf16>, vector<8x256xf32> -> vector<8x256xf32>
    %cst_40 = arith.constant dense<0.000000e+00> : vector<8xf32>
    %54 = vector.multi_reduction <add>, %53, %cst_40 [1] : vector<8x256xf32> to vector<8xf32>
    %55 = vector.shape_cast %54 : vector<8xf32> to vector<8x1xf32>
    %56 = arith.addf %1, %55 : vector<8x1xf32>
    %57 = arith.mulf %53, %53 : vector<8x256xf32>
    %cst_41 = arith.constant dense<0.000000e+00> : vector<8xf32>
    %58 = vector.multi_reduction <add>, %57, %cst_41 [1] : vector<8x256xf32> to vector<8xf32>
    %59 = vector.shape_cast %58 : vector<8xf32> to vector<8x1xf32>
    %60 = arith.addf %2, %59 : vector<8x1xf32>
    %61 = arith.truncf %53 : vector<8x256xf32> to vector<8x256xbf16>
    %c0_42 = arith.constant 0 : index
    %c0_43 = arith.constant 0 : index
    %c0_44 = arith.constant 0 : index
    %62 = vector.load %arg4[%c0_42, %c0_43, %c0_44] : memref<2x8x256xbf16, #tpu.memory_space<vmem>>, vector<1x8x256xbf16>
    %63 = vector.shape_cast %62 : vector<1x8x256xbf16> to vector<8x256xbf16>
    %64 = vector.shape_cast %61 : vector<8x256xbf16> to vector<1x8x256xbf16>
    tpu.vector_store %arg4[%c0_42, %c0_43, %c0_44], %64 {strides = array<i32>} : memref<2x8x256xbf16, #tpu.memory_space<vmem>>, vector<1x8x256xbf16>,
    %c0_i32_45 = arith.constant 0 : i32
    %65 = arith.addi %0, %c0_i32_45 : i32
    %c1_46 = arith.constant 1 : index
    %66 = arith.index_cast %65 : i32 to index
    %c0_47 = arith.constant 0 : index
    %c0_48 = arith.constant 0 : index
    %67 = vector.load %arg2[%c1_46, %66, %c0_47, %c0_48] : memref<2x18x18x4xbf16, #tpu.memory_space<vmem>>, vector<1x16x16x4xbf16>
    %68 = vector.shape_cast %67 : vector<1x16x16x4xbf16> to vector<16x16x4xbf16>
    %69 = vector.shape_cast %68 : vector<16x16x4xbf16> to vector<256x4xbf16>
    %c0_49 = arith.constant 0 : index
    %c0_50 = arith.constant 0 : index
    %70 = vector.load %arg6[%c0_49, %c0_50] : memref<256x36xbf16, #tpu.memory_space<vmem>>, vector<256x4xbf16>
    tpu.vector_store %arg6[%c0_49, %c0_50], %69 {strides = array<i32>} : memref<256x36xbf16, #tpu.memory_space<vmem>>, vector<256x4xbf16>,
    %c1_51 = arith.constant 1 : index
    %71 = arith.index_cast %65 : i32 to index
    %c1_52 = arith.constant 1 : index
    %c0_53 = arith.constant 0 : index
    %72 = vector.load %arg2[%c1_51, %71, %c1_52, %c0_53] : memref<2x18x18x4xbf16, #tpu.memory_space<vmem>>, vector<1x16x16x4xbf16>
    %73 = vector.shape_cast %72 : vector<1x16x16x4xbf16> to vector<16x16x4xbf16>
    %74 = vector.shape_cast %73 : vector<16x16x4xbf16> to vector<256x4xbf16>
    %c0_54 = arith.constant 0 : index
    %c4_55 = arith.constant 4 : index
    %75 = vector.load %arg6[%c0_54, %c4_55] : memref<256x36xbf16, #tpu.memory_space<vmem>>, vector<256x4xbf16>
    tpu.vector_store %arg6[%c0_54, %c4_55], %74 {strides = array<i32>} : memref<256x36xbf16, #tpu.memory_space<vmem>>, vector<256x4xbf16>,
    %c1_56 = arith.constant 1 : index
    %76 = arith.index_cast %65 : i32 to index
    %c2_57 = arith.constant 2 : index
    %c0_58 = arith.constant 0 : index
    %77 = vector.load %arg2[%c1_56, %76, %c2_57, %c0_58] : memref<2x18x18x4xbf16, #tpu.memory_space<vmem>>, vector<1x16x16x4xbf16>
    %78 = vector.shape_cast %77 : vector<1x16x16x4xbf16> to vector<16x16x4xbf16>
    %79 = vector.shape_cast %78 : vector<16x16x4xbf16> to vector<256x4xbf16>
    %c0_59 = arith.constant 0 : index
    %c8_60 = arith.constant 8 : index
    %80 = vector.load %arg6[%c0_59, %c8_60] : memref<256x36xbf16, #tpu.memory_space<vmem>>, vector<256x4xbf16>
    tpu.vector_store %arg6[%c0_59, %c8_60], %79 {strides = array<i32>} : memref<256x36xbf16, #tpu.memory_space<vmem>>, vector<256x4xbf16>,
    %c1_i32_61 = arith.constant 1 : i32
    %81 = arith.addi %0, %c1_i32_61 : i32
    %c1_62 = arith.constant 1 : index
    %82 = arith.index_cast %81 : i32 to index
    %c0_63 = arith.constant 0 : index
    %c0_64 = arith.constant 0 : index
    %83 = vector.load %arg2[%c1_62, %82, %c0_63, %c0_64] : memref<2x18x18x4xbf16, #tpu.memory_space<vmem>>, vector<1x16x16x4xbf16>
    %84 = vector.shape_cast %83 : vector<1x16x16x4xbf16> to vector<16x16x4xbf16>
    %85 = vector.shape_cast %84 : vector<16x16x4xbf16> to vector<256x4xbf16>
    %c0_65 = arith.constant 0 : index
    %c12_66 = arith.constant 12 : index
    %86 = vector.load %arg6[%c0_65, %c12_66] : memref<256x36xbf16, #tpu.memory_space<vmem>>, vector<256x4xbf16>
    tpu.vector_store %arg6[%c0_65, %c12_66], %85 {strides = array<i32>} : memref<256x36xbf16, #tpu.memory_space<vmem>>, vector<256x4xbf16>,
    %c1_67 = arith.constant 1 : index
    %87 = arith.index_cast %81 : i32 to index
    %c1_68 = arith.constant 1 : index
    %c0_69 = arith.constant 0 : index
    %88 = vector.load %arg2[%c1_67, %87, %c1_68, %c0_69] : memref<2x18x18x4xbf16, #tpu.memory_space<vmem>>, vector<1x16x16x4xbf16>
    %89 = vector.shape_cast %88 : vector<1x16x16x4xbf16> to vector<16x16x4xbf16>
    %90 = vector.shape_cast %89 : vector<16x16x4xbf16> to vector<256x4xbf16>
    %c0_70 = arith.constant 0 : index
    %c16_71 = arith.constant 16 : index
    %91 = vector.load %arg6[%c0_70, %c16_71] : memref<256x36xbf16, #tpu.memory_space<vmem>>, vector<256x4xbf16>
    tpu.vector_store %arg6[%c0_70, %c16_71], %90 {strides = array<i32>} : memref<256x36xbf16, #tpu.memory_space<vmem>>, vector<256x4xbf16>,
    %c1_72 = arith.constant 1 : index
    %92 = arith.index_cast %81 : i32 to index
    %c2_73 = arith.constant 2 : index
    %c0_74 = arith.constant 0 : index
    %93 = vector.load %arg2[%c1_72, %92, %c2_73, %c0_74] : memref<2x18x18x4xbf16, #tpu.memory_space<vmem>>, vector<1x16x16x4xbf16>
    %94 = vector.shape_cast %93 : vector<1x16x16x4xbf16> to vector<16x16x4xbf16>
    %95 = vector.shape_cast %94 : vector<16x16x4xbf16> to vector<256x4xbf16>
    %c0_75 = arith.constant 0 : index
    %c20_76 = arith.constant 20 : index
    %96 = vector.load %arg6[%c0_75, %c20_76] : memref<256x36xbf16, #tpu.memory_space<vmem>>, vector<256x4xbf16>
    tpu.vector_store %arg6[%c0_75, %c20_76], %95 {strides = array<i32>} : memref<256x36xbf16, #tpu.memory_space<vmem>>, vector<256x4xbf16>,
    %c2_i32_77 = arith.constant 2 : i32
    %97 = arith.addi %0, %c2_i32_77 : i32
    %c1_78 = arith.constant 1 : index
    %98 = arith.index_cast %97 : i32 to index
    %c0_79 = arith.constant 0 : index
    %c0_80 = arith.constant 0 : index
    %99 = vector.load %arg2[%c1_78, %98, %c0_79, %c0_80] : memref<2x18x18x4xbf16, #tpu.memory_space<vmem>>, vector<1x16x16x4xbf16>
    %100 = vector.shape_cast %99 : vector<1x16x16x4xbf16> to vector<16x16x4xbf16>
    %101 = vector.shape_cast %100 : vector<16x16x4xbf16> to vector<256x4xbf16>
    %c0_81 = arith.constant 0 : index
    %c24_82 = arith.constant 24 : index
    %102 = vector.load %arg6[%c0_81, %c24_82] : memref<256x36xbf16, #tpu.memory_space<vmem>>, vector<256x4xbf16>
    tpu.vector_store %arg6[%c0_81, %c24_82], %101 {strides = array<i32>} : memref<256x36xbf16, #tpu.memory_space<vmem>>, vector<256x4xbf16>,
    %c1_83 = arith.constant 1 : index
    %103 = arith.index_cast %97 : i32 to index
    %c1_84 = arith.constant 1 : index
    %c0_85 = arith.constant 0 : index
    %104 = vector.load %arg2[%c1_83, %103, %c1_84, %c0_85] : memref<2x18x18x4xbf16, #tpu.memory_space<vmem>>, vector<1x16x16x4xbf16>
    %105 = vector.shape_cast %104 : vector<1x16x16x4xbf16> to vector<16x16x4xbf16>
    %106 = vector.shape_cast %105 : vector<16x16x4xbf16> to vector<256x4xbf16>
    %c0_86 = arith.constant 0 : index
    %c28_87 = arith.constant 28 : index
    %107 = vector.load %arg6[%c0_86, %c28_87] : memref<256x36xbf16, #tpu.memory_space<vmem>>, vector<256x4xbf16>
    tpu.vector_store %arg6[%c0_86, %c28_87], %106 {strides = array<i32>} : memref<256x36xbf16, #tpu.memory_space<vmem>>, vector<256x4xbf16>,
    %c1_88 = arith.constant 1 : index
    %108 = arith.index_cast %97 : i32 to index
    %c2_89 = arith.constant 2 : index
    %c0_90 = arith.constant 0 : index
    %109 = vector.load %arg2[%c1_88, %108, %c2_89, %c0_90] : memref<2x18x18x4xbf16, #tpu.memory_space<vmem>>, vector<1x16x16x4xbf16>
    %110 = vector.shape_cast %109 : vector<1x16x16x4xbf16> to vector<16x16x4xbf16>
    %111 = vector.shape_cast %110 : vector<16x16x4xbf16> to vector<256x4xbf16>
    %c0_91 = arith.constant 0 : index
    %c32_92 = arith.constant 32 : index
    %112 = vector.load %arg6[%c0_91, %c32_92] : memref<256x36xbf16, #tpu.memory_space<vmem>>, vector<256x4xbf16>
    tpu.vector_store %arg6[%c0_91, %c32_92], %111 {strides = array<i32>} : memref<256x36xbf16, #tpu.memory_space<vmem>>, vector<256x4xbf16>,
    %c0_93 = arith.constant 0 : index
    %c0_94 = arith.constant 0 : index
    %113 = vector.load %arg3[%c0_93, %c0_94] : memref<8x36xbf16, #tpu.memory_space<vmem>>, vector<8x36xbf16>
    %c0_95 = arith.constant 0 : index
    %c0_96 = arith.constant 0 : index
    %114 = vector.load %arg6[%c0_95, %c0_96] : memref<256x36xbf16, #tpu.memory_space<vmem>>, vector<256x36xbf16>
    %cst_97 = arith.constant dense<0.000000e+00> : vector<8x256xf32>
    %115 = tpu.matmul %113, %114, %cst_97 {dimension_numbers = #tpu.dot_dimension_numbers<[1], [1], [0], [0], [0, 0, 1, 0], [], []>} : vector<8x36xbf16>, vector<256x36xbf16>, vector<8x256xf32> -> vector<8x256xf32>
    %cst_98 = arith.constant dense<0.000000e+00> : vector<8xf32>
    %116 = vector.multi_reduction <add>, %115, %cst_98 [1] : vector<8x256xf32> to vector<8xf32>
    %117 = vector.shape_cast %116 : vector<8xf32> to vector<8x1xf32>
    %118 = arith.addf %56, %117 : vector<8x1xf32>
    %119 = arith.mulf %115, %115 : vector<8x256xf32>
    %cst_99 = arith.constant dense<0.000000e+00> : vector<8xf32>
    %120 = vector.multi_reduction <add>, %119, %cst_99 [1] : vector<8x256xf32> to vector<8xf32>
    %121 = vector.shape_cast %120 : vector<8xf32> to vector<8x1xf32>
    %122 = arith.addf %60, %121 : vector<8x1xf32>
    %123 = arith.truncf %115 : vector<8x256xf32> to vector<8x256xbf16>
    %c1_100 = arith.constant 1 : index
    %c0_101 = arith.constant 0 : index
    %c0_102 = arith.constant 0 : index
    %124 = vector.load %arg4[%c1_100, %c0_101, %c0_102] : memref<2x8x256xbf16, #tpu.memory_space<vmem>>, vector<1x8x256xbf16>
    %125 = vector.shape_cast %124 : vector<1x8x256xbf16> to vector<8x256xbf16>
    %126 = vector.shape_cast %123 : vector<8x256xbf16> to vector<1x8x256xbf16>
    tpu.vector_store %arg4[%c1_100, %c0_101, %c0_102], %126 {strides = array<i32>} : memref<2x8x256xbf16, #tpu.memory_space<vmem>>, vector<1x8x256xbf16>,
    %127 = tpu.concatenate %118, %122 in 1 : vector<8x1xf32>, vector<8x1xf32> -> vector<8x2xf32>
    %c0_103 = arith.constant 0 : index
    %c0_104 = arith.constant 0 : index
    %c0_105 = arith.constant 0 : index
    %c0_106 = arith.constant 0 : index
    %128 = vector.load %arg5[%c0_103, %c0_104, %c0_105, %c0_106] : memref<1x1x8x2xf32, #tpu.memory_space<vmem>>, vector<1x1x8x2xf32>
    %129 = vector.shape_cast %128 : vector<1x1x8x2xf32> to vector<8x2xf32>
    %130 = vector.shape_cast %127 : vector<8x2xf32> to vector<1x1x8x2xf32>
    tpu.vector_store %arg5[%c0_103, %c0_104, %c0_105, %c0_106], %130 {strides = array<i32>} : memref<1x1x8x2xf32, #tpu.memory_space<vmem>>, vector<1x1x8x2xf32>,
    return
  }
  func.func @transform_0(%arg0: i32, %arg1: i32) -> (i32, i32, i32, i32) {
    %c0_i32 = arith.constant 0 : i32
    %c0_i32_0 = arith.constant 0 : i32
    %c0_i32_1 = arith.constant 0 : i32
    %c0_i32_2 = arith.constant 0 : i32
    return %arg0, %c0_i32, %c0_i32_0, %c0_i32_1 : i32, i32, i32, i32
  }
  func.func @transform_1(%arg0: i32, %arg1: i32) -> (i32, i32) {
    %c0_i32 = arith.constant 0 : i32
    %c0_i32_0 = arith.constant 0 : i32
    %c0_i32_1 = arith.constant 0 : i32
    return %c0_i32, %c0_i32_0 : i32, i32
  }
  func.func @transform_2(%arg0: i32, %arg1: i32) -> (i32, i32, i32) {
    %c0_i32 = arith.constant 0 : i32
    %c0_i32_0 = arith.constant 0 : i32
    return %arg0, %c0_i32, %arg1 : i32, i32, i32
  }
  func.func @transform_3(%arg0: i32, %arg1: i32) -> (i32, i32, i32, i32) {
    %c0_i32 = arith.constant 0 : i32
    %c0_i32_0 = arith.constant 0 : i32
    %c0_i32_1 = arith.constant 0 : i32
    return %arg0, %arg1, %c0_i32, %c0_i32_0 : i32, i32, i32, i32
  }
}

</mosaic_0001>

<bundles_post_ra>
// kernel: tpu_custom_call.1
= control target key start
LH: loop header
LB: loop body
LE: loop exit
PB: predicated region body
PF: predicated region fallthrough
CT: control target
= control target key end

     0   :  { %vm212_vm0 = vsmask.f32 3328  ;;  %vm213_vm1 = vsmask.f32 7440  ;;  %s7726_s9 = smov 4   ;;  %vm808_vm3 = vcmask 1042432   ;;  %s11535_s0 = inlined_call_operand.vmem [shape: bf16[2,18,18,4], index: 0, kind: input, shape index: {}]   ;;  %s11536_s1 = inlined_call_operand.vmem [shape: bf16[8,36], index: 1, kind: input, shape index: {}]   ;;  %s11537_s2 = inlined_call_operand.hbm [shape: bf16[2,8,256], index: 2, kind: output, shape index: {0}]   ;;  %s11538_s3 = inlined_call_operand.vmem [shape: f32[1,1,8,2], index: 3, kind: output, shape index: {1}]  }
   0x1   :  { %v170_v0 = vld [vmem:[%s11535_s0 + $0x18] sm:$0xf]  ;;  %v171_v1 = vld [vmem:[%s11535_s0 + $0x1c] sm:$0xf]  ;;  %v172_v2 = vld [vmem:[%s11535_s0 + $0x20] sm:$0x1] }
   0x2   :  { %v264_v3 = vshrl.u32 %v170_v0, 16  ;;  %v267_v4 = vshll.u32 %v170_v0, 16  ;;  %v273_v5 = vshll.u32 %v171_v1, 16  ;;  %v277_v6 = vshrl.u32 %v171_v1, 16  ;;  %v164_v8 = vld [vmem:[%s11535_s0] sm:$0xf]  ;;  %vm7779_vm2 = vmor %vm212_vm0, %vm213_vm1 }
   0x3   :  { %v283_v7 = vshll.u32 %v172_v2, 16  ;;  %v165_v11 = vld [vmem:[%s11535_s0 + $0x4] sm:$0xf]  ;;  %v166_v12 = vld [vmem:[%s11535_s0 + $0x8] sm:$0x1]  ;;  %v216_v16 = vshrl.u32 %v164_v8, 16 }
   0x4   :  { %v266_v9 = vrot.slane %v264_v3, 4  ;;  %v269_v10 = vrot.slane %v267_v4, 5  ;;  %v275_v13 = vrot.slane %v273_v5, 5  ;;  %v279_v14 = vrot.slane %v277_v6, 4  ;;  %v173_v17 = vld [vmem:[%s11535_s0 + $0x24] sm:$0xf] }
   0x5   :  { %v285_v15 = vrot.slane %v283_v7, 5  ;;  %v219_v19 = vshll.u32 %v164_v8, 16  ;;  %v225_v20 = vshll.u32 %v165_v11, 16  ;;  %v229_v21 = vshrl.u32 %v165_v11, 16  ;;  %v174_v26 = vld [vmem:[%s11535_s0 + $0x28] sm:$0xf] }
   0x6   :  { %v270_v18 = vor.u32 %v269_v10, %v266_v9  ;;  %v280_v23 = vor.u32 %v279_v14, %v275_v13  ;;  %v218_v24 = vrot.slane %v216_v16, 4  ;;  %v235_v25 = vshll.u32 %v166_v12, 16  ;;  %v175_v32 = vld [vmem:[%s11535_s0 + $0x2c] sm:$0x1]  ;;  %v168_v46 = vld [vmem:[%s11535_s0 + $0x10] sm:$0xf] }
   0x7   :  { %v288_v27 = vshrl.u32 %v173_v17, 16  ;;  %v221_v29 = vrot.slane %v219_v19, 5  ;;  %v227_v30 = vrot.slane %v225_v20, 5  ;;  %v231_v31 = vrot.slane %v229_v21, 4  ;;  %v167_v41 = vld [vmem:[%s11535_s0 + $0xc] sm:$0xf] }
   0x8   :  { %v271_v28 = vrot.slane %v270_v18, 4  ;;  %v281_v33 = vrot.slane %v280_v23, 4  ;;  %v237_v34 = vrot.slane %v235_v25, 5  ;;  %v291_v36 = vshll.u32 %v173_v17, 16  ;;  %v169_v54 = vld [vmem:[%s11535_s0 + $0x14] sm:$0x1] }
   0x9   :  { %v290_v35 = vrot.slane %v288_v27, 4  ;;  %v222_v38 = vor.u32 %v221_v29, %v218_v24  ;;  %v232_v39 = vor.u32 %v231_v31, %v227_v30  ;;  %v297_v40 = vshll.u32 %v174_v26, 16  ;;  %v179_v60 = vld [vmem:[%s11535_s0 + $0x3c] sm:$0xf]  ;;  %v180_v1 = vld [vmem:[%s11535_s0 + $0x40] sm:$0xf] }
   0xa   :  { %v276_v37 = vsel %vm7779_vm2, %v271_v28, %v275_v13  ;;  %v286_v42 = vsel %vm7779_vm2, %v281_v33, %v285_v15  ;;  %v293_v43 = vrot.slane %v291_v36, 5  ;;  %v301_v44 = vshrl.u32 %v174_v26, 16  ;;  %v181_v8 = vld [vmem:[%s11535_s0 + $0x44] sm:$0x1]  ;;  %v176_v15 = vld [vmem:[%s11535_s0 + $0x30] sm:$0xf] }
   0xb   :  { %v307_v45 = vshll.u32 %v175_v32, 16  ;;  %v6532_v47 = vcombine.low %v276_v37, %v286_v42  ;;  %v223_v48 = vrot.slane %v222_v38, 4  ;;  %v233_v49 = vrot.slane %v232_v39, 4  ;;  %v177_v20 = vld [vmem:[%s11535_s0 + $0x34] sm:$0xf]  ;;  %s7727_s26 = smov 8  }
   0xc   :  { %v299_v50 = vrot.slane %v297_v40, 5  ;;  %v294_v51 = vor.u32 %v293_v43, %v290_v35  ;;  %v303_v52 = vrot.slane %v301_v44, 4  ;;  %v240_v55 = vshrl.u32 %v167_v41, 16  ;;  %v178_v32 = vld [vmem:[%s11535_s0 + $0x38] sm:$0x1]  ;;  %s7728_s28 = smov 12  }
   0xd   :  { %v309_v53 = vrot.slane %v307_v45, 5  ;;  %651 = vrot.lane.b32.xlu1 %v6532_v47, %s7726_s9  ;;  %v228_v56 = vsel %vm7779_vm2, %v223_v48, %v227_v30  ;;  %v238_v57 = vsel %vm7779_vm2, %v233_v49, %v237_v34  ;;  %v243_v58 = vshll.u32 %v167_v41, 16  ;;  %v185_v39 = vld [vmem:[%s11535_s0 + $0x54] sm:$0xf]  ;;  %v186_v44 = vld [vmem:[%s11535_s0 + $0x58] sm:$0xf] }
   0xe   :  { %v249_v59 = vshll.u32 %v168_v46, 16  ;;  %v6530_v61 = vcombine.low %v228_v56, %v238_v57  ;;  %v295_v62 = vrot.slane %v294_v51, 4  ;;  %v304_v63 = vor.u32 %v303_v52, %v299_v50  ;;  %v187_v51 = vld [vmem:[%s11535_s0 + $0x5c] sm:$0x1]  ;;  %s7729_s15 = smov 16   ;;  %s7730_s18 = smov 20  }
   0xf   :  { %v242_v0 = vrot.slane %v240_v55, 4  ;;  %v245_v2 = vrot.slane %v243_v58, 5  ;;  %v253_v4 = vshrl.u32 %v168_v46, 16  ;;  %v259_v5 = vshll.u32 %v169_v54, 16  ;;  %v182_v58 = vld [vmem:[%s11535_s0 + $0x48] sm:$0xf] }
  0x10   :  { %v251_v3 = vrot.slane %v249_v59, 5  ;;  %647 = vrot.lane.b32.xlu0 %v6530_v61, %s7726_s9  ;;  %v300_v6 = vsel %vm7779_vm2, %v295_v62, %v299_v50  ;;  %v305_v7 = vrot.slane %v304_v63, 4  ;;  %v336_v9 = vshrl.u32 %v179_v60, 16  ;;  %v183_v63 = vld [vmem:[%s11535_s0 + $0x4c] sm:$0xf]  ;;  %s7731_s23 = smov 24  }
  0x11   :  { %v339_v10 = vshll.u32 %v179_v60, 16  ;;  %v246_v11 = vor.u32 %v245_v2, %v242_v0  ;;  %v255_v12 = vrot.slane %v253_v4, 4  ;;  %v261_v13 = vrot.slane %v259_v5, 5  ;;  %s7732_s10 = smov 28   ;;  %s7733_s24 = smov 32  }
  0x12   :  { %v345_v14 = vshll.u32 %v180_v1, 16  ;;  %v310_v16 = vsel %vm7779_vm2, %v305_v7, %v309_v53  ;;  %v338_v17 = vrot.slane %v336_v9, 4  ;;  %v349_v19 = vshrl.u32 %v180_v1, 16 }
  0x13   :  { %v341_v18 = vrot.slane %v339_v10, 5  ;;  %v6533_v21 = vcombine.low %v300_v6, %v310_v16  ;;  %v247_v23 = vrot.slane %v246_v11, 4  ;;  %v256_v24 = vor.u32 %v255_v12, %v251_v3  ;;  %v184_v11 = vld [vmem:[%s11535_s0 + $0x50] sm:$0x1] }
  0x14   :  { %v347_v25 = vrot.slane %v345_v14, 5  ;;  %v351_v27 = vrot.slane %v349_v19, 4  ;;  %v355_v28 = vshll.u32 %v181_v8, 16  ;;  %v312_v29 = vshrl.u32 %v176_v15, 16 }
  0x15   :  { %v342_v26 = vor.u32 %v341_v18, %v338_v17  ;;  %653 = vrot.lane.b32.xlu1 %v6533_v21, %s7726_s9  ;;  %v252_v30 = vsel %vm7779_vm2, %v247_v23, %v251_v3  ;;  %v257_v31 = vrot.slane %v256_v24, 4  ;;  %v315_v33 = vshll.u32 %v176_v15, 16  ;;  %v192_v18 = vld [vmem:[%s11535_s0 + $0x70] sm:$0xf] }
  0x16   :  { %v321_v34 = vshll.u32 %v177_v20, 16  ;;  %v352_v36 = vor.u32 %v351_v27, %v347_v25  ;;  %v357_v37 = vrot.slane %v355_v28, 5  ;;  %v314_v38 = vrot.slane %v312_v29, 4 }
  0x17   :  { %v343_v35 = vrot.slane %v342_v26, 4  ;;  %v262_v40 = vsel %vm7779_vm2, %v257_v31, %v261_v13  ;;  %v317_v41 = vrot.slane %v315_v33, 5  ;;  %v325_v43 = vshrl.u32 %v177_v20, 16  ;;  %v191_v13 = vld [vmem:[%s11535_s0 + $0x6c] sm:$0xf] }
  0x18   :  { %v323_v42 = vrot.slane %v321_v34, 5  ;;  %v6531_v45 = vcombine.low %v252_v30, %v262_v40  ;;  %v353_v47 = vrot.slane %v352_v36, 4  ;;  %v331_v48 = vshll.u32 %v178_v32, 16  ;;  %v193_v30 = vld [vmem:[%s11535_s0 + $0x74] sm:$0x1] }
  0x19   :  { %v348_v46 = vsel %vm7779_vm2, %v343_v35, %v347_v25  ;;  %v318_v49 = vor.u32 %v317_v41, %v314_v38  ;;  %v327_v50 = vrot.slane %v325_v43, 4  ;;  %v384_v52 = vshrl.u32 %v185_v39, 16  ;;  %v188_v33 = vld [vmem:[%s11535_s0 + $0x60] sm:$0xf]  ;;  %v189_v38 = vld [vmem:[%s11535_s0 + $0x64] sm:$0xf] }
  0x1a   :  { %v387_v53 = vshll.u32 %v185_v39, 16  ;;  %649 = vrot.lane.b32.xlu0 %v6531_v45, %s7726_s9  ;;  %v358_v54 = vsel %vm7779_vm2, %v353_v47, %v357_v37  ;;  %v333_v55 = vrot.slane %v331_v48, 5  ;;  %v393_v56 = vshll.u32 %v186_v44, 16 }
  0x1b   :  { %v397_v57 = vshrl.u32 %v186_v44, 16  ;;  %v6535_v59 = vcombine.low %v348_v46, %v358_v54  ;;  %v319_v60 = vrot.slane %v318_v49, 4  ;;  %v328_v61 = vor.u32 %v327_v50, %v323_v42  ;;  %v190_v46 = vld [vmem:[%s11535_s0 + $0x68] sm:$0x1] }
  0x1c   :  { %v386_v62 = vrot.slane %v384_v52, 4  ;;  %v389_v0 = vrot.slane %v387_v53, 5  ;;  %v395_v1 = vrot.slane %v393_v56, 5  ;;  %v403_v3 = vshll.u32 %v187_v51, 16  ;;  %v197_v52 = vld [vmem:[%s11535_s0 + $0x84] sm:$0xf] }
  0x1d   :  { %v399_v2 = vrot.slane %v397_v57, 4  ;;  %657 = vrot.lane.b32.xlu1 %v6535_v59, %s7726_s9  ;;  %v324_v4 = vsel %vm7779_vm2, %v319_v60, %v323_v42  ;;  %v329_v5 = vrot.slane %v328_v61, 4  ;;  %v360_v6 = vshrl.u32 %v182_v58, 16  ;;  %v198_v61 = vld [vmem:[%s11535_s0 + $0x88] sm:$0xf] }
  0x1e   :  { %v363_v7 = vshll.u32 %v182_v58, 16  ;;  %v390_v8 = vor.u32 %v389_v0, %v386_v62  ;;  %v405_v10 = vrot.slane %v403_v3, 5  ;;  %v369_v12 = vshll.u32 %v183_v63, 16 }
  0x1f   :  { %v400_v9 = vor.u32 %v399_v2, %v395_v1  ;;  %v334_v14 = vsel %vm7779_vm2, %v329_v5, %v333_v55  ;;  %v362_v15 = vrot.slane %v360_v6, 4  ;;  %v373_v17 = vshrl.u32 %v183_v63, 16  ;;  %v199_v5 = vld [vmem:[%s11535_s0 + $0x8c] sm:$0x1] }
  0x20   :  { %v365_v16 = vrot.slane %v363_v7, 5  ;;  %v6534_v19 = vcombine.low %v324_v4, %v334_v14  ;;  %v391_v20 = vrot.slane %v390_v8, 4  ;;  %v371_v23 = vrot.slane %v369_v12, 5 }
  0x21   :  { %v401_v21 = vrot.slane %v400_v9, 4  ;;  %v375_v25 = vrot.slane %v373_v17, 4  ;;  %v379_v26 = vshll.u32 %v184_v11, 16  ;;  %v432_v27 = vshrl.u32 %v191_v13, 16  ;;  %v194_v11 = vld [vmem:[%s11535_s0 + $0x78] sm:$0xf] }
  0x22   :  { %v366_v24 = vor.u32 %v365_v16, %v362_v15  ;;  %655 = vrot.lane.b32.xlu0 %v6534_v19, %s7726_s9  ;;  %v396_v28 = vsel %vm7779_vm2, %v391_v20, %v395_v1  ;;  %v435_v31 = vshll.u32 %v191_v13, 16  ;;  %v441_v32 = vshll.u32 %v192_v18, 16  ;;  %v195_v16 = vld [vmem:[%s11535_s0 + $0x7c] sm:$0xf] }
  0x23   :  { %v406_v29 = vsel %vm7779_vm2, %v401_v21, %v405_v10  ;;  %v376_v36 = vor.u32 %v375_v25, %v371_v23  ;;  %v381_v37 = vrot.slane %v379_v26, 5  ;;  %v434_v39 = vrot.slane %v432_v27, 4  ;;  %v196_v25 = vld [vmem:[%s11535_s0 + $0x80] sm:$0x1] }
  0x24   :  { %v6537_v34 = vcombine.low %v396_v28, %v406_v29  ;;  %v367_v35 = vrot.slane %v366_v24, 4  ;;  %v437_v40 = vrot.slane %v435_v31, 5  ;;  %v443_v41 = vrot.slane %v441_v32, 5  ;;  %v203_v31 = vld [vmem:[%s11535_s0 + $0x9c] sm:$0xf] }
  0x25   :  { %v445_v42 = vshrl.u32 %v192_v18, 16  ;;  %v377_v44 = vrot.slane %v376_v36, 4  ;;  %v451_v45 = vshll.u32 %v193_v30, 16  ;;  %v408_v47 = vshrl.u32 %v188_v33, 16  ;;  %v204_v36 = vld [vmem:[%s11535_s0 + $0xa0] sm:$0xf] }
  0x26   :  { %661 = vrot.lane.b32.xlu1 %v6537_v34, %s7726_s9  ;;  %v372_v43 = vsel %vm7779_vm2, %v367_v35, %v371_v23  ;;  %v438_v48 = vor.u32 %v437_v40, %v434_v39  ;;  %v411_v50 = vshll.u32 %v188_v33, 16  ;;  %v417_v51 = vshll.u32 %v189_v38, 16 }
  0x27   :  { %v447_v49 = vrot.slane %v445_v42, 4  ;;  %v382_v53 = vsel %vm7779_vm2, %v377_v44, %v381_v37  ;;  %v453_v54 = vrot.slane %v451_v45, 5  ;;  %v410_v55 = vrot.slane %v408_v47, 4 }
  0x28   :  { %v421_v56 = vshrl.u32 %v189_v38, 16  ;;  %v6536_v57 = vcombine.low %v372_v43, %v382_v53  ;;  %v439_v58 = vrot.slane %v438_v48, 4  ;;  %v413_v60 = vrot.slane %v411_v50, 5  ;;  %v205_v43 = vld [vmem:[%s11535_s0 + $0xa4] sm:$0x1] }
  0x29   :  { %v448_v59 = vor.u32 %v447_v49, %v443_v41  ;;  %v419_v62 = vrot.slane %v417_v51, 5  ;;  %v427_v0 = vshll.u32 %v190_v46, 16  ;;  %v480_v1 = vshrl.u32 %v197_v52, 16  ;;  %v200_v50 = vld [vmem:[%s11535_s0 + $0x90] sm:$0xf] }
  0x2a   :  { %v423_v63 = vrot.slane %v421_v56, 4  ;;  %659 = vrot.lane.b32.xlu0 %v6536_v57, %s7726_s9  ;;  %v444_v2 = vsel %vm7779_vm2, %v439_v58, %v443_v41  ;;  %v414_v4 = vor.u32 %v413_v60, %v410_v55  ;;  %v483_v6 = vshll.u32 %v197_v52, 16  ;;  %v201_v55 = vld [vmem:[%s11535_s0 + $0x94] sm:$0xf] }
  0x2b   :  { %v449_v3 = vrot.slane %v448_v59, 4  ;;  %v429_v8 = vrot.slane %v427_v0, 5  ;;  %v482_v9 = vrot.slane %v480_v1, 4  ;;  %v489_v10 = vshll.u32 %v198_v61, 16 }
  0x2c   :  { %v424_v7 = vor.u32 %v423_v63, %v419_v62  ;;  %v415_v13 = vrot.slane %v414_v4, 4  ;;  %v485_v14 = vrot.slane %v483_v6, 5  ;;  %v493_v15 = vshrl.u32 %v198_v61, 16 }
  0x2d   :  { %v454_v12 = vsel %vm7779_vm2, %v449_v3, %v453_v54  ;;  %v491_v19 = vrot.slane %v489_v10, 5  ;;  %v499_v20 = vshll.u32 %v199_v5, 16  ;;  %v456_v26 = vshrl.u32 %v194_v11, 16 }
  0x2e   :  { %v6539_v17 = vcombine.low %v444_v2, %v454_v12  ;;  %v425_v18 = vrot.slane %v424_v7, 4  ;;  %v420_v21 = vsel %vm7779_vm2, %v415_v13, %v419_v62  ;;  %v486_v23 = vor.u32 %v485_v14, %v482_v9  ;;  %v202_v2 = vld [vmem:[%s11535_s0 + $0x98] sm:$0x1]  ;;  %v209_v9 = vld [vmem:[%s11535_s0 + $0xb4] sm:$0xf] }
  0x2f   :  { %v495_v24 = vrot.slane %v493_v15, 4  ;;  %v501_v28 = vrot.slane %v499_v20, 5  ;;  %v459_v29 = vshll.u32 %v194_v11, 16  ;;  %v465_v30 = vshll.u32 %v195_v16, 16  ;;  %v210_v14 = vld [vmem:[%s11535_s0 + $0xb8] sm:$0xf] }
  0x30   :  { %665 = vrot.lane.b32.xlu1 %v6539_v17, %s7726_s9  ;;  %v430_v27 = vsel %vm7779_vm2, %v425_v18, %v429_v8  ;;  %v487_v33 = vrot.slane %v486_v23, 4  ;;  %v458_v35 = vrot.slane %v456_v26, 4  ;;  %v469_v39 = vshrl.u32 %v195_v16, 16 }
  0x31   :  { %v6538_v32 = vcombine.low %v420_v21, %v430_v27  ;;  %v496_v34 = vor.u32 %v495_v24, %v491_v19  ;;  %v461_v37 = vrot.slane %v459_v29, 5  ;;  %v467_v38 = vrot.slane %v465_v30, 5  ;;  %v211_v21 = vld [vmem:[%s11535_s0 + $0xbc] sm:$0x1]  ;;  %v206_v29 = vld [vmem:[%s11535_s0 + $0xa8] sm:$0xf] }
  0x32   :  { %v475_v40 = vshll.u32 %v196_v25, 16  ;;  %v492_v41 = vsel %vm7779_vm2, %v487_v33, %v491_v19  ;;  %v528_v44 = vshrl.u32 %v203_v31, 16  ;;  %v531_v45 = vshll.u32 %v203_v31, 16 }
  0x33   :  { %663 = vrot.lane.b32.xlu0 %v6538_v32, %s7726_s9  ;;  %v497_v42 = vrot.slane %v496_v34, 4  ;;  %v462_v46 = vor.u32 %v461_v37, %v458_v35  ;;  %v471_v47 = vrot.slane %v469_v39, 4  ;;  %v537_v49 = vshll.u32 %v204_v36, 16  ;;  %v207_v34 = vld [vmem:[%s11535_s0 + $0xac] sm:$0xf] }
  0x34   :  { %v477_v48 = vrot.slane %v475_v40, 5  ;;  %v530_v52 = vrot.slane %v528_v44, 4  ;;  %v533_v53 = vrot.slane %v531_v45, 5  ;;  %v541_v54 = vshrl.u32 %v204_v36, 16 }
  0x35   :  { %v502_v51 = vsel %vm7779_vm2, %v497_v42, %v501_v28  ;;  %v463_v57 = vrot.slane %v462_v46, 4  ;;  %v472_v58 = vor.u32 %v471_v47, %v467_v38  ;;  %v539_v59 = vrot.slane %v537_v49, 5  ;;  %v208_v46 = vld [vmem:[%s11535_s0 + $0xb0] sm:$0x1] }
  0x36   :  { %v6541_v56 = vcombine.low %v492_v41, %v502_v51  ;;  %v534_v60 = vor.u32 %v533_v53, %v530_v52  ;;  %v543_v61 = vrot.slane %v541_v54, 4  ;;  %v547_v62 = vshll.u32 %v205_v43, 16  ;;  %v716_v53 = vld [vmem:[%s11535_s0 + $0x10] sm:$0xf]  ;;  %v717_v54 = vld [vmem:[%s11535_s0 + $0x14] sm:$0x1] }
  0x37   :  { %v504_v63 = vshrl.u32 %v200_v50, 16  ;;  %v468_v0 = vsel %vm7779_vm2, %v463_v57, %v467_v38  ;;  %v473_v1 = vrot.slane %v472_v58, 4  ;;  %v507_v3 = vshll.u32 %v200_v50, 16 }
  0x38   :  { %669 = vrot.lane.b32.xlu1 %v6541_v56, %s7726_s9  ;;  %v513_v4 = vshll.u32 %v201_v55, 16  ;;  %v535_v5 = vrot.slane %v534_v60, 4  ;;  %v544_v6 = vor.u32 %v543_v61, %v539_v59  ;;  %v549_v7 = vrot.slane %v547_v62, 5  ;;  %v713_v60 = vld [vmem:[%s11535_s0 + $0x4] sm:$0xf] }
  0x39   :  { %v506_v8 = vrot.slane %v504_v63, 4  ;;  %v478_v10 = vsel %vm7779_vm2, %v473_v1, %v477_v48  ;;  %v509_v11 = vrot.slane %v507_v3, 5  ;;  %v517_v13 = vshrl.u32 %v201_v55, 16  ;;  %v715_v48 = vld [vmem:[%s11535_s0 + $0xc] sm:$0xe] }
  0x3a   :  { %v515_v12 = vrot.slane %v513_v4, 5  ;;  %v6540_v15 = vcombine.low %v468_v0, %v478_v10  ;;  %v540_v16 = vsel %vm7779_vm2, %v535_v5, %v539_v59  ;;  %v545_v17 = vrot.slane %v544_v6, 4  ;;  %v712_v55 = vld [vmem:[%s11535_s0] sm:$0xe]  ;;  %v714_v0 = vld [vmem:[%s11535_s0 + $0x8] sm:$0x1] }
  0x3b   :  { %v523_v18 = vshll.u32 %v202_v2, 16  ;;  %v510_v19 = vor.u32 %v509_v11, %v506_v8  ;;  %v519_v20 = vrot.slane %v517_v13, 4  ;;  %v576_v23 = vshrl.u32 %v209_v9, 16  ;;  %v721_v4 = vld [vmem:[%s11535_s0 + $0x24] sm:$0xe] }
  0x3c   :  { %v579_v24 = vshll.u32 %v209_v9, 16  ;;  %667 = vrot.lane.b32.xlu0 %v6540_v15, %s7726_s9  ;;  %v550_v25 = vsel %vm7779_vm2, %v545_v17, %v549_v7  ;;  %v585_v27 = vshll.u32 %v210_v14, 16  ;;  %v589_v28 = vshrl.u32 %v210_v14, 16  ;;  %v722_v5 = vld [vmem:[%s11535_s0 + $0x28] sm:$0xf] }
  0x3d   :  { %v525_v26 = vrot.slane %v523_v18, 5  ;;  %v6543_v30 = vcombine.low %v540_v16, %v550_v25  ;;  %v511_v31 = vrot.slane %v510_v19, 4  ;;  %v520_v32 = vor.u32 %v519_v20, %v515_v12  ;;  %v723_v11 = vld [vmem:[%s11535_s0 + $0x2c] sm:$0x1]  ;;  %v719_v17 = vld [vmem:[%s11535_s0 + $0x1c] sm:$0xf] }
  0x3e   :  { %v578_v33 = vrot.slane %v576_v23, 4  ;;  %v581_v35 = vrot.slane %v579_v24, 5  ;;  %v587_v36 = vrot.slane %v585_v27, 5  ;;  %v591_v37 = vrot.slane %v589_v28, 4  ;;  %v720_v23 = vld [vmem:[%s11535_s0 + $0x20] sm:$0x1] }
  0x3f   :  { %v595_v38 = vshll.u32 %v211_v21, 16  ;;  %673 = vrot.lane.b32.xlu1 %v6543_v30, %s7726_s9  ;;  %v516_v39 = vsel %vm7779_vm2, %v511_v31, %v515_v12  ;;  %v521_v40 = vrot.slane %v520_v32, 4  ;;  %v552_v41 = vshrl.u32 %v206_v29, 16  ;;  %v718_v12 = vld [vmem:[%s11535_s0 + $0x18] sm:$0xe] }
  0x40   :  { %v555_v42 = vshll.u32 %v206_v29, 16  ;;  %v582_v43 = vor.u32 %v581_v35, %v578_v33  ;;  %v592_v44 = vor.u32 %v591_v37, %v587_v36  ;;  %v561_v47 = vshll.u32 %v207_v34, 16  ;;  %v727_v24 = vld [vmem:[%s11535_s0 + $0x3c] sm:$0xe]  ;;  %v728_v29 = vld [vmem:[%s11535_s0 + $0x40] sm:$0xf] }
  0x41   :  { %v597_v45 = vrot.slane %v595_v38, 5  ;;  %v526_v49 = vsel %vm7779_vm2, %v521_v40, %v525_v26  ;;  %v554_v50 = vrot.slane %v552_v41, 4  ;;  %v565_v52 = vshrl.u32 %v207_v34, 16  ;;  %v729_v30 = vld [vmem:[%s11535_s0 + $0x44] sm:$0x1] }
  0x42   :  { %v557_v51 = vrot.slane %v555_v42, 5  ;;  %v6542_v56 = vcombine.low %v516_v39, %v526_v49  ;;  %v583_v57 = vrot.slane %v582_v43, 4  ;;  %v593_v58 = vrot.slane %v592_v44, 4  ;;  %v724_v31 = vld [vmem:[%s11535_s0 + $0x30] sm:$0xe] }
  0x43   :  { %v563_v59 = vrot.slane %v561_v47, 5  ;;  %v567_v62 = vrot.slane %v565_v52, 4  ;;  %v571_v63 = vshll.u32 %v208_v46, 16  ;;  %vm809_vm4 = vcmask 1046532   ;;  %v726_v37 = vld [vmem:[%s11535_s0 + $0x38] sm:$0x1] }
  0x44   :  { %v558_v61 = vor.u32 %v557_v51, %v554_v50  ;;  %671 = vrot.lane.b32.xlu0 %v6542_v56, %s7726_s9  ;;  %v588_v1 = vsel %vm7779_vm2, %v583_v57, %v587_v36  ;;  %v598_v2 = vsel %vm7779_vm2, %v593_v58, %v597_v45  ;;  %v6547_v3 = vrot.slane %v715_v48, 9  ;;  %vm8004_vm5 = vmor %vm808_vm3, %vm809_vm4  ;;  %v725_v36 = vld [vmem:[%s11535_s0 + $0x34] sm:$0xf]  ;;  %v734_v47 = vld [vmem:[%s11535_s0 + $0x58] sm:$0xf] }
  0x45   :  { %v6545_v6 = vcombine.low %v588_v1, %v598_v2  ;;  %v568_v8 = vor.u32 %v567_v62, %v563_v59  ;;  %v573_v9 = vrot.slane %v571_v63, 5  ;;  %v820_v13 = vrot.slane %v716_v53, 5  ;;  %v733_v42 = vld [vmem:[%s11535_s0 + $0x54] sm:$0xe]  ;;  %v735_v48 = vld [vmem:[%s11535_s0 + $0x5c] sm:$0x1] }
  0x46   :  { %v559_v7 = vrot.slane %v558_v61, 4  ;;  %v823_v14 = vrot.slane %v717_v54, 5  ;;  %v6546_v15 = vrot.slane %v712_v55, 9  ;;  %v813_v16 = vrot.slane %v713_v60, 5  ;;  %v730_v53 = vld [vmem:[%s11535_s0 + $0x48] sm:$0xe] }
  0x47   :  { %677 = vrot.lane.b32.xlu1 %v6545_v6, %s7726_s9  ;;  %v569_v19 = vrot.slane %v568_v8, 4  ;;  %v816_v20 = vrot.slane %v714_v0, 5  ;;  %v6549_v21 = vrot.slane %v721_v4, 9  ;;  %v821_v25 = vsel %vm8004_vm5, %v6547_v3, %v820_v13  ;;  %v731_v54 = vld [vmem:[%s11535_s0 + $0x4c] sm:$0xf] }
  0x48   :  { %v564_v18 = vsel %vm7779_vm2, %v559_v7, %v563_v59  ;;  %v822_v26 = vrot.slane %v820_v13, 4  ;;  %v814_v27 = vsel %vm8004_vm5, %v6546_v15, %v813_v16  ;;  %v815_v28 = vrot.slane %v813_v16, 4  ;;  %v732_v55 = vld [vmem:[%s11535_s0 + $0x50] sm:$0x1]  ;;  %v739_v0 = vld [vmem:[%s11535_s0 + $0x6c] sm:$0xe] }
  0x49   :  { %v574_v32 = vsel %vm7779_vm2, %v569_v19, %v573_v9  ;;  %v834_v33 = vrot.slane %v722_v5, 5  ;;  %v837_v34 = vrot.slane %v723_v11, 5  ;;  %v6548_v35 = vrot.slane %v718_v12, 9  ;;  %v740_v5 = vld [vmem:[%s11535_s0 + $0x70] sm:$0xf] }
  0x4a   :  { %v6544_v38 = vcombine.low %v564_v18, %v574_v32  ;;  %v824_v39 = vsel %vm8004_vm5, %v822_v26, %v823_v14  ;;  %v817_v40 = vsel %vm8004_vm5, %v815_v28, %v816_v20  ;;  %v827_v41 = vrot.slane %v719_v17, 5  ;;  %v741_v6 = vld [vmem:[%s11535_s0 + $0x74] sm:$0x1]  ;;  %v736_v7 = vld [vmem:[%s11535_s0 + $0x60] sm:$0xe] }
  0x4b   :  { %v6563_v43 = vcombine.low %v821_v25, %v824_v39  ;;  %v6562_v44 = vcombine.low %v814_v27, %v817_v40  ;;  %v835_v45 = vsel %vm8004_vm5, %v6549_v21, %v834_v33  ;;  %v836_v46 = vrot.slane %v834_v33, 4  ;;  %v737_v13 = vld [vmem:[%s11535_s0 + $0x64] sm:$0xf]  ;;  %v738_v14 = vld [vmem:[%s11535_s0 + $0x68] sm:$0x1] }
  0x4c   :  { %675 = vrot.lane.b32.xlu0 %v6544_v38, %s7726_s9  ;;  %v828_v49 = vsel %vm8004_vm5, %v6548_v35, %v827_v41  ;;  %v829_v50 = vrot.slane %v827_v41, 4  ;;  %v830_v51 = vrot.slane %v720_v23, 5  ;;  %v6551_v52 = vrot.slane %v727_v24, 9  ;;  %v745_v19 = vld [vmem:[%s11535_s0 + $0x84] sm:$0xe] }
  0x4d   :  { %973 = vrot.lane.b32.xlu1 %v6563_v43, %s7727_s26  ;;  %v838_v56 = vsel %vm8004_vm5, %v836_v46, %v837_v34  ;;  %v848_v57 = vrot.slane %v728_v29, 5  ;;  %v851_v58 = vrot.slane %v729_v30, 5  ;;  %v6550_v59 = vrot.slane %v724_v31, 9  ;;  %v746_v25 = vld [vmem:[%s11535_s0 + $0x88] sm:$0xf] }
  0x4e   :  { %v6565_v60 = vcombine.low %v835_v45, %v838_v56  ;;  %v831_v61 = vsel %vm8004_vm5, %v829_v50, %v830_v51  ;;  %v841_v62 = vrot.slane %v725_v36, 5  ;;  %v844_v63 = vrot.slane %v726_v37, 5  ;;  %v747_v26 = vld [vmem:[%s11535_s0 + $0x8c] sm:$0x1]  ;;  %v742_v31 = vld [vmem:[%s11535_s0 + $0x78] sm:$0xe] }
  0x4f   :  { %v6564_v1 = vcombine.low %v828_v49, %v831_v61  ;;  %v849_v2 = vsel %vm8004_vm5, %v6551_v52, %v848_v57  ;;  %v850_v3 = vrot.slane %v848_v57, 4  ;;  %v6553_v4 = vrot.slane %v733_v42, 9  ;;  %v743_v32 = vld [vmem:[%s11535_s0 + $0x7c] sm:$0xf]  ;;  %v744_v37 = vld [vmem:[%s11535_s0 + $0x80] sm:$0x1] }
  0x50   :  { %971 = vrot.lane.b32.xlu0 %v6562_v44, %s7727_s26  ;;  %v842_v8 = vsel %vm8004_vm5, %v6550_v59, %v841_v62  ;;  %v843_v9 = vrot.slane %v841_v62, 4  ;;  %v862_v11 = vrot.slane %v734_v47, 5  ;;  %v865_v12 = vrot.slane %v735_v48, 5  ;;  %v751_v42 = vld [vmem:[%s11535_s0 + $0x9c] sm:$0xe] }
  0x51   :  { %977 = vrot.lane.b32.xlu1 %v6565_v60, %s7727_s26  ;;  %v852_v15 = vsel %vm8004_vm5, %v850_v3, %v851_v58  ;;  %v6552_v16 = vrot.slane %v730_v53, 9  ;;  %v855_v17 = vrot.slane %v731_v54, 5  ;;  %v858_v18 = vrot.slane %v732_v55, 5  ;;  %v752_v46 = vld [vmem:[%s11535_s0 + $0xa0] sm:$0xf] }
  0x52   :  { %v6567_v20 = vcombine.low %v849_v2, %v852_v15  ;;  %v845_v21 = vsel %vm8004_vm5, %v843_v9, %v844_v63  ;;  %v863_v23 = vsel %vm8004_vm5, %v6553_v4, %v862_v11  ;;  %v864_v24 = vrot.slane %v862_v11, 4  ;;  %v753_v47 = vld [vmem:[%s11535_s0 + $0xa4] sm:$0x1]  ;;  %v748_v48 = vld [vmem:[%s11535_s0 + $0x90] sm:$0xe] }
  0x53   :  { %v6566_v27 = vcombine.low %v842_v8, %v845_v21  ;;  %v856_v28 = vsel %vm8004_vm5, %v6552_v16, %v855_v17  ;;  %v857_v29 = vrot.slane %v855_v17, 4  ;;  %v6555_v30 = vrot.slane %v739_v0, 9  ;;  %v749_v53 = vld [vmem:[%s11535_s0 + $0x94] sm:$0xf]  ;;  %v750_v54 = vld [vmem:[%s11535_s0 + $0x98] sm:$0x1] }
  0x54   :  { %975 = vrot.lane.b32.xlu0 %v6564_v1, %s7727_s26  ;;  %v866_v33 = vsel %vm8004_vm5, %v864_v24, %v865_v12  ;;  %v876_v34 = vrot.slane %v740_v5, 5  ;;  %v879_v35 = vrot.slane %v741_v6, 5  ;;  %v6554_v36 = vrot.slane %v736_v7, 9  ;;  %v757_v59 = vld [vmem:[%s11535_s0 + $0xb4] sm:$0xe] }
  0x55   :  { %981 = vrot.lane.b32.xlu1 %v6567_v20, %s7727_s26  ;;  %v6569_v38 = vcombine.low %v863_v23, %v866_v33  ;;  %v859_v39 = vsel %vm8004_vm5, %v857_v29, %v858_v18  ;;  %v869_v40 = vrot.slane %v737_v13, 5  ;;  %v872_v41 = vrot.slane %v738_v14, 5  ;;  %v758_v0 = vld [vmem:[%s11535_s0 + $0xb8] sm:$0xf]  ;;  %v759_v1 = vld [vmem:[%s11535_s0 + $0xbc] sm:$0x1] }
  0x56   :  { %v877_v43 = vsel %vm8004_vm5, %v6555_v30, %v876_v34  ;;  %v878_v44 = vrot.slane %v876_v34, 4  ;;  %v6557_v45 = vrot.slane %v745_v19, 9  ;;  %v6568_v49 = vcombine.low %v856_v28, %v859_v39  ;;  %v754_v5 = vld [vmem:[%s11535_s0 + $0xa8] sm:$0xe]  ;;  %v755_v6 = vld [vmem:[%s11535_s0 + $0xac] sm:$0xf] }
  0x57   :  { %v871_v50 = vrot.slane %v869_v40, 4  ;;  %v890_v51 = vrot.slane %v746_v25, 5  ;;  %v893_v52 = vrot.slane %v747_v26, 5  ;;  %v870_v56 = vsel %vm8004_vm5, %v6554_v36, %v869_v40  ;;  %v756_v7 = vld [vmem:[%s11535_s0 + $0xb0] sm:$0x1] }
  0x58   :  { %979 = vrot.lane.b32.xlu0 %v6566_v27, %s7727_s26  ;;  %v880_v55 = vsel %vm8004_vm5, %v878_v44, %v879_v35  ;;  %v6556_v57 = vrot.slane %v742_v31, 9  ;;  %v883_v58 = vrot.slane %v743_v32, 5  ;;  %v886_v63 = vrot.slane %v744_v37, 5  ;;  %v6629_v26 = vld [vmem:[%s11535_s0 + $0x18] sm:$0xf] }
  0x59   :  { %985 = vrot.lane.b32.xlu1 %v6569_v38, %s7727_s26  ;;  %v6571_v60 = vcombine.low %v877_v43, %v880_v55  ;;  %v873_v61 = vsel %vm8004_vm5, %v871_v50, %v872_v41  ;;  %v892_v62 = vrot.slane %v890_v51, 4  ;;  %v891_v2 = vsel %vm8004_vm5, %v6557_v45, %v890_v51  ;;  %v6630_v31 = vld [vmem:[%s11535_s0 + $0x1c] sm:$0xf]  ;;  %v6631_v39 = vld [vmem:[%s11535_s0 + $0x20] sm:$0x1] }
  0x5a   :  { %v885_v3 = vrot.slane %v883_v58, 4  ;;  %v6559_v4 = vrot.slane %v751_v42, 9  ;;  %v904_v9 = vrot.slane %v752_v46, 5  ;;  %v907_v11 = vrot.slane %v753_v47, 5  ;;  %v6626_v41 = vld [vmem:[%s11535_s0 + $0xc] sm:$0xf] }
  0x5b   :  { %v894_v8 = vsel %vm8004_vm5, %v892_v62, %v893_v52  ;;  %v6558_v12 = vrot.slane %v748_v48, 9  ;;  %v6570_v13 = vcombine.low %v870_v56, %v873_v61  ;;  %v884_v14 = vsel %vm8004_vm5, %v6556_v57, %v883_v58  ;;  %v6627_v46 = vld [vmem:[%s11535_s0 + $0x10] sm:$0xf] }
  0x5c   :  { %983 = vrot.lane.b32.xlu0 %v6568_v49, %s7727_s26  ;;  %v897_v15 = vrot.slane %v749_v53, 5  ;;  %v900_v16 = vrot.slane %v750_v54, 5  ;;  %v6573_v17 = vcombine.low %v891_v2, %v894_v8  ;;  %v887_v18 = vsel %vm8004_vm5, %v885_v3, %v886_v63  ;;  %v6635_v55 = vld [vmem:[%s11535_s0 + $0x30] sm:$0xf] }
  0x5d   :  { %989 = vrot.lane.b32.xlu1 %v6571_v60, %s7727_s26  ;;  %v906_v19 = vrot.slane %v904_v9, 4  ;;  %v6561_v20 = vrot.slane %v757_v59, 9  ;;  %v905_v21 = vsel %vm8004_vm5, %v6559_v4, %v904_v9  ;;  %v918_v24 = vrot.slane %v758_v0, 5  ;;  %v6636_v0 = vld [vmem:[%s11535_s0 + $0x34] sm:$0xf] }
  0x5e   :  { %v899_v23 = vrot.slane %v897_v15, 4  ;;  %v921_v25 = vrot.slane %v759_v1, 5  ;;  %v6560_v28 = vrot.slane %v754_v5, 9  ;;  %v911_v29 = vrot.slane %v755_v6, 5  ;;  %v6628_v1 = vld [vmem:[%s11535_s0 + $0x14] sm:$0x1] }
  0x5f   :  { %v908_v27 = vsel %vm8004_vm5, %v906_v19, %v907_v11  ;;  %v914_v30 = vrot.slane %v756_v7, 5  ;;  %v6572_v32 = vcombine.low %v884_v14, %v887_v18  ;;  %v898_v33 = vsel %vm8004_vm5, %v6558_v12, %v897_v15  ;;  %v7606_v6 = vld [vmem:[%s11535_s0 + $0x18] sm:$0xff]  }
  0x60   :  { %987 = vrot.lane.b32.xlu0 %v6570_v13, %s7727_s26  ;;  %v901_v34 = vsel %vm8004_vm5, %v899_v23, %v900_v16  ;;  %v920_v35 = vrot.slane %v918_v24, 4  ;;  %v6575_v36 = vcombine.low %v905_v21, %v908_v27  ;;  %v919_v37 = vsel %vm8004_vm5, %v6561_v20, %v918_v24  ;;  %v6637_v13 = vld [vmem:[%s11535_s0 + $0x38] sm:$0x1]  ;;  %v6632_v16 = vld [vmem:[%s11535_s0 + $0x24] sm:$0xf] }
  0x61   :  { %993 = vrot.lane.b32.xlu1 %v6573_v17, %s7727_s26  ;;  %v913_v38 = vrot.slane %v911_v29, 4  ;;  %v1290_v40 = vshrl.u32 %v6629_v26, 16  ;;  %v1293_v43 = vshll.u32 %v6629_v26, 16  ;;  %v1299_v44 = vshll.u32 %v6630_v31, 16  ;;  %v6633_v20 = vld [vmem:[%s11535_s0 + $0x28] sm:$0xf] }
  0x62   :  { %v922_v42 = vsel %vm8004_vm5, %v920_v35, %v921_v25  ;;  %v1303_v45 = vshrl.u32 %v6630_v31, 16  ;;  %v6574_v47 = vcombine.low %v898_v33, %v901_v34  ;;  %v912_v48 = vsel %vm8004_vm5, %v6560_v28, %v911_v29  ;;  %v7607_v26 = vld [vmem:[%s11535_s0 + $0xc] sm:$0xff]  }
  0x63   :  { %v915_v49 = vsel %vm8004_vm5, %v913_v38, %v914_v30  ;;  %v1292_v50 = vrot.slane %v1290_v40, 4  ;;  %v1295_v51 = vrot.slane %v1293_v43, 5  ;;  %v1301_v52 = vrot.slane %v1299_v44, 5  ;;  %v6634_v30 = vld [vmem:[%s11535_s0 + $0x2c] sm:$0x1] }
  0x64   :  { %991 = vrot.lane.b32.xlu0 %v6572_v32, %s7727_s26  ;;  %v1305_v53 = vrot.slane %v1303_v45, 4  ;;  %v1309_v54 = vshll.u32 %v6631_v39, 16  ;;  %v6577_v56 = vcombine.low %v919_v37, %v922_v42  ;;  %v1266_v57 = vshrl.u32 %v6626_v41, 16  ;;  %v7608_v32 = vld [vmem:[%s11535_s0 + $0x30] sm:$0xff]   ;;  %v7609_v42 = vld [vmem:[%s11535_s0 + $0x24] sm:$0xff]  }
  0x65   :  { %997 = vrot.lane.b32.xlu1 %v6575_v36, %s7727_s26  ;;  %v1269_v58 = vshll.u32 %v6626_v41, 16  ;;  %v1275_v59 = vshll.u32 %v6627_v46, 16  ;;  %v6576_v60 = vcombine.low %v912_v48, %v915_v49  ;;  %v1296_v61 = vor.u32 %v1295_v51, %v1292_v50  ;;  %v6641_v36 = vld [vmem:[%s11535_s0 + $0x48] sm:$0xf]  ;;  %v6642_v41 = vld [vmem:[%s11535_s0 + $0x4c] sm:$0xf] }
  0x66   :  { %v1306_v62 = vor.u32 %v1305_v53, %v1301_v52  ;;  %v1279_v63 = vshrl.u32 %v6627_v46, 16  ;;  %v1268_v2 = vrot.slane %v1266_v57, 4  ;;  %v1338_v5 = vshrl.u32 %v6635_v55, 16  ;;  %v6643_v50 = vld [vmem:[%s11535_s0 + $0x50] sm:$0x1] }
  0x67   :  { %v1271_v3 = vrot.slane %v1269_v58, 5  ;;  %v8235_v4 = vrot.slane %v1275_v59, 5  ;;  %v1297_v7 = vrot.slane %v1296_v61, 4  ;;  %v1311_v9 = vrot.slane %v1309_v54, 5  ;;  %v6638_v57 = vld [vmem:[%s11535_s0 + $0x3c] sm:$0xf] }
  0x68   :  { %995 = vrot.lane.b32.xlu0 %v6574_v47, %s7727_s26  ;;  %v1307_v8 = vrot.slane %v1306_v62, 4  ;;  %v1281_v11 = vrot.slane %v1279_v63, 4  ;;  %v1341_v14 = vshll.u32 %v6635_v55, 16  ;;  %v1347_v15 = vshll.u32 %v6636_v0, 16  ;;  %v7611_v58 = vld [vmem:[%s11535_s0 + $0x3c] sm:$0xff]  }
  0x69   :  { %1001 = vrot.lane.b32.xlu1 %v6577_v56, %s7727_s26  ;;  %v1272_v12 = vor.u32 %v1271_v3, %v1268_v2  ;;  %v1285_v17 = vshll.u32 %v6628_v1, 16  ;;  %v1340_v18 = vrot.slane %v1338_v5, 4  ;;  %v1351_v19 = vshrl.u32 %v6636_v0, 16  ;;  %v6639_v63 = vld [vmem:[%s11535_s0 + $0x40] sm:$0xf] }
  0x6a   :  { %v1282_v23 = vor.u32 %v1281_v11, %v8235_v4  ;;  %v1343_v24 = vrot.slane %v1341_v14, 5  ;;  %v8254_v25 = vrot.slane %v1347_v15, 5  ;;  %v1302_v27 = vsel %vm7779_vm2, %v1297_v7, %v1301_v52  ;;  %v7610_v52 = vld [vmem:[%s11535_s0 + $0x48] sm:$0xff]   ;;  %v6647_v5 = vld [vmem:[%s11535_s0 + $0x60] sm:$0xf] }
  0x6b   :  { %v8251_v21 = vrot.slane %v1272_v12, 4  ;;  %v1312_v28 = vsel %vm7779_vm2, %v1307_v8, %v1311_v9  ;;  %v1353_v29 = vrot.slane %v1351_v19, 4  ;;  %v1314_v31 = vshrl.u32 %v6632_v16, 16  ;;  %v6640_v11 = vld [vmem:[%s11535_s0 + $0x44] sm:$0x1] }
  0x6c   :  { %999 = vrot.lane.b32.xlu0 %v6576_v60, %s7727_s26  ;;  %v1357_v33 = vshll.u32 %v6637_v13, 16  ;;  %v1317_v34 = vshll.u32 %v6632_v16, 16  ;;  %v1323_v35 = vshll.u32 %v6633_v20, 16  ;;  %v8274_v37 = vrot.slane %v1285_v17, 5 }
  0x6d   :  { %1154 = vrot.lane.b32.xlu1 %v7606_v6, %s7728_s28  ;;  %v1344_v38 = vor.u32 %v1343_v24, %v1340_v18  ;;  %v1354_v39 = vor.u32 %v1353_v29, %v8254_v25  ;;  %v1316_v40 = vrot.slane %v1314_v31, 4  ;;  %v8283_v43 = vcombine.low %v1302_v27, %v1312_v28  ;;  %v7612_v6 = vld [vmem:[%s11535_s0 + $0x60] sm:$0xff]   ;;  %v7613_v28 = vld [vmem:[%s11535_s0 + $0x54] sm:$0xff]  }
  0x6e   :  { %v1278_v44 = vsel %vm7779_vm2, %v8251_v21, %v8235_v4  ;;  %v8289_v45 = vrot.slane %v1282_v23, 4  ;;  %v1319_v46 = vrot.slane %v1317_v34, 5  ;;  %v8292_v47 = vrot.slane %v1323_v35, 5  ;;  %v6648_v31 = vld [vmem:[%s11535_s0 + $0x64] sm:$0xf] }
  0x6f   :  { %v1327_v48 = vshrl.u32 %v6633_v20, 16  ;;  %v1333_v49 = vshll.u32 %v6634_v30, 16  ;;  %v1386_v51 = vshrl.u32 %v6641_v36, 16  ;;  %v1359_v53 = vrot.slane %v1357_v33, 5  ;;  %v7614_v33 = vld [vmem:[%s11535_s0 + $0x78] sm:$0xff]  }
  0x70   :  { %1152 = vrot.lane.b32.xlu0 %v7607_v26, %s7728_s28  ;;  %v1320_v54 = vor.u32 %v1319_v46, %v1316_v40  ;;  %v1389_v55 = vshll.u32 %v6641_v36, 16  ;;  %v1395_v56 = vshll.u32 %v6642_v41, 16  ;;  %v1345_v59 = vrot.slane %v1344_v38, 4  ;;  %v6644_v38 = vld [vmem:[%s11535_s0 + $0x54] sm:$0xf] }
  0x71   :  { %1158 = vrot.lane.b32.xlu1 %v7608_v32, %s7728_s28  ;;  %v1355_v60 = vrot.slane %v1354_v39, 4  ;;  %v1329_v61 = vrot.slane %v1327_v48, 4  ;;  %v1388_v62 = vrot.slane %v1386_v51, 4  ;;  %v1335_v1 = vrot.slane %v1333_v49, 5  ;;  %v7615_v39 = vld [vmem:[%s11535_s0 + $0x6c] sm:$0xff]  }
  0x72   :  { %v1321_v0 = vrot.slane %v1320_v54, 4  ;;  %v1391_v2 = vrot.slane %v1389_v55, 5  ;;  %v8310_v3 = vrot.slane %v1395_v56, 5  ;;  %v1399_v8 = vshrl.u32 %v6642_v41, 16  ;;  %v6653_v4 = vld [vmem:[%s11535_s0 + $0x78] sm:$0xf] }
  0x73   :  { %v1330_v7 = vor.u32 %v1329_v61, %v8292_v47  ;;  %v1405_v9 = vshll.u32 %v6643_v50, 16  ;;  %v1362_v12 = vshrl.u32 %v6638_v57, 16  ;;  %v1288_v13 = vsel %vm7779_vm2, %v8289_v45, %v8274_v37 }
  0x74   :  { %1156 = vrot.lane.b32.xlu0 %v7609_v42, %s7728_s28  ;;  %v1392_v14 = vor.u32 %v1391_v2, %v1388_v62  ;;  %v1365_v15 = vshll.u32 %v6638_v57, 16  ;;  %v1371_v16 = vshll.u32 %v6639_v63, 16  ;;  %v1350_v17 = vsel %vm7779_vm2, %v1345_v59, %v8254_v25  ;;  %v6649_v42 = vld [vmem:[%s11535_s0 + $0x68] sm:$0x1]  ;;  %v6646_v59 = vld [vmem:[%s11535_s0 + $0x5c] sm:$0x1] }
  0x75   :  { %1162 = vrot.lane.b32.xlu1 %v7610_v52, %s7728_s28  ;;  %v1331_v18 = vrot.slane %v1330_v7, 4  ;;  %v1401_v19 = vrot.slane %v1399_v8, 4  ;;  %v1364_v20 = vrot.slane %v1362_v12, 4  ;;  %v1360_v23 = vsel %vm7779_vm2, %v1355_v60, %v1359_v53  ;;  %v6645_v52 = vld [vmem:[%s11535_s0 + $0x58] sm:$0xf]  ;;  %v7617_v60 = vld [vmem:[%s11535_s0 + $0x84] sm:$0xff]  }
  0x76   :  { %v1326_v24 = vsel %vm7779_vm2, %v1321_v0, %v8292_v47  ;;  %v1367_v26 = vrot.slane %v1365_v15, 5  ;;  %v1375_v27 = vshrl.u32 %v6639_v63, 16  ;;  %v1407_v29 = vrot.slane %v1405_v9, 5  ;;  %v7616_v47 = vld [vmem:[%s11535_s0 + $0x90] sm:$0xff]   ;;  %v7618_v2 = vld [vmem:[%s11535_s0 + $0xa8] sm:$0xff]  }
  0x77   :  { %v1402_v25 = vor.u32 %v1401_v19, %v8310_v3  ;;  %v8341_v30 = vrot.slane %v1371_v16, 5  ;;  %v1434_v32 = vshrl.u32 %v6647_v5, 16  ;;  %v1336_v34 = vsel %vm7779_vm2, %v1331_v18, %v1335_v1  ;;  %v6654_v1 = vld [vmem:[%s11535_s0 + $0x7c] sm:$0xf]  ;;  %v8410_v8 = vld [vmem:[%s11535_s0 + $0x80] sm:$0x1] }
  0x78   :  { %1160 = vrot.lane.b32.xlu0 %v7611_v58, %s7728_s28  ;;  %v1393_v35 = vrot.slane %v1392_v14, 4  ;;  %v1377_v36 = vrot.slane %v1375_v27, 4  ;;  %v1381_v37 = vshll.u32 %v6640_v11, 16  ;;  %v1368_v41 = vor.u32 %v1367_v26, %v1364_v20  ;;  %v6650_v18 = vld [vmem:[%s11535_s0 + $0x6c] sm:$0xf]  ;;  %v7619_v19 = vld [vmem:[%s11535_s0 + $0x9c] sm:$0xff]  }
  0x79   :  { %1166 = vrot.lane.b32.xlu1 %v7612_v6, %s7728_s28  ;;  %v1403_v40 = vrot.slane %v1402_v25, 4  ;;  %v1436_v45 = vrot.slane %v1434_v32, 4  ;;  %v1437_v46 = vshll.u32 %v6647_v5, 16  ;;  %v8369_v48 = vcombine.low %v1278_v44, %v1288_v13  ;;  %v7620_v32 = vld [vmem:[%s11535_s0 + $0xc0] sm:$0xff]  }
  0x7a   :  { %v8371_v49 = vcombine.low %v1350_v17, %v1360_v23  ;;  %v1443_v50 = vshll.u32 %v6648_v31, 16  ;;  %v1447_v51 = vshrl.u32 %v6648_v31, 16  ;;  %v8377_v53 = vcombine.low %v1326_v24, %v1336_v34 }
  0x7b   :  { %v1378_v54 = vor.u32 %v1377_v36, %v8341_v30  ;;  %v1439_v55 = vrot.slane %v1437_v46, 5  ;;  %v1410_v56 = vshrl.u32 %v6644_v38, 16  ;;  %v1398_v21 = vsel %vm7779_vm2, %v1393_v35, %v8310_v3  ;;  %v7623_v46 = vld [vmem:[%s11535_s0] sm:$0xff]  }
  0x7c   :  { %1164 = vrot.lane.b32.xlu0 %v7613_v28, %s7728_s28  ;;  %v1408_v44 = vsel %vm7779_vm2, %v1403_v40, %v1407_v29  ;;  %v8389_v57 = vrot.slane %v1381_v37, 5  ;;  %v8391_v58 = vrot.slane %v1443_v50, 5  ;;  %v8399_v61 = vrot.slane %v1368_v41, 4  ;;  %v6651_v37 = vld [vmem:[%s11535_s0 + $0x70] sm:$0xf] }
  0x7d   :  { %1170 = vrot.lane.b32.xlu1 %v7614_v33, %s7728_s28  ;;  %v1440_v62 = vor.u32 %v1439_v55, %v1436_v45  ;;  %v1449_v63 = vrot.slane %v1447_v51, 4  ;;  %v1453_v0 = vshll.u32 %v6649_v42, 16  ;;  %v1412_v3 = vrot.slane %v1410_v56, 4  ;;  %v8464_v42 = vld [vmem:[%s11535_s0 + $0x74] sm:$0x1]  ;;  %v7622_v45 = vld [vmem:[%s11535_s0 + $0x18] sm:$0xff]  }
  0x7e   :  { %v1413_v5 = vshll.u32 %v6644_v38, 16  ;;  %v1419_v6 = vshll.u32 %v6645_v52, 16  ;;  %v1423_v7 = vshrl.u32 %v6645_v52, 16  ;;  %v8413_v9 = vcombine.low %v1398_v21, %v1408_v44  ;;  %v7625_v50 = vld [vmem:[%s11535_s0 + $0xc] sm:$0xff]   ;;  %v7628_v51 = vld [vmem:[%s11535_s0 + $0x3c] sm:$0xff]   ;;  %v7634_v21 = vld [vmem:[%s11535_s0 + $0x84] sm:$0xff]  }
  0x7f   :  { %v8415_v11 = vrot.slane %v1378_v54, 4  ;;  %v8417_v12 = vrot.slane %v1440_v62, 4  ;;  %v1450_v13 = vor.u32 %v1449_v63, %v8391_v58  ;;  %v1482_v17 = vshrl.u32 %v6653_v4, 16  ;;  %v8434_v31 = vpop.permute.xlu1 %651  ;;  %v7629_v52 = vld [vmem:[%s11535_s0 + $0x30] sm:$0xff]   ;;  %v7631_v55 = vld [vmem:[%s11535_s0 + $0x48] sm:$0xff]   ;;  %v7635_v44 = vld [vmem:[%s11535_s0 + $0x78] sm:$0xff]  }
  0x80   :  { %1168 = vrot.lane.b32.xlu0 %v7615_v39, %s7728_s28  ;;  %v1415_v14 = vrot.slane %v1413_v5, 5  ;;  %v8421_v15 = vrot.slane %v1419_v6, 5  ;;  %v1425_v16 = vrot.slane %v1423_v7, 4  ;;  %v8431_v23 = vrot.slane %v1453_v0, 5  ;;  %v7630_v54 = vld [vmem:[%s11535_s0 + $0x54] sm:$0xff]   ;;  %v7632_v56 = vld [vmem:[%s11535_s0 + $0x6c] sm:$0xff]  }
  0x81   :  { %1174 = vrot.lane.b32.xlu1 %v7616_v47, %s7728_s28  ;;  %v8429_v20 = vrot.slane %v1450_v13, 4  ;;  %v1429_v24 = vshll.u32 %v6646_v59, 16  ;;  %v1485_v26 = vshll.u32 %v6653_v4, 16  ;;  %v1484_v25 = vrot.slane %v1482_v17, 4  ;;  %v7624_v47 = vld [vmem:[%s11535_s0 + $0x24] sm:$0xff]   ;;  %v7638_v59 = vld [vmem:[%s11535_s0 + $0x9c] sm:$0xff]  }
  0x82   :  { %v1416_v27 = vor.u32 %v1415_v14, %v1412_v3  ;;  %v1426_v28 = vor.u32 %v1425_v16, %v8421_v15  ;;  %v1491_v29 = vshll.u32 %v6654_v1, 16  ;;  %v1374_v33 = vsel %vm7779_vm2, %v8399_v61, %v8341_v30  ;;  %v7633_v4 = vld [vmem:[%s11535_s0 + $0x60] sm:$0xff]   ;;  %v8513_v3 = vld [vmem:[%s11535_s0 + $0x6c] sm:$0xe]  ;;  %v7640_v5 = vld [vmem:[%s11535_s0 + $0xb4] sm:$0xff]  }
  0x83   :  { %v1487_v34 = vrot.slane %v1485_v26, 5  ;;  %v1495_v35 = vshrl.u32 %v6654_v1, 16  ;;  %v1501_v36 = vshll.u32 %v8410_v8, 16  ;;  %v1384_v38 = vsel %vm7779_vm2, %v8415_v11, %v8389_v57  ;;  %v8527_v14 = vld [vmem:[%s11535_s0 + $0x70] sm:$0xf]  ;;  %v7641_v16 = vld [vmem:[%s11535_s0 + $0xa8] sm:$0xff]  }
  0x84   :  { %1172 = vrot.lane.b32.xlu0 %v7617_v60, %s7728_s28  ;;  %v1446_v39 = vsel %vm7779_vm2, %v8417_v12, %v8391_v58  ;;  %v8457_v40 = vrot.slane %v1416_v27, 4  ;;  %v8459_v41 = vrot.slane %v1491_v29, 5  ;;  %v7639_v60 = vld [vmem:[%s11535_s0 + $0x90] sm:$0xff]   ;;  %v8508_v62 = vrot.slane %v1429_v24, 5  ;;  %v8542_v26 = vld [vmem:[%s11535_s0 + $0xc] sm:$0xe] }
  0x85   :  { %1178 = vrot.lane.b32.xlu1 %v7618_v2, %s7728_s28  ;;  %v1488_v63 = vor.u32 %v1487_v34, %v1484_v25  ;;  %v1497_v0 = vrot.slane %v1495_v35, 4  ;;  %v1458_v1 = vshrl.u32 %v6650_v18, 16  ;;  %v648_v2 = vpop.permute.xlu0 %647  ;;  %v1456_v6 = vsel %vm7779_vm2, %v8429_v20, %v8431_v23  ;;  %v7621_v17 = vld [vmem:[%s11535_s0 + $0xb4] sm:$0xff]   ;;  %v8554_v29 = vld [vmem:[%s11535_s0 + $0x10] sm:$0xf] }
  0x86   :  { %v8522_v7 = vrot.slane %v1426_v28, 4  ;;  %v1461_v8 = vshll.u32 %v6650_v18, 16  ;;  %v1467_v13 = vshll.u32 %v6651_v37, 16  ;;  %v1503_v23 = vrot.slane %v1501_v36, 5  ;;  %v8606_v57 = vld [vmem:[%s11535_s0 + $0x74] sm:$0x1] }
  0x87   :  { %v8536_v20 = vrot.slane %v1488_v63, 4  ;;  %v1498_v18 = vor.u32 %v1497_v0, %v8459_v41  ;;  %v1460_v24 = vrot.slane %v1458_v1, 4  ;;  %v1471_v25 = vshrl.u32 %v6651_v37, 16  ;;  %v654_v34 = vpop.permute.xlu1 %653 }
  0x88   :  { %1176 = vrot.lane.b32.xlu0 %v7619_v19, %s7728_s28  ;;  %v1422_v19 = vsel %vm7779_vm2, %v8457_v40, %v8421_v15  ;;  %v1463_v27 = vrot.slane %v1461_v8, 5  ;;  %v8549_v28 = vrot.slane %v1467_v13, 5  ;;  %v1477_v36 = vshll.u32 %v8464_v42, 16  ;;  %v6842_v42 = vld [vmem:[%s11535_s0 + $0x78] sm:$0xf] }
  0x89   :  { %1182 = vrot.lane.b32.xlu1 %v7620_v32, %s7728_s28  ;;  %v1499_v35 = vrot.slane %v1498_v18, 4  ;;  %vm695_vm6 = vcmask 64544   ;;  %vm147_vm7 = vcmask 31744   ;;  %v1432_v15 = vsel %vm7779_vm2, %v8522_v7, %v8508_v62  ;;  %v6906_v8 = vld [vmem:[%s11535_s0 + $0x78] sm:$0xe] }
  0x8a   :  { %v1464_v32 = vor.u32 %v1463_v27, %v1460_v24  ;;  %v1473_v40 = vrot.slane %v1471_v25, 4  ;;  %150 = vst.msk [vmem:[#allocation2 + $0x10] sm:$0xff] %vm147_vm7, %v7622_v45  ;;  %148 = vst.msk [vmem:[#allocation2] sm:$0xff] %vm147_vm7, %v7623_v46  ;;  %v6746_v37 = vrot.slane %v8513_v3, 9  ;;  %v8592_v45 = vcombine.low %v1374_v33, %v1384_v38  ;;  %v8625_v38 = vld [vmem:[%s11535_s0 + $0x14] sm:$0x1] }
  0x8b   :  { %151 = vst.msk [vmem:[#allocation2 + $0x18] sm:$0xff] %vm147_vm7, %v7624_v47  ;;  %149 = vst.msk [vmem:[#allocation2 + $0x8] sm:$0xff] %vm147_vm7, %v7625_v50  ;;  %v1494_v46 = vsel %vm7779_vm2, %v8536_v20, %v8459_v41  ;;  %v1504_v47 = vsel %vm7779_vm2, %v1499_v35, %v1503_v23  ;;  %v1916_v30 = vrot.slane %v8527_v14, 5  ;;  %v8617_v11 = vcombine.low %v1446_v39, %v1456_v6  ;;  %v6844_v50 = vld [vmem:[%s11535_s0 + $0x80] sm:$0x1] }
  0x8c   :  { %153 = vst.msk [vmem:[#allocation2 + $0x28] sm:$0xff] %vm147_vm7, %v7628_v51  ;;  %152 = vst.msk [vmem:[#allocation2 + $0x20] sm:$0xff] %vm147_vm7, %v7629_v52  ;;  %1180 = vrot.lane.b32.xlu0 %v7621_v17, %s7728_s28  ;;  %v650_v61 = vpop.permute.xlu0 %649  ;;  %v1474_v33 = vor.u32 %v1473_v40, %v8549_v28  ;;  %v6738_v41 = vrot.slane %v8542_v26, 9  ;;  %v8632_v58 = vcombine.low %v1422_v19, %v1432_v15  ;;  %v8634_v12 = vrot.slane %v1477_v36, 5  ;;  %v6818_v52 = vld [vmem:[%s11535_s0 + $0x18] sm:$0xf] }
  0x8d   :  { %155 = vst.msk [vmem:[#allocation2 + $0x38] sm:$0xff] %vm147_vm7, %v7630_v54  ;;  %154 = vst.msk [vmem:[#allocation2 + $0x30] sm:$0xff] %vm147_vm7, %v7631_v55  ;;  %1699 = vrot.lane.b32.xlu1 %v8283_v43, %s7729_s15  ;;  %v6843_v43 = vld [vmem:[%s11535_s0 + $0x7c] sm:$0xf]  ;;  %v1860_v39 = vrot.slane %v8554_v29, 5  ;;  %v2505_v51 = vshrl.u32 %v6842_v42, 16  ;;  %v8643_v54 = vcombine.low %v1494_v46, %v1504_v47 }
  0x8e   :  { %157 = vst.msk [vmem:[#allocation2 + $0x48] sm:$0xff] %vm147_vm7, %v7632_v56  ;;  %156 = vst.msk [vmem:[#allocation2 + $0x40] sm:$0xff] %vm147_vm7, %v7633_v4  ;;  %v8645_v55 = vrot.slane %v1474_v33, 4  ;;  %v8649_v56 = vsel %vm8004_vm5, %v6746_v37, %v1916_v30  ;;  %v1919_v4 = vrot.slane %v8606_v57, 5  ;;  %v2508_v63 = vshll.u32 %v6842_v42, 16 }
  0x8f   :  { %159 = vst.msk [vmem:[#allocation2 + $0x58] sm:$0xff] %vm147_vm7, %v7634_v21  ;;  %158 = vst.msk [vmem:[#allocation2 + $0x50] sm:$0xff] %vm147_vm7, %v7635_v44  ;;  %v658_v21 = vpop.permute.xlu1 %657  ;;  %v6819_v44 = vld [vmem:[%s11535_s0 + $0x1c] sm:$0xf]  ;;  %v2507_v62 = vrot.slane %v2505_v51, 4  ;;  %v2514_v0 = vshll.u32 %v6843_v43, 16 }
  0x90   :  { %161 = vst.msk [vmem:[#allocation2 + $0x68] sm:$0xff] %vm147_vm7, %v7638_v59  ;;  %160 = vst.msk [vmem:[#allocation2 + $0x60] sm:$0xff] %vm147_vm7, %v7639_v60  ;;  %v6820_v59 = vld [vmem:[%s11535_s0 + $0x20] sm:$0x1]  ;;  %1697 = vrot.lane.b32.xlu0 %v8369_v48, %s7729_s15  ;;  %v1918_v60 = vrot.slane %v1916_v30, 4  ;;  %v1863_v48 = vrot.slane %v8625_v38, 5 }
  0x91   :  { %163 = vst.msk [vmem:[#allocation2 + $0x78] sm:$0xff] %vm147_vm7, %v7640_v5  ;;  %162 = vst.msk [vmem:[#allocation2 + $0x70] sm:$0xff] %vm147_vm7, %v7641_v16  ;;  %1703 = vrot.lane.b32.xlu1 %v8371_v49, %s7729_s15  ;;  %v2518_v3 = vshrl.u32 %v6843_v43, 16  ;;  %v1480_v5 = vsel %vm7779_vm2, %v8645_v55, %v8634_v12  ;;  %v1862_v6 = vrot.slane %v1860_v39, 4  ;;  %v2510_v7 = vrot.slane %v2508_v63, 5 }
  0x92   :  { %698 = vst.msk [vmem:[#allocation2 + $0x10] sm:$0xff] %vm695_vm6, %v8434_v31  ;;  %696 = vst.msk [vmem:[#allocation2] sm:$0xff] %vm695_vm6, %v648_v2  ;;  %v8619_v31 = vrot.slane %v1464_v32, 4  ;;  %v8669_v2 = vsel %vm8004_vm5, %v6738_v41, %v1860_v39  ;;  %v8676_v49 = vrot.slane %v2514_v0, 5  ;;  %v6907_v13 = vld [vmem:[%s11535_s0 + $0x7c] sm:$0xf] }
  0x93   :  { %699 = vst.msk [vmem:[#allocation2 + $0x18] sm:$0xff] %vm695_vm6, %v654_v34  ;;  %697 = vst.msk [vmem:[#allocation2 + $0x8] sm:$0xff] %vm695_vm6, %v650_v61  ;;  %v2520_v14 = vrot.slane %v2518_v3, 4  ;;  %v2524_v16 = vshll.u32 %v6844_v50, 16  ;;  %v2313_v17 = vshrl.u32 %v6818_v52, 16  ;;  %v2316_v20 = vshll.u32 %v6818_v52, 16 }
  0x94   :  { %701 = vst.msk [vmem:[#allocation2 + $0x28] sm:$0xff] %vm695_vm6, %v658_v21  ;;  %v1470_v1 = vsel %vm7779_vm2, %v8619_v31, %v8549_v28  ;;  %v6908_v18 = vld [vmem:[%s11535_s0 + $0x80] sm:$0x1]  ;;  %1701 = vrot.lane.b32.xlu0 %v8377_v53, %s7729_s15  ;;  %v656_v23 = vpop.permute.xlu0 %655  ;;  %v2511_v24 = vor.u32 %v2510_v7, %v2507_v62  ;;  %v2322_v26 = vshll.u32 %v6819_v44, 16  ;;  %v2326_v19 = vshrl.u32 %v6819_v44, 16 }
  0x95   :  { %v2332_v27 = vshll.u32 %v6820_v59, 16  ;;  %v6882_v28 = vld [vmem:[%s11535_s0 + $0x18] sm:$0xe]  ;;  %1707 = vrot.lane.b32.xlu1 %v8413_v9, %s7729_s15  ;;  %700 = vst.msk [vmem:[#allocation2 + $0x20] sm:$0xff] %vm695_vm6, %v656_v23  ;;  %v2521_v25 = vor.u32 %v2520_v14, %v8676_v49  ;;  %v2526_v29 = vrot.slane %v2524_v16, 5  ;;  %v2315_v34 = vrot.slane %v2313_v17, 4 }
  0x96   :  { %v2318_v35 = vrot.slane %v2316_v20, 5  ;;  %v6883_v53 = vld [vmem:[%s11535_s0 + $0x1c] sm:$0xf]  ;;  %v6884_v36 = vld [vmem:[%s11535_s0 + $0x20] sm:$0x1]  ;;  %v2512_v15 = vrot.slane %v2511_v24, 4  ;;  %v1920_v31 = vsel %vm8004_vm5, %v1918_v60, %v1919_v4  ;;  %v6682_v12 = vcombine.low %v1470_v1, %v1480_v5 }
  0x97   :  { %v2324_v32 = vrot.slane %v2322_v26, 5  ;;  %v2328_v40 = vrot.slane %v2326_v19, 4  ;;  %v2334_v37 = vrot.slane %v2332_v27, 5  ;;  %v6717_v9 = vld [vmem:[%s11535_s0 + $0x78] sm:$0xe]  ;;  %v2522_v42 = vrot.slane %v2521_v25, 4 }
  0x98   :  { %v2319_v46 = vor.u32 %v2318_v35, %v2315_v34  ;;  %v662_v47 = vpop.permute.xlu1 %661  ;;  %v6938_v57 = vrot.slane %v6906_v8, 9  ;;  %v2963_v30 = vrot.slane %v6907_v13, 5  ;;  %v6718_v61 = vld [vmem:[%s11535_s0 + $0x7c] sm:$0xf]  ;;  %1705 = vrot.lane.b32.xlu0 %v8592_v45, %s7729_s15  ;;  %v2966_v38 = vrot.slane %v6908_v18, 5 }
  0x99   :  { %v2329_v33 = vor.u32 %v2328_v40, %v2324_v32  ;;  %703 = vst.msk [vmem:[#allocation2 + $0x38] sm:$0xff] %vm695_vm6, %v662_v47  ;;  %v6930_v41 = vrot.slane %v6882_v28, 9  ;;  %v6719_v43 = vld [vmem:[%s11535_s0 + $0x80] sm:$0x1]  ;;  %1711 = vrot.lane.b32.xlu1 %v8617_v11, %s7729_s15  ;;  %v8720_v39 = vsel %vm8004_vm5, %v1862_v6, %v1863_v48  ;;  %v6693_v51 = vld [vmem:[%s11535_s0 + $0x18] sm:$0xe]  ;;  %v2517_v55 = vsel %vm7779_vm2, %v2512_v15, %v8676_v49 }
  0x9a   :  { %v2320_v45 = vrot.slane %v2319_v46, 4  ;;  %v2965_v50 = vrot.slane %v2963_v30, 4  ;;  %v6694_v52 = vld [vmem:[%s11535_s0 + $0x1c] sm:$0xf]  ;;  %v2907_v4 = vrot.slane %v6883_v53, 5  ;;  %v2910_v21 = vrot.slane %v6884_v36, 5 }
  0x9b   :  { %v2330_v11 = vrot.slane %v2329_v33, 4  ;;  %v2527_v44 = vsel %vm7779_vm2, %v2522_v42, %v2526_v29  ;;  %v8735_v59 = vsel %vm8004_vm5, %v6938_v57, %v2963_v30  ;;  %v6747_v60 = vrot.slane %v6717_v9, 9  ;;  %v8740_v63 = vld [vmem:[%s11535_s0 + $0x20] sm:$0x1]  ;;  %v6845_v18 = vld [vmem:[%s11535_s0 + $0x84] sm:$0xf] }
  0x9c   :  { %v1923_v62 = vrot.slane %v6718_v61, 5  ;;  %1709 = vrot.lane.b32.xlu0 %v8632_v58, %s7729_s15  ;;  %v2325_v0 = vsel %vm7779_vm2, %v2320_v45, %v2324_v32  ;;  %v660_v48 = vpop.permute.xlu0 %659  ;;  %v8750_v3 = vsel %vm8004_vm5, %v2965_v50, %v2966_v38  ;;  %v2909_v5 = vrot.slane %v2907_v4, 4  ;;  %v6846_v23 = vld [vmem:[%s11535_s0 + $0x88] sm:$0xf]  ;;  %v6847_v24 = vld [vmem:[%s11535_s0 + $0x8c] sm:$0x1] }
  0x9d   :  { %v2335_v1 = vsel %vm7779_vm2, %v2330_v11, %v2334_v37  ;;  %1715 = vrot.lane.b32.xlu1 %v8643_v54, %s7729_s15  ;;  %v6762_v6 = vcombine.low %v8649_v56, %v1920_v31  ;;  %702 = vst.msk [vmem:[#allocation2 + $0x30] sm:$0xff] %vm695_vm6, %v660_v48  ;;  %v8758_v58 = vsel %vm8004_vm5, %v6930_v41, %v2907_v4  ;;  %v1926_v49 = vrot.slane %v6719_v43, 5  ;;  %v7626_v54 = vld [vmem:[%s11535_s0 + $0x78] sm:$0xff]   ;;  %v6821_v25 = vld [vmem:[%s11535_s0 + $0x24] sm:$0xf] }
  0x9e   :  { %v1925_v7 = vrot.slane %v1923_v62, 4  ;;  %v6754_v8 = vcombine.low %v8669_v2, %v8720_v39  ;;  %v8764_v13 = vsel %vm8004_vm5, %v2909_v5, %v2910_v21  ;;  %v6739_v14 = vrot.slane %v6693_v51, 9  ;;  %v6822_v29 = vld [vmem:[%s11535_s0 + $0x28] sm:$0xf]  ;;  %v6823_v32 = vld [vmem:[%s11535_s0 + $0x2c] sm:$0x1] }
  0x9f   :  { %v1867_v16 = vrot.slane %v6694_v52, 5  ;;  %v8769_v56 = vcombine.low %v2517_v55, %v2527_v44  ;;  %v8771_v17 = vcombine.low %v2325_v0, %v2335_v1  ;;  %v6954_v20 = vcombine.low %v8735_v59, %v8750_v3  ;;  %v7627_v40 = vld [vmem:[%s11535_s0 + $0x18] sm:$0xff]   ;;  %v6909_v51 = vld [vmem:[%s11535_s0 + $0x84] sm:$0xe]  ;;  %v6910_v4 = vld [vmem:[%s11535_s0 + $0x88] sm:$0xf] }
  0xa0   :  { %v8777_v2 = vsel %vm8004_vm5, %v6747_v60, %v1923_v62  ;;  %1713 = vrot.lane.b32.xlu0 %v6682_v12, %s7729_s15  ;;  %v6946_v26 = vcombine.low %v8758_v58, %v8764_v13  ;;  %v8793_v19 = vsel %vm8004_vm5, %v1925_v7, %v1926_v49  ;;  %v1870_v27 = vrot.slane %v8740_v63, 5  ;;  %v6911_v21 = vld [vmem:[%s11535_s0 + $0x8c] sm:$0x1]  ;;  %v6885_v1 = vld [vmem:[%s11535_s0 + $0x24] sm:$0xe] }
  0xa1   :  { %v2529_v28 = vshrl.u32 %v6845_v18, 16  ;;  %2034 = vrot.lane.b32.xlu1 %v6762_v6, %s7730_s18  ;;  %v2532_v35 = vshll.u32 %v6845_v18, 16  ;;  %v2538_v53 = vshll.u32 %v6846_v23, 16  ;;  %v2542_v36 = vshrl.u32 %v6846_v23, 16  ;;  %v6886_v7 = vld [vmem:[%s11535_s0 + $0x28] sm:$0xf] }
  0xa2   :  { %v666_v34 = vpop.permute.xlu1 %665  ;;  %v2548_v15 = vshll.u32 %v6847_v24, 16  ;;  %v1869_v37 = vrot.slane %v1867_v16, 4  ;;  %v2337_v42 = vshrl.u32 %v6821_v25, 16  ;;  %v2340_v46 = vshll.u32 %v6821_v25, 16  ;;  %v6887_v18 = vld [vmem:[%s11535_s0 + $0x2c] sm:$0x1] }
  0xa3   :  { %705 = vst.msk [vmem:[#allocation2 + $0x48] sm:$0xff] %vm695_vm6, %v666_v34  ;;  %v2531_v9 = vrot.slane %v2529_v28, 4  ;;  %v8812_v47 = vsel %vm8004_vm5, %v6739_v14, %v1867_v16  ;;  %v2534_v57 = vrot.slane %v2532_v35, 5  ;;  %v2540_v30 = vrot.slane %v2538_v53, 5  ;;  %v7036_v24 = vld [vmem:[%s11535_s0 + $0x138] sm:$0xf] }
  0xa4   :  { %v2544_v61 = vrot.slane %v2542_v36, 4  ;;  %2018 = vrot.lane.b32.xlu0 %v6754_v8, %s7730_s18  ;;  %v2550_v33 = vrot.slane %v2548_v15, 5  ;;  %v2339_v38 = vrot.slane %v2337_v42, 4  ;;  %v2342_v41 = vrot.slane %v2340_v46, 5  ;;  %v7038_v15 = vld [vmem:[%s11535_s0 + $0x140] sm:$0x1] }
  0xa5   :  { %v664_v31 = vpop.permute.xlu0 %663  ;;  %v2346_v43 = vshll.u32 %v6822_v29, 16  ;;  %2215 = vrot.lane.b32.xlu1 %v7626_v54, %s7731_s23  ;;  %v2535_v12 = vor.u32 %v2534_v57, %v2531_v9  ;;  %v2350_v45 = vshrl.u32 %v6822_v29, 16  ;;  %v2356_v50 = vshll.u32 %v6823_v32, 16  ;;  %v7037_v29 = vld [vmem:[%s11535_s0 + $0x13c] sm:$0xf] }
  0xa6   :  { %704 = vst.msk [vmem:[#allocation2 + $0x40] sm:$0xff] %vm695_vm6, %v664_v31  ;;  %v2545_v39 = vor.u32 %v2544_v61, %v2540_v30  ;;  %v8822_v52 = vsel %vm8004_vm5, %v1869_v37, %v1870_v27  ;;  %v2343_v55 = vor.u32 %v2342_v41, %v2339_v38  ;;  %v6939_v44 = vrot.slane %v6909_v51, 9  ;;  %v7012_v37 = vld [vmem:[%s11535_s0 + $0xd8] sm:$0xf]  ;;  %v7014_v61 = vld [vmem:[%s11535_s0 + $0xe0] sm:$0x1] }
  0xa7   :  { %v2348_v11 = vrot.slane %v2346_v43, 5  ;;  %v2536_v60 = vrot.slane %v2535_v12, 4  ;;  %v2352_v63 = vrot.slane %v2350_v45, 4  ;;  %v2358_v0 = vrot.slane %v2356_v50, 5  ;;  %v7100_v31 = vld [vmem:[%s11535_s0 + $0x138] sm:$0xe] }
  0xa8   :  { %v2546_v62 = vrot.slane %v2545_v39, 4  ;;  %2199 = vrot.lane.b32.xlu0 %v7627_v40, %s7731_s23  ;;  %v2344_v48 = vrot.slane %v2343_v55, 4  ;;  %v2970_v5 = vrot.slane %v6910_v4, 5  ;;  %v2973_v6 = vrot.slane %v6911_v21, 5  ;;  %v7101_v12 = vld [vmem:[%s11535_s0 + $0x13c] sm:$0xf] }
  0xa9   :  { %v6931_v49 = vrot.slane %v6885_v1, 9  ;;  %2760 = vrot.lane.b32.xlu1 %v8769_v56, %s7732_s10  ;;  %v2541_v14 = vsel %vm7779_vm2, %v2536_v60, %v2540_v30  ;;  %v2353_v54 = vor.u32 %v2352_v63, %v2348_v11  ;;  %v2914_v23 = vrot.slane %v6886_v7, 5  ;;  %v7636_v55 = vld [vmem:[%s11535_s0 + $0x84] sm:$0xff]   ;;  %v7076_v21 = vld [vmem:[%s11535_s0 + $0xd8] sm:$0xe] }
  0xaa   :  { %v670_v8 = vpop.permute.xlu1 %669  ;;  %v2551_v16 = vsel %vm7779_vm2, %v2546_v62, %v2550_v33  ;;  %v6763_v56 = vcombine.low %v8777_v2, %v8793_v19  ;;  %v6755_v27 = vcombine.low %v8812_v47, %v8822_v52  ;;  %v8856_v28 = vsel %vm8004_vm5, %v6939_v44, %v2970_v5  ;;  %v7013_v47 = vld [vmem:[%s11535_s0 + $0xdc] sm:$0xf]  ;;  %v7102_v52 = vld [vmem:[%s11535_s0 + $0x140] sm:$0x1]  ;;  %v7637_v1 = vld [vmem:[%s11535_s0 + $0x24] sm:$0xff]  }
  0xab   :  { %707 = vst.msk [vmem:[#allocation2 + $0x58] sm:$0xff] %vm695_vm6, %v670_v8  ;;  %v2972_v25 = vrot.slane %v2970_v5, 4  ;;  %v2349_v34 = vsel %vm7779_vm2, %v2344_v48, %v2348_v11  ;;  %v2354_v35 = vrot.slane %v2353_v54, 4  ;;  %v2916_v53 = vrot.slane %v2914_v23, 4  ;;  %v7077_v44 = vld [vmem:[%s11535_s0 + $0xdc] sm:$0xf] }
  0xac   :  { %v2917_v2 = vrot.slane %v6887_v18, 5  ;;  %2744 = vrot.lane.b32.xlu0 %v8771_v17, %s7732_s10  ;;  %v8865_v19 = vcombine.low %v2541_v14, %v2551_v16  ;;  %v3647_v32 = vshrl.u32 %v7036_v24, 16  ;;  %v3650_v40 = vshll.u32 %v7036_v24, 16 }
  0xad   :  { %v8869_v36 = vsel %vm8004_vm5, %v2972_v25, %v2973_v6  ;;  %3081 = vrot.lane.b32.xlu1 %v6954_v20, %s7733_s24  ;;  %v2359_v17 = vsel %vm7779_vm2, %v2354_v35, %v2358_v0  ;;  %v8887_v42 = vsel %vm8004_vm5, %v6931_v49, %v2914_v23  ;;  %v3656_v46 = vshll.u32 %v7037_v29, 16 }
  0xae   :  { %v6955_v9 = vcombine.low %v8856_v28, %v8869_v36  ;;  %v668_v57 = vpop.permute.xlu0 %667  ;;  %v8892_v30 = vcombine.low %v2349_v34, %v2359_v17  ;;  %v8896_v59 = vsel %vm8004_vm5, %v2916_v53, %v2917_v2  ;;  %v3649_v3 = vrot.slane %v3647_v32, 4  ;;  %v7205_v32 = vld [vmem:[%s11535_s0 + $0xe8] sm:$0xf] }
  0xaf   :  { %v3652_v20 = vrot.slane %v3650_v40, 5  ;;  %706 = vst.msk [vmem:[#allocation2 + $0x50] sm:$0xff] %vm695_vm6, %v668_v57  ;;  %v3658_v33 = vrot.slane %v3656_v46, 5  ;;  %v3660_v38 = vshrl.u32 %v7037_v29, 16  ;;  %v3666_v41 = vshll.u32 %v7038_v15, 16 }
  0xb0   :  { %v3455_v43 = vshrl.u32 %v7012_v37, 16  ;;  %3065 = vrot.lane.b32.xlu0 %v6946_v26, %s7733_s24  ;;  %v3458_v45 = vshll.u32 %v7012_v37, 16  ;;  %v3464_v50 = vshll.u32 %v7013_v47, 16  ;;  %v3468_v51 = vshrl.u32 %v7013_v47, 16  ;;  %v7206_v40 = vld [vmem:[%s11535_s0 + $0xec] sm:$0x1] }
  0xb1   :  { %v3653_v39 = vor.u32 %v3652_v20, %v3649_v3  ;;  %2036 = vrot.lane.b32.xlu1 %v6763_v56, %s7730_s18  ;;  %v674_v11 = vpop.permute.xlu1 %673  ;;  %v6947_v4 = vcombine.low %v8887_v42, %v8896_v59  ;;  %v3662_v58 = vrot.slane %v3660_v38, 4  ;;  %v3474_v26 = vshll.u32 %v7014_v61, 16  ;;  %v7078_v56 = vld [vmem:[%s11535_s0 + $0xe0] sm:$0x1]  ;;  %v6656_v20 = vld [vmem:[%s11535_s0 + $0x84] sm:$0xf] }
  0xb2   :  { %v3457_v13 = vrot.slane %v3455_v43, 4  ;;  %709 = vst.msk [vmem:[#allocation2 + $0x68] sm:$0xff] %vm695_vm6, %v674_v11  ;;  %v3460_v62 = vrot.slane %v3458_v45, 5  ;;  %v3466_v63 = vrot.slane %v3464_v50, 5  ;;  %v3470_v0 = vrot.slane %v3468_v51, 4 }
  0xb3   :  { %v3654_v60 = vrot.slane %v3653_v39, 4  ;;  %v3663_v48 = vor.u32 %v3662_v58, %v3658_v33  ;;  %v3668_v5 = vrot.slane %v3666_v41, 5  ;;  %v7132_v6 = vrot.slane %v7100_v31, 9  ;;  %v6657_v61 = vld [vmem:[%s11535_s0 + $0x88] sm:$0xf] }
  0xb4   :  { %v4104_v7 = vrot.slane %v7101_v12, 5  ;;  %2020 = vrot.lane.b32.xlu0 %v6755_v27, %s7730_s18  ;;  %v3461_v49 = vor.u32 %v3460_v62, %v3457_v13  ;;  %v3471_v8 = vor.u32 %v3470_v0, %v3466_v63  ;;  %v3476_v14 = vrot.slane %v3474_v26, 5  ;;  %v7204_v27 = vld [vmem:[%s11535_s0 + $0xe4] sm:$0xf]  ;;  %v6658_v51 = vld [vmem:[%s11535_s0 + $0x8c] sm:$0x1] }
  0xb5   :  { %v4107_v16 = vrot.slane %v7102_v52, 5  ;;  %2217 = vrot.lane.b32.xlu1 %v7636_v55, %s7731_s23  ;;  %vm1019_vm8 = vcmask 97344   ;;  %v3659_v54 = vsel %vm7779_vm2, %v3654_v60, %v3658_v33  ;;  %v3664_v18 = vrot.slane %v3663_v48, 4  ;;  %v6696_v58 = vld [vmem:[%s11535_s0 + $0x24] sm:$0xe] }
  0xb6   :  { %v8937_v23 = vsel %vm8004_vm5, %v7132_v6, %v4104_v7  ;;  %v4106_v24 = vrot.slane %v4104_v7, 4  ;;  %v672_v25 = vpop.permute.xlu0 %671  ;;  %v3462_v29 = vrot.slane %v3461_v49, 4  ;;  %v3472_v34 = vrot.slane %v3471_v8, 4  ;;  %v6697_v60 = vld [vmem:[%s11535_s0 + $0x28] sm:$0xf] }
  0xb7   :  { %v7124_v35 = vrot.slane %v7076_v21, 9  ;;  %v4048_v53 = vrot.slane %v7077_v44, 5  ;;  %708 = vst.msk [vmem:[#allocation2 + $0x60] sm:$0xff] %vm695_vm6, %v672_v25  ;;  %v3669_v2 = vsel %vm7779_vm2, %v3664_v18, %v3668_v5  ;;  %v4498_v37 = vshrl.u32 %v7204_v27, 16  ;;  %v6698_v62 = vld [vmem:[%s11535_s0 + $0x2c] sm:$0x1] }
  0xb8   :  { %v8950_v15 = vsel %vm8004_vm5, %v4106_v24, %v4107_v16  ;;  %v4501_v17 = vshll.u32 %v7204_v27, 16  ;;  %2201 = vrot.lane.b32.xlu0 %v7637_v1, %s7731_s23  ;;  %v7068_v46 = vcombine.low %v3659_v54, %v3669_v2  ;;  %v3467_v47 = vsel %vm7779_vm2, %v3462_v29, %v3466_v63  ;;  %v7228_v8 = vld [vmem:[%s11535_s0 + $0x144] sm:$0xf]  ;;  %v7229_v54 = vld [vmem:[%s11535_s0 + $0x148] sm:$0xf] }
  0xb9   :  { %v3477_v57 = vsel %vm7779_vm2, %v3472_v34, %v3476_v14  ;;  %v4051_v3 = vrot.slane %v7078_v56, 5  ;;  %2762 = vrot.lane.b32.xlu1 %v8865_v19, %s7732_s10  ;;  %v678_v31 = vpop.permute.xlu1 %677  ;;  %v7148_v38 = vcombine.low %v8937_v23, %v8950_v15  ;;  %v4050_v41 = vrot.slane %v4048_v53, 4  ;;  %v7230_v25 = vld [vmem:[%s11535_s0 + $0x14c] sm:$0x1]  ;;  %v7268_v29 = vld [vmem:[%s11535_s0 + $0xe4] sm:$0xe] }
  0xba   :  { %v8971_v33 = vcombine.low %v3467_v47, %v3477_v57  ;;  %v4500_v43 = vrot.slane %v4498_v37, 4  ;;  %711 = vst.msk [vmem:[#allocation2 + $0x78] sm:$0xff] %vm695_vm6, %v678_v31  ;;  %v4503_v12 = vrot.slane %v4501_v17, 5  ;;  %v4507_v39 = vshll.u32 %v7205_v32, 16  ;;  %v7269_v42 = vld [vmem:[%s11535_s0 + $0xe8] sm:$0xf] }
  0xbb   :  { %v4511_v45 = vshrl.u32 %v7205_v32, 16  ;;  %v4517_v50 = vshll.u32 %v7206_v40, 16  ;;  %v8981_v19 = vsel %vm8004_vm5, %v7124_v35, %v4048_v53  ;;  %v1506_v52 = vshrl.u32 %v6656_v20, 16  ;;  %v7270_v53 = vld [vmem:[%s11535_s0 + $0xec] sm:$0x1] }
  0xbc   :  { %v1509_v55 = vshll.u32 %v6656_v20, 16  ;;  %v1515_v11 = vshll.u32 %v6657_v61, 16  ;;  %2746 = vrot.lane.b32.xlu0 %v8892_v30, %s7732_s10  ;;  %v8990_v13 = vsel %vm8004_vm5, %v4050_v41, %v4051_v3  ;;  %v4504_v26 = vor.u32 %v4503_v12, %v4500_v43  ;;  %v6720_v2 = vld [vmem:[%s11535_s0 + $0x84] sm:$0xe]  ;;  %v6721_v31 = vld [vmem:[%s11535_s0 + $0x88] sm:$0xf] }
  0xbd   :  { %v4509_v21 = vrot.slane %v4507_v39, 5  ;;  %v4513_v44 = vrot.slane %v4511_v45, 4  ;;  %3083 = vrot.lane.b32.xlu1 %v6955_v9, %s7733_s24  ;;  %v4519_v30 = vrot.slane %v4517_v50, 5  ;;  %v1508_v63 = vrot.slane %v1506_v52, 4  ;;  %v6722_v41 = vld [vmem:[%s11535_s0 + $0x8c] sm:$0x1] }
  0xbe   :  { %v1511_v0 = vrot.slane %v1509_v55, 5  ;;  %v9002_v1 = vrot.slane %v1515_v11, 5  ;;  %v676_v48 = vpop.permute.xlu0 %675  ;;  %v4505_v5 = vrot.slane %v4504_v26, 4  ;;  %v1519_v7 = vshrl.u32 %v6657_v61, 16  ;;  %v7642_v43 = vld [vmem:[%s11535_s0 + $0x144] sm:$0xff]  }
  0xbf   :  { %v4514_v6 = vor.u32 %v4513_v44, %v4509_v21  ;;  %v1525_v49 = vshll.u32 %v6658_v51, 16  ;;  %710 = vst.msk [vmem:[#allocation2 + $0x70] sm:$0xff] %vm695_vm6, %v676_v48  ;;  %v974_v14 = vpop.permute.xlu1 %973  ;;  %v6740_v28 = vrot.slane %v6696_v58, 9  ;;  %v1874_v36 = vrot.slane %v6697_v60, 5  ;;  %v7292_v51 = vld [vmem:[%s11535_s0 + $0x144] sm:$0xe] }
  0xc0   :  { %v1512_v16 = vor.u32 %v1511_v0, %v1508_v63  ;;  %v1877_v9 = vrot.slane %v6698_v62, 5  ;;  %3067 = vrot.lane.b32.xlu0 %v6947_v4, %s7733_s24  ;;  %1021 = vst.msk [vmem:[#allocation2 + $0x8] sm:$0xff] %vm1019_vm8, %v974_v14  ;;  %v7140_v18 = vcombine.low %v8981_v19, %v8990_v13  ;;  %v4510_v24 = vsel %vm7779_vm2, %v4505_v5, %v4509_v21  ;;  %v7294_v19 = vld [vmem:[%s11535_s0 + $0x14c] sm:$0x1] }
  0xc1   :  { %v4515_v56 = vrot.slane %v4514_v6, 4  ;;  %v1521_v27 = vrot.slane %v1519_v7, 4  ;;  %3902 = vrot.lane.b32.xlu1 %v7068_v46, %s7726_s9  ;;  %v1527_v4 = vrot.slane %v1525_v49, 5  ;;  %v1876_v34 = vrot.slane %v1874_v36, 4  ;;  %v6824_v6 = vld [vmem:[%s11535_s0 + $0x30] sm:$0xf] }
  0xc2   :  { %v1513_v59 = vrot.slane %v1512_v16, 4  ;;  %v4690_v35 = vshrl.u32 %v7228_v8, 16  ;;  %v972_v32 = vpop.permute.xlu0 %971  ;;  %v4693_v17 = vshll.u32 %v7228_v8, 16  ;;  %v4699_v46 = vshll.u32 %v7229_v54, 16  ;;  %v6825_v16 = vld [vmem:[%s11535_s0 + $0x34] sm:$0xf] }
  0xc3   :  { %v4520_v40 = vsel %vm7779_vm2, %v4515_v56, %v4519_v30  ;;  %v1522_v37 = vor.u32 %v1521_v27, %v9002_v1  ;;  %1020 = vst.msk [vmem:[#allocation2] sm:$0xff] %vm1019_vm8, %v972_v32  ;;  %v978_v47 = vpop.permute.xlu1 %977  ;;  %v9044_v3 = vsel %vm8004_vm5, %v6740_v28, %v1874_v36  ;;  %v9048_v20 = vsel %vm8004_vm5, %v1876_v34, %v1877_v9  ;;  %v7643_v30 = vld [vmem:[%s11535_s0 + $0xe4] sm:$0xff]  }
  0xc4   :  { %v9040_v57 = vcombine.low %v4510_v24, %v4520_v40  ;;  %v4692_v61 = vrot.slane %v4690_v35, 4  ;;  %3886 = vrot.lane.b32.xlu0 %v8971_v33, %s7726_s9  ;;  %1023 = vst.msk [vmem:[#allocation2 + $0x18] sm:$0xff] %vm1019_vm8, %v978_v47  ;;  %v1518_v12 = vsel %vm7779_vm2, %v1513_v59, %v9002_v1  ;;  %v4695_v45 = vrot.slane %v4693_v17, 5  ;;  %v7293_v33 = vld [vmem:[%s11535_s0 + $0x148] sm:$0xf] }
  0xc5   :  { %v1523_v39 = vrot.slane %v1522_v37, 4  ;;  %v4701_v50 = vrot.slane %v4699_v46, 5  ;;  %4222 = vrot.lane.b32.xlu1 %v7148_v38, %s7727_s26  ;;  %v4703_v52 = vshrl.u32 %v7229_v54, 16  ;;  %v4709_v55 = vshll.u32 %v7230_v25, 16  ;;  %v7397_v17 = vld [vmem:[%s11535_s0 + $0xf4] sm:$0xf] }
  0xc6   :  { %v7316_v11 = vrot.slane %v7268_v29, 9  ;;  %v5091_v58 = vrot.slane %v7269_v42, 5  ;;  %v976_v13 = vpop.permute.xlu0 %975  ;;  %v6756_v26 = vcombine.low %v9044_v3, %v9048_v20  ;;  %v4696_v21 = vor.u32 %v4695_v45, %v4692_v61  ;;  %v6850_v3 = vld [vmem:[%s11535_s0 + $0x98] sm:$0x1] }
  0xc7   :  { %v5094_v44 = vrot.slane %v7270_v53, 5  ;;  %v6748_v60 = vrot.slane %v6720_v2, 9  ;;  %1022 = vst.msk [vmem:[#allocation2 + $0x10] sm:$0xff] %vm1019_vm8, %v976_v13  ;;  %v982_v62 = vpop.permute.xlu1 %981  ;;  %v1528_v23 = vsel %vm7779_vm2, %v1523_v39, %v1527_v4  ;;  %v4705_v15 = vrot.slane %v4703_v52, 4  ;;  %v6826_v4 = vld [vmem:[%s11535_s0 + $0x38] sm:$0x1] }
  0xc8   :  { %v4711_v38 = vrot.slane %v4709_v55, 5  ;;  %v9088_v63 = vsel %vm8004_vm5, %v7316_v11, %v5091_v58  ;;  %4206 = vrot.lane.b32.xlu0 %v7140_v18, %s7727_s26  ;;  %1025 = vst.msk [vmem:[#allocation2 + $0x28] sm:$0xff] %vm1019_vm8, %v982_v62  ;;  %v4697_v0 = vrot.slane %v4696_v21, 4  ;;  %v5093_v1 = vrot.slane %v5091_v58, 4  ;;  %v7396_v53 = vld [vmem:[%s11535_s0 + $0xf0] sm:$0xf] }
  0xc9   :  { %v1930_v48 = vrot.slane %v6721_v31, 5  ;;  %v1933_v5 = vrot.slane %v6722_v41, 5  ;;  %4401 = vrot.lane.b32.xlu1 %v7642_v43, %s7728_s28  ;;  %v4706_v7 = vor.u32 %v4705_v15, %v4701_v50  ;;  %v7324_v49 = vrot.slane %v7292_v51, 9  ;;  %v7398_v41 = vld [vmem:[%s11535_s0 + $0xf8] sm:$0x1] }
  0xca   :  { %v5147_v8 = vrot.slane %v7293_v33, 5  ;;  %v5150_v14 = vrot.slane %v7294_v19, 5  ;;  %v980_v28 = vpop.permute.xlu0 %979  ;;  %v6684_v36 = vcombine.low %v1518_v12, %v1528_v23  ;;  %v9101_v9 = vsel %vm8004_vm5, %v5093_v1, %v5094_v44  ;;  %v6848_v55 = vld [vmem:[%s11535_s0 + $0x90] sm:$0xf]  ;;  %v6849_v44 = vld [vmem:[%s11535_s0 + $0x94] sm:$0xf] }
  0xcb   :  { %v9105_v54 = vsel %vm8004_vm5, %v6748_v60, %v1930_v48  ;;  %v1932_v18 = vrot.slane %v1930_v48, 4  ;;  %1024 = vst.msk [vmem:[#allocation2 + $0x20] sm:$0xff] %vm1019_vm8, %v980_v28  ;;  %v986_v24 = vpop.permute.xlu1 %985  ;;  %v4702_v56 = vsel %vm7779_vm2, %v4697_v0, %v4701_v50  ;;  %v4707_v27 = vrot.slane %v4706_v7, 4  ;;  %v7644_v1 = vld [vmem:[%s11535_s0 + $0x30] sm:$0xff]  }
  0xcc   :  { %v9112_v25 = vsel %vm8004_vm5, %v7324_v49, %v5147_v8  ;;  %v5149_v29 = vrot.slane %v5147_v8, 4  ;;  %4385 = vrot.lane.b32.xlu0 %v7643_v30, %s7728_s28  ;;  %1027 = vst.msk [vmem:[#allocation2 + $0x38] sm:$0xff] %vm1019_vm8, %v986_v24  ;;  %v7332_v42 = vcombine.low %v9088_v63, %v9101_v9  ;;  %v2361_v34 = vshrl.u32 %v6824_v6, 16  ;;  %v6888_v49 = vld [vmem:[%s11535_s0 + $0x30] sm:$0xe] }
  0xcd   :  { %v9120_v59 = vsel %vm8004_vm5, %v1932_v18, %v1933_v5  ;;  %v2364_v35 = vshll.u32 %v6824_v6, 16  ;;  %4929 = vrot.lane.b32.xlu1 %v9040_v57, %s7729_s15  ;;  %v4712_v2 = vsel %vm7779_vm2, %v4707_v27, %v4711_v38  ;;  %v2370_v37 = vshll.u32 %v6825_v16, 16 }
  0xce   :  { %v6764_v32 = vcombine.low %v9105_v54, %v9120_v59  ;;  %v9136_v40 = vsel %vm8004_vm5, %v5149_v29, %v5150_v14  ;;  %v984_v46 = vpop.permute.xlu0 %983  ;;  %v7260_v47 = vcombine.low %v4702_v56, %v4712_v2  ;;  %v2363_v61 = vrot.slane %v2361_v34, 4  ;;  %v6890_v29 = vld [vmem:[%s11535_s0 + $0x38] sm:$0x1]  ;;  %v7420_v2 = vld [vmem:[%s11535_s0 + $0x150] sm:$0xf] }
  0xcf   :  { %v7340_v57 = vcombine.low %v9112_v25, %v9136_v40  ;;  %v2366_v31 = vrot.slane %v2364_v35, 5  ;;  %1026 = vst.msk [vmem:[#allocation2 + $0x30] sm:$0xff] %vm1019_vm8, %v984_v46  ;;  %v990_v43 = vpop.permute.xlu1 %989  ;;  %v2372_v12 = vrot.slane %v2370_v37, 5  ;;  %v2374_v39 = vshrl.u32 %v6825_v16, 16  ;;  %v7421_v37 = vld [vmem:[%s11535_s0 + $0x154] sm:$0xf] }
  0xd0   :  { %v2380_v45 = vshll.u32 %v6826_v4, 16  ;;  %v5541_v50 = vshrl.u32 %v7396_v53, 16  ;;  %1717 = vrot.lane.b32.xlu0 %v6684_v36, %s7729_s15  ;;  %1029 = vst.msk [vmem:[#allocation2 + $0x48] sm:$0xff] %vm1019_vm8, %v990_v43  ;;  %v5544_v33 = vshll.u32 %v7396_v53, 16  ;;  %v5550_v19 = vshll.u32 %v7397_v17, 16 }
  0xd1   :  { %v2367_v51 = vor.u32 %v2366_v31, %v2363_v61  ;;  %v5554_v52 = vshrl.u32 %v7397_v17, 16  ;;  %2022 = vrot.lane.b32.xlu1 %v6756_v26, %s7730_s18  ;;  %v2376_v11 = vrot.slane %v2374_v39, 4  ;;  %v5560_v21 = vshll.u32 %v7398_v41, 16  ;;  %v6889_v36 = vld [vmem:[%s11535_s0 + $0x34] sm:$0xf] }
  0xd2   :  { %v2382_v58 = vrot.slane %v2380_v45, 5  ;;  %v5543_v13 = vrot.slane %v5541_v50, 4  ;;  %v988_v60 = vpop.permute.xlu0 %987  ;;  %v5546_v30 = vrot.slane %v5544_v33, 5  ;;  %v5552_v23 = vrot.slane %v5550_v19, 5  ;;  %v7645_v31 = vld [vmem:[%s11535_s0 + $0xf0] sm:$0xff]  }
  0xd3   :  { %v2368_v62 = vrot.slane %v2367_v51, 4  ;;  %v5556_v15 = vrot.slane %v5554_v52, 4  ;;  %1028 = vst.msk [vmem:[#allocation2 + $0x40] sm:$0xff] %vm1019_vm8, %v988_v60  ;;  %v994_v38 = vpop.permute.xlu1 %993  ;;  %v2377_v63 = vor.u32 %v2376_v11, %v2372_v12  ;;  %v5562_v0 = vrot.slane %v5560_v21, 5  ;;  %v7422_v43 = vld [vmem:[%s11535_s0 + $0x158] sm:$0x1] }
  0xd4   :  { %v2553_v20 = vshrl.u32 %v6848_v55, 16  ;;  %v2556_v26 = vshll.u32 %v6848_v55, 16  ;;  %4945 = vrot.lane.b32.xlu0 %v7260_v47, %s7729_s15  ;;  %1031 = vst.msk [vmem:[#allocation2 + $0x58] sm:$0xff] %vm1019_vm8, %v994_v38  ;;  %v5547_v5 = vor.u32 %v5546_v30, %v5543_v13  ;;  %v2562_v7 = vshll.u32 %v6849_v44, 16  ;;  %v7646_v39 = vld [vmem:[%s11535_s0 + $0x90] sm:$0xff]  }
  0xd5   :  { %v2373_v48 = vsel %vm7779_vm2, %v2368_v62, %v2372_v12  ;;  %v5557_v6 = vor.u32 %v5556_v15, %v5552_v23  ;;  %5249 = vrot.lane.b32.xlu1 %v7332_v42, %s7730_s18  ;;  %vm1200_vm9 = vcmask 130144   ;;  %v2378_v8 = vrot.slane %v2377_v63, 4  ;;  %v7460_v19 = vld [vmem:[%s11535_s0 + $0xf0] sm:$0xe]  ;;  %v7461_v21 = vld [vmem:[%s11535_s0 + $0xf4] sm:$0xf] }
  0xd6   :  { %v2555_v14 = vrot.slane %v2553_v20, 4  ;;  %v2558_v16 = vrot.slane %v2556_v26, 5  ;;  %v2566_v28 = vshrl.u32 %v6849_v44, 16  ;;  %v992_v9 = vpop.permute.xlu0 %991  ;;  %v5548_v18 = vrot.slane %v5547_v5, 4  ;;  %v7462_v44 = vld [vmem:[%s11535_s0 + $0xf8] sm:$0x1] }
  0xd7   :  { %v5558_v24 = vrot.slane %v5557_v6, 4  ;;  %v2564_v56 = vrot.slane %v2562_v7, 5  ;;  %v2572_v27 = vshll.u32 %v6850_v3, 16  ;;  %1030 = vst.msk [vmem:[#allocation2 + $0x50] sm:$0xff] %vm1019_vm8, %v992_v9  ;;  %v998_v42 = vpop.permute.xlu1 %997  ;;  %v2383_v4 = vsel %vm7779_vm2, %v2378_v8, %v2382_v58  ;;  %v6912_v15 = vld [vmem:[%s11535_s0 + $0x90] sm:$0xe] }
  0xd8   :  { %v2559_v34 = vor.u32 %v2558_v16, %v2555_v14  ;;  %v2568_v35 = vrot.slane %v2566_v28, 4  ;;  %v6932_v53 = vrot.slane %v6888_v49, 9  ;;  %2038 = vrot.lane.b32.xlu0 %v6764_v32, %s7730_s18  ;;  %1033 = vst.msk [vmem:[#allocation2 + $0x68] sm:$0xff] %vm1019_vm8, %v998_v42  ;;  %v6868_v17 = vcombine.low %v2373_v48, %v2383_v4  ;;  %v7015_v5 = vld [vmem:[%s11535_s0 + $0xe4] sm:$0xf]  ;;  %v7647_v28 = vld [vmem:[%s11535_s0 + $0x150] sm:$0xff]  }
  0xd9   :  { %v5553_v46 = vsel %vm7779_vm2, %v5548_v18, %v5552_v23  ;;  %v5563_v47 = vsel %vm7779_vm2, %v5558_v24, %v5562_v0  ;;  %v2574_v61 = vrot.slane %v2572_v27, 5  ;;  %2203 = vrot.lane.b32.xlu1 %v7644_v1, %s7731_s23  ;;  %v2921_v32 = vrot.slane %v6889_v36, 5  ;;  %v6914_v0 = vld [vmem:[%s11535_s0 + $0x98] sm:$0x1]  ;;  %v7016_v6 = vld [vmem:[%s11535_s0 + $0xe8] sm:$0xf] }
  0xda   :  { %v9202_v41 = vcombine.low %v5553_v46, %v5563_v47  ;;  %v2560_v54 = vrot.slane %v2559_v34, 4  ;;  %v2569_v59 = vor.u32 %v2568_v35, %v2564_v56  ;;  %v996_v12 = vpop.permute.xlu0 %995  ;;  %v2924_v45 = vrot.slane %v6890_v29, 5  ;;  %v7017_v29 = vld [vmem:[%s11535_s0 + $0xec] sm:$0x1]  ;;  %v7485_v46 = vld [vmem:[%s11535_s0 + $0x154] sm:$0xf] }
  0xdb   :  { %v5733_v50 = vshrl.u32 %v7420_v2, 16  ;;  %v5736_v51 = vshll.u32 %v7420_v2, 16  ;;  %v5742_v33 = vshll.u32 %v7421_v37, 16  ;;  %1032 = vst.msk [vmem:[#allocation2 + $0x60] sm:$0xff] %vm1019_vm8, %v996_v12  ;;  %v1002_v52 = vpop.permute.xlu1 %1001  ;;  %v9218_v58 = vsel %vm8004_vm5, %v6932_v53, %v2921_v32 }
  0xdc   :  { %v2565_v55 = vsel %vm7779_vm2, %v2560_v54, %v2564_v56  ;;  %v2570_v11 = vrot.slane %v2569_v59, 4  ;;  %v2923_v13 = vrot.slane %v2921_v32, 4  ;;  %5265 = vrot.lane.b32.xlu0 %v7340_v57, %s7730_s18  ;;  %1035 = vst.msk [vmem:[#allocation2 + $0x78] sm:$0xff] %vm1019_vm8, %v1002_v52  ;;  %v5746_v23 = vshrl.u32 %v7421_v37, 16  ;;  %v6913_v57 = vld [vmem:[%s11535_s0 + $0x94] sm:$0xf] }
  0xdd   :  { %v5735_v60 = vrot.slane %v5733_v50, 4  ;;  %v5738_v62 = vrot.slane %v5736_v51, 5  ;;  %v5744_v30 = vrot.slane %v5742_v33, 5  ;;  %5428 = vrot.lane.b32.xlu1 %v7645_v31, %s7731_s23  ;;  %v5752_v25 = vshll.u32 %v7422_v43, 16  ;;  %v7486_v32 = vld [vmem:[%s11535_s0 + $0x158] sm:$0x1] }
  0xde   :  { %v2575_v38 = vsel %vm7779_vm2, %v2570_v11, %v2574_v61  ;;  %v9239_v63 = vsel %vm8004_vm5, %v2923_v13, %v2924_v45  ;;  %v7508_v40 = vrot.slane %v7460_v19, 9  ;;  %v1000_v3 = vpop.permute.xlu0 %999  ;;  %v5748_v48 = vrot.slane %v5746_v23, 4  ;;  %v7079_v50 = vld [vmem:[%s11535_s0 + $0xe4] sm:$0xe]  ;;  %v7080_v51 = vld [vmem:[%s11535_s0 + $0xe8] sm:$0xf] }
  0xdf   :  { %v9247_v20 = vcombine.low %v2565_v55, %v2575_v38  ;;  %v6948_v26 = vcombine.low %v9218_v58, %v9239_v63  ;;  %v5739_v1 = vor.u32 %v5738_v62, %v5735_v60  ;;  %1034 = vst.msk [vmem:[#allocation2 + $0x70] sm:$0xff] %vm1019_vm8, %v1000_v3  ;;  %v1155_v7 = vpop.permute.xlu1 %1154  ;;  %v5754_v49 = vrot.slane %v5752_v25, 5  ;;  %v7081_v62 = vld [vmem:[%s11535_s0 + $0xec] sm:$0x1]  ;;  %v7039_v25 = vld [vmem:[%s11535_s0 + $0x144] sm:$0xf] }
  0xe0   :  { %v6134_v8 = vrot.slane %v7461_v21, 5  ;;  %v6137_v14 = vrot.slane %v7462_v44, 5  ;;  %v6940_v16 = vrot.slane %v6912_v15, 9  ;;  %2219 = vrot.lane.b32.xlu0 %v7646_v39, %s7731_s23  ;;  %1202 = vst.msk [vmem:[#allocation2 + $0x8] sm:$0xff] %vm1200_vm9, %v1155_v7  ;;  %v5749_v9 = vor.u32 %v5748_v48, %v5744_v30  ;;  %v7041_v7 = vld [vmem:[%s11535_s0 + $0x14c] sm:$0x1] }
  0xe1   :  { %v5740_v36 = vrot.slane %v5739_v1, 4  ;;  %v2977_v18 = vrot.slane %v6913_v57, 5  ;;  %v2980_v24 = vrot.slane %v6914_v0, 5  ;;  %2748 = vrot.lane.b32.xlu1 %v6868_v17, %s7732_s10  ;;  %v3479_v42 = vshrl.u32 %v7015_v5, 16  ;;  %v7484_v17 = vld [vmem:[%s11535_s0 + $0x150] sm:$0xe] }
  0xe2   :  { %v9266_v56 = vsel %vm8004_vm5, %v7508_v40, %v6134_v8  ;;  %v6136_v27 = vrot.slane %v6134_v8, 4  ;;  %v3482_v4 = vshll.u32 %v7015_v5, 16  ;;  %v1153_v34 = vpop.permute.xlu0 %1152  ;;  %v5750_v53 = vrot.slane %v5749_v9, 4  ;;  %v7040_v1 = vld [vmem:[%s11535_s0 + $0x148] sm:$0xf] }
  0xe3   :  { %v5745_v35 = vsel %vm7779_vm2, %v5740_v36, %v5744_v30  ;;  %v9275_v2 = vsel %vm8004_vm5, %v6940_v16, %v2977_v18  ;;  %v2979_v37 = vrot.slane %v2977_v18, 4  ;;  %1201 = vst.msk [vmem:[#allocation2] sm:$0xff] %vm1200_vm9, %v1153_v34  ;;  %v1159_v47 = vpop.permute.xlu1 %1158  ;;  %v3481_v31 = vrot.slane %v3479_v42, 4  ;;  %v6659_v34 = vld [vmem:[%s11535_s0 + $0x90] sm:$0xf] }
  0xe4   :  { %v9286_v61 = vsel %vm8004_vm5, %v6136_v27, %v6137_v14  ;;  %v3484_v54 = vrot.slane %v3482_v4, 5  ;;  %v3488_v59 = vshll.u32 %v7016_v6, 16  ;;  %5444 = vrot.lane.b32.xlu0 %v7647_v28, %s7731_s23  ;;  %1204 = vst.msk [vmem:[#allocation2 + $0x18] sm:$0xff] %vm1200_vm9, %v1159_v47  ;;  %v5755_v43 = vsel %vm7779_vm2, %v5750_v53, %v5754_v49 }
  0xe5   :  { %v7524_v12 = vcombine.low %v9266_v56, %v9286_v61  ;;  %v9299_v39 = vsel %vm8004_vm5, %v2979_v37, %v2980_v24  ;;  %v3492_v45 = vshrl.u32 %v7016_v6, 16  ;;  %5972 = vrot.lane.b32.xlu1 %v9202_v41, %s7732_s10  ;;  %v7452_v33 = vcombine.low %v5745_v35, %v5755_v43  ;;  %v7104_v24 = vld [vmem:[%s11535_s0 + $0x148] sm:$0xf]  ;;  %v7105_v56 = vld [vmem:[%s11535_s0 + $0x14c] sm:$0x1] }
  0xe6   :  { %v6956_v19 = vcombine.low %v9275_v2, %v9299_v39  ;;  %v3485_v52 = vor.u32 %v3484_v54, %v3481_v31  ;;  %v3490_v55 = vrot.slane %v3488_v59, 5  ;;  %v1157_v11 = vpop.permute.xlu0 %1156  ;;  %v3498_v21 = vshll.u32 %v7017_v29, 16  ;;  %v7232_v39 = vld [vmem:[%s11535_s0 + $0x154] sm:$0xf] }
  0xe7   :  { %v3494_v13 = vrot.slane %v3492_v45, 4  ;;  %v7516_v44 = vrot.slane %v7484_v17, 9  ;;  %v6190_v60 = vrot.slane %v7485_v46, 5  ;;  %1203 = vst.msk [vmem:[#allocation2 + $0x10] sm:$0xff] %vm1200_vm9, %v1157_v11  ;;  %v1163_v30 = vpop.permute.xlu1 %1162  ;;  %v6193_v41 = vrot.slane %v7486_v32, 5 }
  0xe8   :  { %v3486_v23 = vrot.slane %v3485_v52, 4  ;;  %v7125_v15 = vrot.slane %v7079_v50, 9  ;;  %v4055_v38 = vrot.slane %v7080_v51, 5  ;;  %2764 = vrot.lane.b32.xlu0 %v9247_v20, %s7732_s10  ;;  %1206 = vst.msk [vmem:[#allocation2 + $0x28] sm:$0xff] %vm1200_vm9, %v1163_v30  ;;  %v3500_v57 = vrot.slane %v3498_v21, 5 }
  0xe9   :  { %v3495_v40 = vor.u32 %v3494_v13, %v3490_v55  ;;  %v9323_v0 = vsel %vm8004_vm5, %v7516_v44, %v6190_v60  ;;  %v6192_v3 = vrot.slane %v6190_v60, 4  ;;  %3069 = vrot.lane.b32.xlu1 %v6948_v26, %s7733_s24  ;;  %v4058_v6 = vrot.slane %v7081_v62, 5  ;;  %v7103_v26 = vld [vmem:[%s11535_s0 + $0x144] sm:$0xe]  ;;  %v6660_v46 = vld [vmem:[%s11535_s0 + $0x94] sm:$0xf] }
  0xea   :  { %v3491_v20 = vsel %vm7779_vm2, %v3486_v23, %v3490_v55  ;;  %v9336_v48 = vsel %vm8004_vm5, %v7125_v15, %v4055_v38  ;;  %v4057_v5 = vrot.slane %v4055_v38, 4  ;;  %v1161_v49 = vpop.permute.xlu0 %1160  ;;  %v3671_v58 = vshrl.u32 %v7039_v25, 16  ;;  %v7231_v13 = vld [vmem:[%s11535_s0 + $0x150] sm:$0xf]  ;;  %v7233_v15 = vld [vmem:[%s11535_s0 + $0x158] sm:$0x1] }
  0xeb   :  { %v3496_v8 = vrot.slane %v3495_v40, 4  ;;  %v6194_v14 = vsel %vm8004_vm5, %v6192_v3, %v6193_v41  ;;  %v3674_v63 = vshll.u32 %v7039_v25, 16  ;;  %1205 = vst.msk [vmem:[#allocation2 + $0x20] sm:$0xff] %vm1200_vm9, %v1161_v49  ;;  %v1167_v16 = vpop.permute.xlu1 %1166  ;;  %v3680_v9 = vshll.u32 %v7040_v1, 16  ;;  %v7207_v38 = vld [vmem:[%s11535_s0 + $0xf0] sm:$0xf] }
  0xec   :  { %v7532_v28 = vcombine.low %v9323_v0, %v6194_v14  ;;  %v4059_v36 = vsel %vm8004_vm5, %v4057_v5, %v4058_v6  ;;  %v3684_v18 = vshrl.u32 %v7040_v1, 16  ;;  %5988 = vrot.lane.b32.xlu0 %v7452_v33, %s7732_s10  ;;  %1208 = vst.msk [vmem:[#allocation2 + $0x38] sm:$0xff] %vm1200_vm9, %v1167_v16  ;;  %v3673_v42 = vrot.slane %v3671_v58, 4  ;;  %v7208_v5 = vld [vmem:[%s11535_s0 + $0xf4] sm:$0xf] }
  0xed   :  { %v3501_v27 = vsel %vm7779_vm2, %v3496_v8, %v3500_v57  ;;  %v7141_v29 = vcombine.low %v9336_v48, %v4059_v36  ;;  %v3676_v4 = vrot.slane %v3674_v63, 5  ;;  %6292 = vrot.lane.b32.xlu1 %v7524_v12, %s7733_s24  ;;  %v3682_v53 = vrot.slane %v3680_v9, 5  ;;  %v6661_v12 = vld [vmem:[%s11535_s0 + $0x98] sm:$0x1]  ;;  %v7648_v6 = vld [vmem:[%s11535_s0 + $0xf0] sm:$0xff]  }
  0xee   :  { %v7061_v35 = vcombine.low %v3491_v20, %v3501_v27  ;;  %v3686_v37 = vrot.slane %v3684_v18, 4  ;;  %v3690_v17 = vshll.u32 %v7041_v7, 16  ;;  %v1165_v47 = vpop.permute.xlu0 %1164  ;;  %v7133_v31 = vrot.slane %v7103_v26, 9  ;;  %v7209_v58 = vld [vmem:[%s11535_s0 + $0xf8] sm:$0x1] }
  0xef   :  { %v3677_v61 = vor.u32 %v3676_v4, %v3673_v42  ;;  %v4111_v54 = vrot.slane %v7104_v24, 5  ;;  %v4114_v59 = vrot.slane %v7105_v56, 5  ;;  %1207 = vst.msk [vmem:[#allocation2 + $0x30] sm:$0xff] %vm1200_vm9, %v1165_v47  ;;  %v1171_v32 = vpop.permute.xlu1 %1170  ;;  %v1530_v50 = vshrl.u32 %v6659_v34, 16  ;;  %v6723_v9 = vld [vmem:[%s11535_s0 + $0x90] sm:$0xe] }
  0xf0   :  { %v3687_v43 = vor.u32 %v3686_v37, %v3682_v53  ;;  %v3692_v45 = vrot.slane %v3690_v17, 5  ;;  %v1533_v51 = vshll.u32 %v6659_v34, 16  ;;  %3085 = vrot.lane.b32.xlu0 %v6956_v19, %s7733_s24  ;;  %1210 = vst.msk [vmem:[#allocation2 + $0x48] sm:$0xff] %vm1200_vm9, %v1171_v32  ;;  %v1539_v11 = vshll.u32 %v6660_v46, 16  ;;  %v6724_v47 = vld [vmem:[%s11535_s0 + $0x94] sm:$0xf] }
  0xf1   :  { %v3678_v33 = vrot.slane %v3677_v61, 4  ;;  %v9379_v52 = vsel %vm8004_vm5, %v7133_v31, %v4111_v54  ;;  %v4113_v55 = vrot.slane %v4111_v54, 4  ;;  %3888 = vrot.lane.b32.xlu1 %v7061_v35, %s7726_s9  ;;  %v1532_v44 = vrot.slane %v1530_v50, 4 }
  0xf2   :  { %v3688_v21 = vrot.slane %v3687_v43, 4  ;;  %v1535_v60 = vrot.slane %v1533_v51, 5  ;;  %v1543_v2 = vshrl.u32 %v6660_v46, 16  ;;  %v1169_v19 = vpop.permute.xlu0 %1168  ;;  %v1541_v23 = vrot.slane %v1539_v11, 5  ;;  %v6725_v43 = vld [vmem:[%s11535_s0 + $0x98] sm:$0x1] }
  0xf3   :  { %v3683_v62 = vsel %vm7779_vm2, %v3678_v33, %v3682_v53  ;;  %v9392_v30 = vsel %vm8004_vm5, %v4113_v55, %v4114_v59  ;;  %v1549_v41 = vshll.u32 %v6661_v12, 16  ;;  %1209 = vst.msk [vmem:[#allocation2 + $0x40] sm:$0xff] %vm1200_vm9, %v1169_v19  ;;  %v1175_v25 = vpop.permute.xlu1 %1174  ;;  %v4714_v48 = vshrl.u32 %v7231_v13, 16  ;;  %v6700_v55 = vld [vmem:[%s11535_s0 + $0x34] sm:$0xf] }
  0xf4   :  { %v3693_v40 = vsel %vm7779_vm2, %v3688_v21, %v3692_v45  ;;  %v1536_v57 = vor.u32 %v1535_v60, %v1532_v44  ;;  %v1545_v0 = vrot.slane %v1543_v2, 4  ;;  %6308 = vrot.lane.b32.xlu0 %v7532_v28, %s7733_s24  ;;  %1212 = vst.msk [vmem:[#allocation2 + $0x58] sm:$0xff] %vm1200_vm9, %v1175_v25  ;;  %v7149_v1 = vcombine.low %v9379_v52, %v9392_v30  ;;  %v6699_v45 = vld [vmem:[%s11535_s0 + $0x30] sm:$0xe]  ;;  %v6701_v2 = vld [vmem:[%s11535_s0 + $0x38] sm:$0x1] }
  0xf5   :  { %v7069_v3 = vcombine.low %v3683_v62, %v3693_v40  ;;  %v1551_v20 = vrot.slane %v1549_v41, 5  ;;  %4208 = vrot.lane.b32.xlu1 %v7141_v29, %s7727_s26  ;;  %vm1745_vm10 = vcmask 162944   ;;  %v4717_v8 = vshll.u32 %v7231_v13, 16  ;;  %v7649_v11 = vld [vmem:[%s11535_s0 + $0x150] sm:$0xff]  }
  0xf6   :  { %v1537_v7 = vrot.slane %v1536_v57, 4  ;;  %v1546_v49 = vor.u32 %v1545_v0, %v1541_v23  ;;  %v4723_v14 = vshll.u32 %v7232_v39, 16  ;;  %v1173_v63 = vpop.permute.xlu0 %1172  ;;  %v4716_v26 = vrot.slane %v4714_v48, 4  ;;  %v7296_v41 = vld [vmem:[%s11535_s0 + $0x154] sm:$0xf] }
  0xf7   :  { %v4727_v16 = vshrl.u32 %v7232_v39, 16  ;;  %v4733_v28 = vshll.u32 %v7233_v15, 16  ;;  %v4522_v36 = vshrl.u32 %v7207_v38, 16  ;;  %1211 = vst.msk [vmem:[#allocation2 + $0x50] sm:$0xff] %vm1200_vm9, %v1173_v63  ;;  %v1179_v18 = vpop.permute.xlu1 %1178  ;;  %v4719_v27 = vrot.slane %v4717_v8, 5 }
  0xf8   :  { %v1542_v24 = vsel %vm7779_vm2, %v1537_v7, %v1541_v23  ;;  %v1547_v56 = vrot.slane %v1546_v49, 4  ;;  %v4725_v29 = vrot.slane %v4723_v14, 5  ;;  %3904 = vrot.lane.b32.xlu0 %v7069_v3, %s7726_s9  ;;  %1214 = vst.msk [vmem:[#allocation2 + $0x68] sm:$0xff] %vm1200_vm9, %v1179_v18  ;;  %v4525_v35 = vshll.u32 %v7207_v38, 16  ;;  %v7295_v23 = vld [vmem:[%s11535_s0 + $0x150] sm:$0xe] }
  0xf9   :  { %v4729_v42 = vrot.slane %v4727_v16, 4  ;;  %v4735_v4 = vrot.slane %v4733_v28, 5  ;;  %v4524_v34 = vrot.slane %v4522_v36, 4  ;;  %4387 = vrot.lane.b32.xlu1 %v7648_v6, %s7728_s28  ;;  %v4720_v37 = vor.u32 %v4719_v27, %v4716_v26  ;;  %v7297_v0 = vld [vmem:[%s11535_s0 + $0x158] sm:$0x1] }
  0xfa   :  { %v1552_v53 = vsel %vm7779_vm2, %v1547_v56, %v1551_v20  ;;  %v4531_v17 = vshll.u32 %v7208_v5, 16  ;;  %v4535_v46 = vshrl.u32 %v7208_v5, 16  ;;  %v1177_v61 = vpop.permute.xlu0 %1176  ;;  %v4527_v59 = vrot.slane %v4525_v35, 5  ;;  %v7271_v6 = vld [vmem:[%s11535_s0 + $0xf0] sm:$0xe] }
  0xfb   :  { %v6685_v31 = vcombine.low %v1542_v24, %v1552_v53  ;;  %v4730_v54 = vor.u32 %v4729_v42, %v4725_v29  ;;  %v4541_v32 = vshll.u32 %v7209_v58, 16  ;;  %1213 = vst.msk [vmem:[#allocation2 + $0x60] sm:$0xff] %vm1200_vm9, %v1177_v61  ;;  %v1183_v12 = vpop.permute.xlu1 %1182  ;;  %v4721_v50 = vrot.slane %v4720_v37, 4  ;;  %v7272_v58 = vld [vmem:[%s11535_s0 + $0xf4] sm:$0xf] }
  0xfc   :  { %v4533_v51 = vrot.slane %v4531_v17, 5  ;;  %v4537_v33 = vrot.slane %v4535_v46, 4  ;;  %v6749_v52 = vrot.slane %v6723_v9, 9  ;;  %4224 = vrot.lane.b32.xlu0 %v7149_v1, %s7727_s26  ;;  %1216 = vst.msk [vmem:[#allocation2 + $0x78] sm:$0xff] %vm1200_vm9, %v1183_v12  ;;  %v4528_v21 = vor.u32 %v4527_v59, %v4524_v34  ;;  %v7273_v63 = vld [vmem:[%s11535_s0 + $0xf8] sm:$0x1] }
  0xfd   :  { %v4731_v13 = vrot.slane %v4730_v54, 4  ;;  %v4543_v44 = vrot.slane %v4541_v32, 5  ;;  %v1937_v60 = vrot.slane %v6724_v47, 5  ;;  %1719 = vrot.lane.b32.xlu1 %v6685_v31, %s7729_s15  ;;  %v4726_v39 = vsel %vm7779_vm2, %v4721_v50, %v4725_v29  ;;  %v6851_v9 = vld [vmem:[%s11535_s0 + $0x9c] sm:$0xf] }
  0xfe   :  { %v4538_v19 = vor.u32 %v4537_v33, %v4533_v51  ;;  %v1940_v62 = vrot.slane %v6725_v43, 5  ;;  %v6741_v30 = vrot.slane %v6699_v45, 9  ;;  %v1181_v15 = vpop.permute.xlu0 %1180  ;;  %v4529_v25 = vrot.slane %v4528_v21, 4  ;;  %v6852_v42 = vld [vmem:[%s11535_s0 + $0xa0] sm:$0xf] }
  0xff   :  { %v4736_v38 = vsel %vm7779_vm2, %v4731_v13, %v4735_v4  ;;  %v1938_v40 = vsel %vm8004_vm5, %v6749_v52, %v1937_v60  ;;  %v1939_v57 = vrot.slane %v1937_v60, 4  ;;  %1215 = vst.msk [vmem:[#allocation2 + $0x70] sm:$0xff] %vm1200_vm9, %v1181_v15  ;;  %v1700_v3 = vpop.permute.xlu1 %1699  ;;  %v1881_v48 = vrot.slane %v6700_v55, 5  ;;  %v6853_v17 = vld [vmem:[%s11535_s0 + $0xa4] sm:$0x1] }
 0x100   :  { %v7261_v1 = vcombine.low %v4726_v39, %v4736_v38  ;;  %v4539_v20 = vrot.slane %v4538_v19, 4  ;;  %v1884_v5 = vrot.slane %v6701_v2, 5  ;;  %4403 = vrot.lane.b32.xlu0 %v7649_v11, %s7728_s28  ;;  %1747 = vst.msk [vmem:[#allocation2 + $0x8] sm:$0xff] %vm1745_vm10, %v1700_v3  ;;  %v4534_v7 = vsel %vm7779_vm2, %v4529_v25, %v4533_v51  ;;  %v6827_v31 = vld [vmem:[%s11535_s0 + $0x3c] sm:$0xf] }
 0x101   :  { %v1941_v49 = vsel %vm8004_vm5, %v1939_v57, %v1940_v62  ;;  %v7325_v8 = vrot.slane %v7295_v23, 9  ;;  %v5154_v14 = vrot.slane %v7296_v41, 5  ;;  %v1882_v28 = vsel %vm8004_vm5, %v6741_v30, %v1881_v48  ;;  %v6828_v52 = vld [vmem:[%s11535_s0 + $0x40] sm:$0xf]  ;;  %v6829_v21 = vld [vmem:[%s11535_s0 + $0x44] sm:$0x1] }
 0x102   :  { %4947 = vrot.lane.b32.xlu1 %v7261_v1, %s7729_s15  ;;  %v4544_v26 = vsel %vm7779_vm2, %v4539_v20, %v4543_v44  ;;  %v6765_v16 = vcombine.low %v1938_v40, %v1941_v49  ;;  %v1883_v36 = vrot.slane %v1881_v48, 4  ;;  %v1698_v18 = vpop.permute.xlu0 %1697  ;;  %v5157_v29 = vrot.slane %v7297_v0, 5  ;;  %v7423_v62 = vld [vmem:[%s11535_s0 + $0x15c] sm:$0xf]  ;;  %v7424_v1 = vld [vmem:[%s11535_s0 + $0x160] sm:$0xf] }
 0x103   :  { %v7253_v24 = vcombine.low %v4534_v7, %v4544_v26  ;;  %v5155_v56 = vsel %vm8004_vm5, %v7325_v8, %v5154_v14  ;;  %v5156_v27 = vrot.slane %v5154_v14, 4  ;;  %1746 = vst.msk [vmem:[#allocation2] sm:$0xff] %vm1745_vm10, %v1698_v18  ;;  %v1704_v4 = vpop.permute.xlu1 %1703  ;;  %v7317_v35 = vrot.slane %v7271_v6, 9  ;;  %v7650_v30 = vld [vmem:[%s11535_s0 + $0x9c] sm:$0xff]  }
 0x104   :  { %v1885_v34 = vsel %vm8004_vm5, %v1883_v36, %v1884_v5  ;;  %v5098_v53 = vrot.slane %v7272_v58, 5  ;;  %v5101_v37 = vrot.slane %v7273_v63, 5  ;;  %1749 = vst.msk [vmem:[#allocation2 + $0x18] sm:$0xff] %vm1745_vm10, %v1704_v4  ;;  %v2577_v61 = vshrl.u32 %v6851_v9, 16  ;;  %v7651_v48 = vld [vmem:[%s11535_s0 + $0x3c] sm:$0xff]  }
 0x105   :  { %4931 = vrot.lane.b32.xlu0 %v7253_v24, %s7729_s15  ;;  %v6757_v46 = vcombine.low %v1882_v28, %v1885_v34  ;;  %v5158_v47 = vsel %vm8004_vm5, %v5156_v27, %v5157_v29  ;;  %v2580_v43 = vshll.u32 %v6851_v9, 16  ;;  %v2586_v50 = vshll.u32 %v6852_v42, 16  ;;  %v7425_v63 = vld [vmem:[%s11535_s0 + $0x164] sm:$0x1]  ;;  %v7399_v24 = vld [vmem:[%s11535_s0 + $0xfc] sm:$0xf] }
 0x106   :  { %2040 = vrot.lane.b32.xlu1 %v6765_v16, %s7730_s18  ;;  %v7341_v54 = vcombine.low %v5155_v56, %v5158_v47  ;;  %v5099_v59 = vsel %vm8004_vm5, %v7317_v35, %v5098_v53  ;;  %v5100_v32 = vrot.slane %v5098_v53, 4  ;;  %v1702_v45 = vpop.permute.xlu0 %1701  ;;  %v2579_v12 = vrot.slane %v2577_v61, 4  ;;  %v7652_v16 = vld [vmem:[%s11535_s0 + $0x15c] sm:$0xff]   ;;  %v7401_v47 = vld [vmem:[%s11535_s0 + $0x104] sm:$0x1] }
 0x107   :  { %v2590_v51 = vshrl.u32 %v6852_v42, 16  ;;  %v2596_v33 = vshll.u32 %v6853_v17, 16  ;;  %1748 = vst.msk [vmem:[#allocation2 + $0x10] sm:$0xff] %vm1745_vm10, %v1702_v45  ;;  %v1708_v55 = vpop.permute.xlu1 %1707  ;;  %v2582_v13 = vrot.slane %v2580_v43, 5  ;;  %v2385_v44 = vshrl.u32 %v6827_v31, 16  ;;  %v7653_v61 = vld [vmem:[%s11535_s0 + $0xfc] sm:$0xff]  }
 0x108   :  { %v5102_v11 = vsel %vm8004_vm5, %v5100_v32, %v5101_v37  ;;  %v2388_v60 = vshll.u32 %v6827_v31, 16  ;;  %1751 = vst.msk [vmem:[#allocation2 + $0x28] sm:$0xff] %vm1745_vm10, %v1708_v55  ;;  %v2588_v39 = vrot.slane %v2586_v50, 5  ;;  %vm2066_vm11 = vcmask 195744   ;;  %v7400_v34 = vld [vmem:[%s11535_s0 + $0x100] sm:$0xf] }
 0x109   :  { %2024 = vrot.lane.b32.xlu0 %v6757_v46, %s7730_s18  ;;  %v7333_v2 = vcombine.low %v5099_v59, %v5102_v11  ;;  %v2592_v19 = vrot.slane %v2590_v51, 4  ;;  %v2583_v23 = vor.u32 %v2582_v13, %v2579_v12  ;;  %v2387_v41 = vrot.slane %v2385_v44, 4  ;;  %v6915_v43 = vld [vmem:[%s11535_s0 + $0x9c] sm:$0xe]  ;;  %v6916_v45 = vld [vmem:[%s11535_s0 + $0xa0] sm:$0xf] }
 0x10a   :  { %5267 = vrot.lane.b32.xlu1 %v7341_v54, %s7730_s18  ;;  %v2390_v15 = vrot.slane %v2388_v60, 5  ;;  %v2394_v38 = vshll.u32 %v6828_v52, 16  ;;  %v1706_v25 = vpop.permute.xlu0 %1705  ;;  %v2598_v57 = vrot.slane %v2596_v33, 5  ;;  %v2398_v0 = vshrl.u32 %v6828_v52, 16  ;;  %v6917_v52 = vld [vmem:[%s11535_s0 + $0xa4] sm:$0x1] }
 0x10b   :  { %v2593_v40 = vor.u32 %v2592_v19, %v2588_v39  ;;  %v2404_v3 = vshll.u32 %v6829_v21, 16  ;;  %1750 = vst.msk [vmem:[#allocation2 + $0x20] sm:$0xff] %vm1745_vm10, %v1706_v25  ;;  %v1712_v20 = vpop.permute.xlu1 %1711  ;;  %v2584_v5 = vrot.slane %v2583_v23, 4  ;;  %v5757_v49 = vshrl.u32 %v7423_v62, 16  ;;  %v6891_v60 = vld [vmem:[%s11535_s0 + $0x3c] sm:$0xe] }
 0x10c   :  { %v2391_v6 = vor.u32 %v2390_v15, %v2387_v41  ;;  %v2396_v7 = vrot.slane %v2394_v38, 5  ;;  %1753 = vst.msk [vmem:[#allocation2 + $0x38] sm:$0xff] %vm1745_vm10, %v1712_v20  ;;  %v2400_v14 = vrot.slane %v2398_v0, 4  ;;  %v5760_v26 = vshll.u32 %v7423_v62, 16  ;;  %v6892_v23 = vld [vmem:[%s11535_s0 + $0x40] sm:$0xf] }
 0x10d   :  { %5251 = vrot.lane.b32.xlu0 %v7333_v2, %s7730_s18  ;;  %v2594_v8 = vrot.slane %v2593_v40, 4  ;;  %v2406_v58 = vrot.slane %v2404_v3, 5  ;;  %v2589_v28 = vsel %vm7779_vm2, %v2584_v5, %v2588_v39  ;;  %vm2247_vm12 = vcmask 228544   ;;  %v6893_v41 = vld [vmem:[%s11535_s0 + $0x44] sm:$0x1] }
 0x10e   :  { %2221 = vrot.lane.b32.xlu1 %v7650_v30, %s7731_s23  ;;  %v2392_v36 = vrot.slane %v2391_v6, 4  ;;  %v5759_v9 = vrot.slane %v5757_v49, 4  ;;  %v5766_v18 = vshll.u32 %v7424_v1, 16  ;;  %v1710_v56 = vpop.permute.xlu0 %1709  ;;  %v2401_v29 = vor.u32 %v2400_v14, %v2396_v7  ;;  %v7487_v40 = vld [vmem:[%s11535_s0 + $0x15c] sm:$0xe] }
 0x10f   :  { %v2599_v27 = vsel %vm7779_vm2, %v2594_v8, %v2598_v57  ;;  %v5762_v42 = vrot.slane %v5760_v26, 5  ;;  %v5770_v4 = vshrl.u32 %v7424_v1, 16  ;;  %1752 = vst.msk [vmem:[#allocation2 + $0x30] sm:$0xff] %vm1745_vm10, %v1710_v56  ;;  %v1716_v35 = vpop.permute.xlu1 %1715  ;;  %v5776_v46 = vshll.u32 %v7425_v63, 16  ;;  %v7488_v20 = vld [vmem:[%s11535_s0 + $0x160] sm:$0xf] }
 0x110   :  { %v6877_v53 = vcombine.low %v2589_v28, %v2599_v27  ;;  %v2397_v37 = vsel %vm7779_vm2, %v2392_v36, %v2396_v7  ;;  %v5768_v17 = vrot.slane %v5766_v18, 5  ;;  %1755 = vst.msk [vmem:[#allocation2 + $0x48] sm:$0xff] %vm1745_vm10, %v1716_v35  ;;  %v2402_v31 = vrot.slane %v2401_v29, 4  ;;  %v7489_v8 = vld [vmem:[%s11535_s0 + $0x164] sm:$0x1] }
 0x111   :  { %2205 = vrot.lane.b32.xlu0 %v7651_v48, %s7731_s23  ;;  %v5763_v54 = vor.u32 %v5762_v42, %v5759_v9  ;;  %v5772_v59 = vrot.slane %v5770_v4, 4  ;;  %v5565_v32 = vshrl.u32 %v7399_v24, 16  ;;  %v5778_v12 = vrot.slane %v5776_v46, 5  ;;  %v7463_v28 = vld [vmem:[%s11535_s0 + $0xfc] sm:$0xe] }
 0x112   :  { %5446 = vrot.lane.b32.xlu1 %v7652_v16, %s7731_s23  ;;  %v5568_v50 = vshll.u32 %v7399_v24, 16  ;;  %v5574_v51 = vshll.u32 %v7400_v34, 16  ;;  %v5578_v33 = vshrl.u32 %v7400_v34, 16  ;;  %v1714_v55 = vpop.permute.xlu0 %1713  ;;  %v2407_v11 = vsel %vm7779_vm2, %v2402_v31, %v2406_v58  ;;  %v7464_v36 = vld [vmem:[%s11535_s0 + $0x100] sm:$0xf] }
 0x113   :  { %v5764_v13 = vrot.slane %v5763_v54, 4  ;;  %v5773_v21 = vor.u32 %v5772_v59, %v5768_v17  ;;  %v5567_v44 = vrot.slane %v5565_v32, 4  ;;  %1754 = vst.msk [vmem:[#allocation2 + $0x40] sm:$0xff] %vm1745_vm10, %v1714_v55  ;;  %v2035_v2 = vpop.permute.xlu1 %2034  ;;  %v6869_v39 = vcombine.low %v2397_v37, %v2407_v11  ;;  %v7465_v56 = vld [vmem:[%s11535_s0 + $0x104] sm:$0x1] }
 0x114   :  { %v5570_v19 = vrot.slane %v5568_v50, 5  ;;  %v5576_v62 = vrot.slane %v5574_v51, 5  ;;  %v5580_v30 = vrot.slane %v5578_v33, 4  ;;  %2075 = vst.msk [vmem:[#allocation2 + $0x40] sm:$0xff] %vm2066_vm11, %v2035_v2  ;;  %v5584_v25 = vshll.u32 %v7401_v47, 16 }
 0x115   :  { %5430 = vrot.lane.b32.xlu0 %v7653_v61, %s7731_s23  ;;  %v5769_v15 = vsel %vm7779_vm2, %v5764_v13, %v5768_v17  ;;  %v5774_v38 = vrot.slane %v5773_v21, 4  ;;  %vm2792_vm13 = vcmask 261344   ;;  %v6941_v3 = vrot.slane %v6915_v43, 9  ;;  %v7042_v34 = vld [vmem:[%s11535_s0 + $0x150] sm:$0xf] }
 0x116   :  { %2766 = vrot.lane.b32.xlu1 %v6877_v53, %s7732_s10  ;;  %v5571_v57 = vor.u32 %v5570_v19, %v5567_v44  ;;  %v5581_v0 = vor.u32 %v5580_v30, %v5576_v62  ;;  %v2984_v1 = vrot.slane %v6916_v45, 5  ;;  %v2019_v48 = vpop.permute.xlu0 %2018  ;;  %v5586_v6 = vrot.slane %v5584_v25, 5  ;;  %v7043_v32 = vld [vmem:[%s11535_s0 + $0x154] sm:$0xf]  ;;  %v7044_v51 = vld [vmem:[%s11535_s0 + $0x158] sm:$0x1] }
 0x117   :  { %v5779_v5 = vsel %vm7779_vm2, %v5774_v38, %v5778_v12  ;;  %v2987_v7 = vrot.slane %v6917_v52, 5  ;;  %v6933_v49 = vrot.slane %v6891_v60, 9  ;;  %2067 = vst.msk [vmem:[#allocation2] sm:$0xff] %vm2066_vm11, %v2019_v48  ;;  %v2216_v14 = vpop.permute.xlu1 %2215  ;;  %v2928_v18 = vrot.slane %v6892_v23, 5  ;;  %v7018_v13 = vld [vmem:[%s11535_s0 + $0xf0] sm:$0xf] }
 0x118   :  { %v7453_v58 = vcombine.low %v5769_v15, %v5779_v5  ;;  %v5572_v63 = vrot.slane %v5571_v57, 4  ;;  %v5582_v26 = vrot.slane %v5581_v0, 4  ;;  %v2985_v16 = vsel %vm8004_vm5, %v6941_v3, %v2984_v1  ;;  %2256 = vst.msk [vmem:[#allocation2 + $0x40] sm:$0xff] %vm2247_vm12, %v2216_v14  ;;  %v7019_v19 = vld [vmem:[%s11535_s0 + $0xf4] sm:$0xf] }
 0x119   :  { %2750 = vrot.lane.b32.xlu0 %v6869_v39, %s7732_s10  ;;  %v2986_v9 = vrot.slane %v2984_v1, 4  ;;  %v2931_v24 = vrot.slane %v6893_v41, 5  ;;  %vm3113_vm14 = vcmask 294144   ;;  %v7517_v42 = vrot.slane %v7487_v40, 9  ;;  %v7106_v25 = vld [vmem:[%s11535_s0 + $0x150] sm:$0xe] }
 0x11a   :  { %5990 = vrot.lane.b32.xlu1 %v7453_v58, %s7732_s10  ;;  %v5577_v27 = vsel %vm7779_vm2, %v5572_v63, %v5576_v62  ;;  %v5587_v29 = vsel %vm7779_vm2, %v5582_v26, %v5586_v6  ;;  %v6197_v4 = vrot.slane %v7488_v20, 5  ;;  %v2200_v35 = vpop.permute.xlu0 %2199  ;;  %v2929_v17 = vsel %vm8004_vm5, %v6933_v49, %v2928_v18  ;;  %v7020_v62 = vld [vmem:[%s11535_s0 + $0xf8] sm:$0x1]  ;;  %v7107_v1 = vld [vmem:[%s11535_s0 + $0x154] sm:$0xf] }
 0x11b   :  { %v7445_v53 = vcombine.low %v5577_v27, %v5587_v29  ;;  %v2988_v37 = vsel %vm8004_vm5, %v2986_v9, %v2987_v7  ;;  %v2930_v46 = vrot.slane %v2928_v18, 4  ;;  %2248 = vst.msk [vmem:[#allocation2] sm:$0xff] %vm2247_vm12, %v2200_v35  ;;  %v2761_v47 = vpop.permute.xlu1 %2760  ;;  %v6200_v59 = vrot.slane %v7489_v8, 5  ;;  %v7108_v7 = vld [vmem:[%s11535_s0 + $0x158] sm:$0x1] }
 0x11c   :  { %v6957_v61 = vcombine.low %v2985_v16, %v2988_v37  ;;  %v6198_v31 = vsel %vm8004_vm5, %v7517_v42, %v6197_v4  ;;  %v6199_v54 = vrot.slane %v6197_v4, 4  ;;  %2801 = vst.msk [vmem:[#allocation2 + $0x40] sm:$0xff] %vm2792_vm13, %v2761_v47  ;;  %v7509_v45 = vrot.slane %v7463_v28, 9  ;;  %v7082_v49 = vld [vmem:[%s11535_s0 + $0xf0] sm:$0xe]  ;;  %v7656_v4 = vld [vmem:[%s11535_s0 + $0x138] sm:$0xff]  }
 0x11d   :  { %5974 = vrot.lane.b32.xlu0 %v7445_v53, %s7732_s10  ;;  %v2932_v43 = vsel %vm8004_vm5, %v2930_v46, %v2931_v24  ;;  %v6141_v12 = vrot.slane %v7464_v36, 5  ;;  %v6144_v50 = vrot.slane %v7465_v56, 5  ;;  %v3695_v55 = vshrl.u32 %v7042_v34, 16  ;;  %v7083_v16 = vld [vmem:[%s11535_s0 + $0xf4] sm:$0xf] }
 0x11e   :  { %3087 = vrot.lane.b32.xlu1 %v6957_v61, %s7733_s24  ;;  %v6949_v33 = vcombine.low %v2929_v17, %v2932_v43  ;;  %v6201_v52 = vsel %vm8004_vm5, %v6199_v54, %v6200_v59  ;;  %v3698_v11 = vshll.u32 %v7042_v34, 16  ;;  %v2745_v21 = vpop.permute.xlu0 %2744  ;;  %v3704_v39 = vshll.u32 %v7043_v32, 16  ;;  %v7084_v24 = vld [vmem:[%s11535_s0 + $0xf8] sm:$0x1]  ;;  %v7210_v54 = vld [vmem:[%s11535_s0 + $0xfc] sm:$0xf] }
 0x11f   :  { %v7533_v44 = vcombine.low %v6198_v31, %v6201_v52  ;;  %v6142_v60 = vsel %vm8004_vm5, %v7509_v45, %v6141_v12  ;;  %v6143_v2 = vrot.slane %v6141_v12, 4  ;;  %2793 = vst.msk [vmem:[#allocation2] sm:$0xff] %vm2792_vm13, %v2745_v21  ;;  %v3082_v30 = vpop.permute.xlu1 %3081  ;;  %v3697_v23 = vrot.slane %v3695_v55, 4  ;;  %v7212_v21 = vld [vmem:[%s11535_s0 + $0x104] sm:$0x1] }
 0x120   :  { %v3700_v41 = vrot.slane %v3698_v11, 5  ;;  %v3708_v15 = vshrl.u32 %v7043_v32, 16  ;;  %v3714_v38 = vshll.u32 %v7044_v51, 16  ;;  %3122 = vst.msk [vmem:[#allocation2 + $0x40] sm:$0xff] %vm3113_vm14, %v3082_v30  ;;  %v3706_v57 = vrot.slane %v3704_v39, 5 }
 0x121   :  { %3071 = vrot.lane.b32.xlu0 %v6949_v33, %s7733_s24  ;;  %v6145_v40 = vsel %vm8004_vm5, %v6143_v2, %v6144_v50  ;;  %v3503_v0 = vshrl.u32 %v7018_v13, 16  ;;  %v3506_v3 = vshll.u32 %v7018_v13, 16  ;;  %v3512_v63 = vshll.u32 %v7019_v19, 16  ;;  %v7211_v51 = vld [vmem:[%s11535_s0 + $0x100] sm:$0xf]  ;;  %v7657_v33 = vld [vmem:[%s11535_s0 + $0xd8] sm:$0xff]  }
 0x122   :  { %6310 = vrot.lane.b32.xlu1 %v7533_v44, %s7733_s24  ;;  %v7525_v20 = vcombine.low %v6142_v60, %v6145_v40  ;;  %v3701_v48 = vor.u32 %v3700_v41, %v3697_v23  ;;  %v3710_v5 = vrot.slane %v3708_v15, 4  ;;  %v3716_v6 = vrot.slane %v3714_v38, 5  ;;  %v3066_v8 = vpop.permute.xlu0 %3065  ;;  %v6662_v44 = vld [vmem:[%s11535_s0 + $0x9c] sm:$0xf]  ;;  %v6663_v60 = vld [vmem:[%s11535_s0 + $0xa0] sm:$0xf] }
 0x123   :  { %v3505_v14 = vrot.slane %v3503_v0, 4  ;;  %v3508_v58 = vrot.slane %v3506_v3, 5  ;;  %v3516_v26 = vshrl.u32 %v7019_v19, 16  ;;  %3114 = vst.msk [vmem:[#allocation2] sm:$0xff] %vm3113_vm14, %v3066_v8  ;;  %v2037_v28 = vpop.permute.xlu1 %2036  ;;  %v3522_v18 = vshll.u32 %v7020_v62, 16 }
 0x124   :  { %v3702_v36 = vrot.slane %v3701_v48, 4  ;;  %v3711_v9 = vor.u32 %v3710_v5, %v3706_v57  ;;  %vm3147_vm15 = vcmask 293888   ;;  %2076 = vst.msk [vmem:[#allocation2 + $0x48] sm:$0xff] %vm2066_vm11, %v2037_v28  ;;  %v3514_v27 = vrot.slane %v3512_v63, 5  ;;  %v6703_v8 = vld [vmem:[%s11535_s0 + $0x40] sm:$0xf] }
 0x125   :  { %6294 = vrot.lane.b32.xlu0 %v7525_v20, %s7733_s24  ;;  %v3509_v56 = vor.u32 %v3508_v58, %v3505_v14  ;;  %v3518_v29 = vrot.slane %v3516_v26, 4  ;;  %v7134_v42 = vrot.slane %v7106_v25, 9  ;;  %v3524_v53 = vrot.slane %v3522_v18, 5  ;;  %v6664_v20 = vld [vmem:[%s11535_s0 + $0xa4] sm:$0x1] }
 0x126   :  { %v3707_v34 = vsel %vm7779_vm2, %v3702_v36, %v3706_v57  ;;  %v3712_v35 = vrot.slane %v3711_v9, 4  ;;  %v4118_v37 = vrot.slane %v7107_v1, 5  ;;  %v2021_v17 = vpop.permute.xlu0 %2020  ;;  %v4121_v61 = vrot.slane %v7108_v7, 5  ;;  %v6704_v14 = vld [vmem:[%s11535_s0 + $0x44] sm:$0x1]  ;;  %v7654_v36 = vld [vmem:[%s11535_s0 + $0x15c] sm:$0xff]  }
 0x127   :  { %v3510_v46 = vrot.slane %v3509_v56, 4  ;;  %v3519_v47 = vor.u32 %v3518_v29, %v3514_v27  ;;  %v7126_v31 = vrot.slane %v7082_v49, 9  ;;  %2068 = vst.msk [vmem:[#allocation2 + $0x8] sm:$0xff] %vm2066_vm11, %v2021_v17  ;;  %v2218_v32 = vpop.permute.xlu1 %2217  ;;  %v3139_v43 = vld [vmem:[#allocation2 + $0x40] sm:$0xff]  ;;  %v4062_v50 = vrot.slane %v7083_v16, 5 }
 0x128   :  { %v3717_v59 = vsel %vm7779_vm2, %v3712_v35, %v3716_v6  ;;  %v4119_v45 = vsel %vm8004_vm5, %v7134_v42, %v4118_v37  ;;  %v4120_v12 = vrot.slane %v4118_v37, 4  ;;  %2257 = vst.msk [vmem:[#allocation2 + $0x48] sm:$0xff] %vm2247_vm12, %v2218_v32  ;;  %7580 = vmatprep.subr.msk.bf16.mxu0 %vm3147_vm15, %v3139_v43  ;;  %v4065_v13 = vrot.slane %v7084_v24, 5  ;;  %v6702_v49 = vld [vmem:[%s11535_s0 + $0x3c] sm:$0xe] }
 0x129   :  { %v7070_v52 = vcombine.low %v3707_v34, %v3717_v59  ;;  %v3515_v55 = vsel %vm7779_vm2, %v3510_v46, %v3514_v27  ;;  %v3520_v11 = vrot.slane %v3519_v47, 4  ;;  %3398 = vst.msk [vmem:[#allocation2 + $0x40] sm:$0xff] %vm147_vm7, %v7656_v4  ;;  %v4063_v39 = vsel %vm8004_vm5, %v7126_v31, %v4062_v50  ;;  %v7234_v35 = vld [vmem:[%s11535_s0 + $0x15c] sm:$0xf]  ;;  %v7235_v32 = vld [vmem:[%s11535_s0 + $0x160] sm:$0xf] }
 0x12a   :  { %v4122_v2 = vsel %vm8004_vm5, %v4120_v12, %v4121_v61  ;;  %v4064_v19 = vrot.slane %v4062_v50, 4  ;;  %v4546_v62 = vshrl.u32 %v7210_v54, 16  ;;  %v2202_v23 = vpop.permute.xlu0 %2201  ;;  %v3131_v15 = vld [vmem:[#allocation2] sm:$0xff]  ;;  %v4549_v38 = vshll.u32 %v7210_v54, 16 }
 0x12b   :  { %3906 = vrot.lane.b32.xlu1 %v7070_v52, %s7726_s9  ;;  %v3525_v30 = vsel %vm7779_vm2, %v3520_v11, %v3524_v53  ;;  %v7150_v41 = vcombine.low %v4119_v45, %v4122_v2  ;;  %v4555_v25 = vshll.u32 %v7211_v51, 16  ;;  %2249 = vst.msk [vmem:[#allocation2 + $0x8] sm:$0xff] %vm2247_vm12, %v2202_v23  ;;  %v3152_v0 = vsel %vm3147_vm15, %v3131_v15, 0  ;;  %v2763_v3 = vpop.permute.xlu1 %2762  ;;  %v7655_v47 = vld [vmem:[%s11535_s0 + $0xfc] sm:$0xff]  }
 0x12c   :  { %v7062_v40 = vcombine.low %v3515_v55, %v3525_v30  ;;  %v4066_v57 = vsel %vm8004_vm5, %v4064_v19, %v4065_v13  ;;  %v4548_v1 = vrot.slane %v4546_v62, 4  ;;  %3390 = vst.msk [vmem:[#allocation2] sm:$0xff] %vm147_vm7, %v7657_v33  ;;  %7545 = vmatpush3.bf16.xpose.msra.mxu0 %v3152_v0  ;;  %v4551_v5 = vrot.slane %v4549_v38, 5  ;;  %v7275_v62 = vld [vmem:[%s11535_s0 + $0x100] sm:$0xf]  ;;  %v7665_v30 = vld [vmem:[%s11535_s0 + $0x144] sm:$0xff]  }
 0x12d   :  { %v7142_v48 = vcombine.low %v4063_v39, %v4066_v57  ;;  %2802 = vst.msk [vmem:[#allocation2 + $0x48] sm:$0xff] %vm2792_vm13, %v2763_v3  ;;  %v4557_v6 = vrot.slane %v4555_v25, 5  ;;  %v4559_v7 = vshrl.u32 %v7211_v51, 16  ;;  %v4565_v58 = vshll.u32 %v7212_v21, 16  ;;  %v7236_v51 = vld [vmem:[%s11535_s0 + $0x164] sm:$0x1] }
 0x12e   :  { %3890 = vrot.lane.b32.xlu0 %v7062_v40, %s7726_s9  ;;  %v1554_v63 = vshrl.u32 %v6662_v44, 16  ;;  %v1557_v26 = vshll.u32 %v6662_v44, 16  ;;  %v1563_v16 = vshll.u32 %v6663_v60, 16  ;;  %v2747_v28 = vpop.permute.xlu0 %2746  ;;  %v4552_v9 = vor.u32 %v4551_v5, %v4548_v1  ;;  %v7274_v44 = vld [vmem:[%s11535_s0 + $0xfc] sm:$0xe] }
 0x12f   :  { %4226 = vrot.lane.b32.xlu1 %v7150_v41, %s7727_s26  ;;  %v4561_v18 = vrot.slane %v4559_v7, 4  ;;  %v1567_v24 = vshrl.u32 %v6663_v60, 16  ;;  %v1573_v56 = vshll.u32 %v6664_v20, 16  ;;  %2794 = vst.msk [vmem:[#allocation2 + $0x8] sm:$0xff] %vm2792_vm13, %v2747_v28  ;;  %v3084_v27 = vpop.permute.xlu1 %3083  ;;  %v4567_v29 = vrot.slane %v4565_v58, 5 }
 0x130   :  { %v1556_v42 = vrot.slane %v1554_v63, 4  ;;  %v1559_v4 = vrot.slane %v1557_v26, 5  ;;  %v1565_v34 = vrot.slane %v1563_v16, 5  ;;  %3123 = vst.msk [vmem:[#allocation2 + $0x48] sm:$0xff] %vm3113_vm14, %v3084_v27  ;;  %v4553_v53 = vrot.slane %v4552_v9, 4  ;;  %v7664_v26 = vld [vmem:[%s11535_s0 + $0xe4] sm:$0xff]  }
 0x131   :  { %v4562_v37 = vor.u32 %v4561_v18, %v4557_v6  ;;  %v1569_v17 = vrot.slane %v1567_v24, 4  ;;  %v1575_v46 = vrot.slane %v1573_v56, 5  ;;  %v6742_v31 = vrot.slane %v6702_v49, 9  ;;  %v7276_v25 = vld [vmem:[%s11535_s0 + $0x104] sm:$0x1] }
 0x132   :  { %4210 = vrot.lane.b32.xlu0 %v7142_v48, %s7727_s26  ;;  %v1560_v61 = vor.u32 %v1559_v4, %v1556_v42  ;;  %v1888_v54 = vrot.slane %v6703_v8, 5  ;;  %v1891_v59 = vrot.slane %v6704_v14, 5  ;;  %v3068_v43 = vpop.permute.xlu0 %3067  ;;  %v4558_v45 = vsel %vm7779_vm2, %v4553_v53, %v4557_v6  ;;  %v6726_v40 = vld [vmem:[%s11535_s0 + $0x9c] sm:$0xe]  ;;  %v6727_v48 = vld [vmem:[%s11535_s0 + $0xa0] sm:$0xf] }
 0x133   :  { %4405 = vrot.lane.b32.xlu1 %v7654_v36, %s7728_s28  ;;  %v4563_v12 = vrot.slane %v4562_v37, 4  ;;  %v1570_v50 = vor.u32 %v1569_v17, %v1565_v34  ;;  %v4738_v33 = vshrl.u32 %v7234_v35, 16  ;;  %3115 = vst.msk [vmem:[#allocation2 + $0x8] sm:$0xff] %vm3113_vm14, %v3068_v43  ;;  %v3903_v55 = vpop.permute.xlu1 %3902  ;;  %v4741_v21 = vshll.u32 %v7234_v35, 16  ;;  %v6728_v5 = vld [vmem:[%s11535_s0 + $0xa4] sm:$0x1] }
 0x134   :  { %v1561_v52 = vrot.slane %v1560_v61, 4  ;;  %v1889_v11 = vsel %vm8004_vm5, %v6742_v31, %v1888_v54  ;;  %v1890_v13 = vrot.slane %v1888_v54, 4  ;;  %3942 = vst.msk [vmem:[#allocation2 + $0x40] sm:$0xff] %vm695_vm6, %v3903_v55  ;;  %v4747_v19 = vshll.u32 %v7235_v32, 16  ;;  %v7298_v63 = vld [vmem:[%s11535_s0 + $0x15c] sm:$0xe] }
 0x135   :  { %v4568_v60 = vsel %vm7779_vm2, %v4563_v12, %v4567_v29  ;;  %v1571_v2 = vrot.slane %v1570_v50, 4  ;;  %v4740_v39 = vrot.slane %v4738_v33, 4  ;;  %v4743_v38 = vrot.slane %v4741_v21, 5  ;;  %v7299_v18 = vld [vmem:[%s11535_s0 + $0x160] sm:$0xf] }
 0x136   :  { %4389 = vrot.lane.b32.xlu0 %v7655_v47, %s7728_s28  ;;  %v7254_v23 = vcombine.low %v4558_v45, %v4568_v60  ;;  %v1566_v41 = vsel %vm7779_vm2, %v1561_v52, %v1565_v34  ;;  %v1892_v15 = vsel %vm8004_vm5, %v1890_v13, %v1891_v59  ;;  %v3887_v0 = vpop.permute.xlu0 %3886  ;;  %v4749_v1 = vrot.slane %v4747_v19, 5  ;;  %v7300_v42 = vld [vmem:[%s11535_s0 + $0x164] sm:$0x1]  ;;  %v6831_v50 = vld [vmem:[%s11535_s0 + $0x4c] sm:$0xf] }
 0x137   :  { %v1576_v57 = vsel %vm7779_vm2, %v1571_v2, %v1575_v46  ;;  %v6758_v3 = vcombine.low %v1889_v11, %v1892_v15  ;;  %v4751_v20 = vshrl.u32 %v7235_v32, 16  ;;  %3934 = vst.msk [vmem:[#allocation2] sm:$0xff] %vm695_vm6, %v3887_v0  ;;  %v4744_v7 = vor.u32 %v4743_v38, %v4740_v39  ;;  %v4223_v8 = vpop.permute.xlu1 %4222  ;;  %v3140_v14 = vld [vmem:[#allocation2 + $0x48] sm:$0xff]  ;;  %v6832_v52 = vld [vmem:[%s11535_s0 + $0x50] sm:$0x1] }
 0x138   :  { %4933 = vrot.lane.b32.xlu1 %v7254_v23, %s7729_s15  ;;  %v6686_v6 = vcombine.low %v1566_v41, %v1576_v57  ;;  %v4757_v49 = vshll.u32 %v7236_v51, 16  ;;  %v7318_v58 = vrot.slane %v7274_v44, 9  ;;  %4262 = vst.msk [vmem:[#allocation2 + $0x40] sm:$0xff] %vm1019_vm8, %v4223_v8  ;;  %7581 = vmatprep.subr.msk.bf16.mxu0 %vm3147_vm15, %v3140_v14  ;;  %v5105_v28 = vrot.slane %v7275_v62, 5  ;;  %v6830_v46 = vld [vmem:[%s11535_s0 + $0x48] sm:$0xf] }
 0x139   :  { %v4753_v16 = vrot.slane %v4751_v20, 4  ;;  %v5108_v36 = vrot.slane %v7276_v25, 5  ;;  %v6750_v9 = vrot.slane %v6726_v40, 9  ;;  %3399 = vst.msk [vmem:[#allocation2 + $0x48] sm:$0xff] %vm147_vm7, %v7665_v30  ;;  %v4745_v24 = vrot.slane %v4744_v7, 4  ;;  %v7658_v62 = vld [vmem:[%s11535_s0 + $0x48] sm:$0xff]  }
 0x13a   :  { %1721 = vrot.lane.b32.xlu0 %v6686_v6, %s7729_s15  ;;  %v4759_v56 = vrot.slane %v4757_v49, 5  ;;  %v1944_v27 = vrot.slane %v6727_v48, 5  ;;  %v1947_v29 = vrot.slane %v6728_v5, 5  ;;  %v4207_v34 = vpop.permute.xlu0 %4206  ;;  %v5106_v35 = vsel %vm8004_vm5, %v7318_v58, %v5105_v28  ;;  %v3132_v37 = vld [vmem:[#allocation2 + $0x8] sm:$0xff]  ;;  %v7404_v0 = vld [vmem:[%s11535_s0 + $0x110] sm:$0x1] }
 0x13b   :  { %v4754_v4 = vor.u32 %v4753_v16, %v4749_v1  ;;  %v5107_v53 = vrot.slane %v5105_v28, 4  ;;  %v7326_v17 = vrot.slane %v7298_v63, 9  ;;  %v4750_v47 = vsel %vm7779_vm2, %v4745_v24, %v4749_v1  ;;  %4254 = vst.msk [vmem:[#allocation2] sm:$0xff] %vm1019_vm8, %v4207_v34  ;;  %v4402_v59 = vpop.permute.xlu1 %4401  ;;  %v7402_v13 = vld [vmem:[%s11535_s0 + $0x108] sm:$0xf] }
 0x13c   :  { %2026 = vrot.lane.b32.xlu1 %v6758_v3, %s7730_s18  ;;  %v9827_v61 = vsel %vm8004_vm5, %v6750_v9, %v1944_v27  ;;  %v1946_v31 = vrot.slane %v1944_v27, 4  ;;  %v3155_v54 = vsel %vm3147_vm15, %v3132_v37, 0  ;;  %3391 = vst.msk [vmem:[#allocation2 + $0x8] sm:$0xff] %vm147_vm7, %v7664_v26  ;;  %v5161_v45 = vrot.slane %v7299_v18, 5  ;;  %v7403_v38 = vld [vmem:[%s11535_s0 + $0x10c] sm:$0xf] }
 0x13d   :  { %v4755_v32 = vrot.slane %v4754_v4, 4  ;;  %v5109_v43 = vsel %vm8004_vm5, %v5107_v53, %v5108_v36  ;;  %7547 = vmatpush3.bf16.xpose.msra.mxu0 %v3155_v54  ;;  %4441 = vst.msk [vmem:[#allocation2 + $0x40] sm:$0xff] %vm1200_vm9, %v4402_v59  ;;  %v5164_v12 = vrot.slane %v7300_v42, 5  ;;  %v2409_v55 = vshrl.u32 %v6830_v46, 16  ;;  %v7659_v20 = vld [vmem:[%s11535_s0 + $0x108] sm:$0xff]  }
 0x13e   :  { %v7334_v51 = vcombine.low %v5106_v35, %v5109_v43  ;;  %v1948_v33 = vsel %vm8004_vm5, %v1946_v31, %v1947_v29  ;;  %v2412_v11 = vshll.u32 %v6830_v46, 16  ;;  %v4386_v60 = vpop.permute.xlu0 %4385  ;;  %v9850_v2 = vsel %vm8004_vm5, %v7326_v17, %v5161_v45  ;;  %v6854_v7 = vld [vmem:[%s11535_s0 + $0xa8] sm:$0xf]  ;;  %v6855_v26 = vld [vmem:[%s11535_s0 + $0xac] sm:$0xf] }
 0x13f   :  { %v4760_v21 = vsel %vm7779_vm2, %v4755_v32, %v4759_v56  ;;  %v6766_v44 = vcombine.low %v9827_v61, %v1948_v33  ;;  %v5163_v39 = vrot.slane %v5161_v45, 4  ;;  %4433 = vst.msk [vmem:[#allocation2] sm:$0xff] %vm1200_vm9, %v4386_v60  ;;  %v4930_v30 = vpop.permute.xlu1 %4929  ;;  %v2411_v23 = vrot.slane %v2409_v55, 4  ;;  %v6856_v24 = vld [vmem:[%s11535_s0 + $0xb0] sm:$0x1] }
 0x140   :  { %v7262_v19 = vcombine.low %v4750_v47, %v4760_v21  ;;  %5253 = vrot.lane.b32.xlu1 %v7334_v51, %s7730_s18  ;;  %v2414_v41 = vrot.slane %v2412_v11, 5  ;;  %v2418_v15 = vshll.u32 %v6831_v50, 16  ;;  %4977 = vst.msk [vmem:[#allocation2] sm:$0xff] %vm1745_vm10, %v4930_v30  ;;  %v2422_v40 = vshrl.u32 %v6831_v50, 16  ;;  %v6894_v4 = vld [vmem:[%s11535_s0 + $0x48] sm:$0xe] }
 0x141   :  { %v5165_v25 = vsel %vm8004_vm5, %v5163_v39, %v5164_v12  ;;  %v2428_v57 = vshll.u32 %v6832_v52, 16  ;;  %v5589_v3 = vshrl.u32 %v7402_v13, 16  ;;  %v5592_v6 = vshll.u32 %v7402_v13, 16  ;;  %v6895_v17 = vld [vmem:[%s11535_s0 + $0x4c] sm:$0xf] }
 0x142   :  { %4949 = vrot.lane.b32.xlu0 %v7262_v19, %s7729_s15  ;;  %v7342_v1 = vcombine.low %v9850_v2, %v5165_v25  ;;  %v2415_v48 = vor.u32 %v2414_v41, %v2411_v23  ;;  %v2420_v5 = vrot.slane %v2418_v15, 5  ;;  %v1718_v49 = vpop.permute.xlu0 %1717  ;;  %v2424_v8 = vrot.slane %v2422_v40, 4  ;;  %v6896_v50 = vld [vmem:[%s11535_s0 + $0x50] sm:$0x1]  ;;  %v7660_v51 = vld [vmem:[%s11535_s0 + $0xa8] sm:$0xff]  }
 0x143   :  { %v2430_v14 = vrot.slane %v2428_v57, 5  ;;  %v5591_v58 = vrot.slane %v5589_v3, 4  ;;  %v5598_v63 = vshll.u32 %v7403_v38, 16  ;;  %1756 = vst.msk [vmem:[#allocation2 + $0x50] sm:$0xff] %vm1745_vm10, %v1718_v49  ;;  %v2023_v16 = vpop.permute.xlu1 %2022  ;;  %v5594_v36 = vrot.slane %v5592_v6, 5 }
 0x144   :  { %2207 = vrot.lane.b32.xlu1 %v7658_v62, %s7731_s23  ;;  %v2416_v28 = vrot.slane %v2415_v48, 4  ;;  %v5602_v9 = vshrl.u32 %v7403_v38, 16  ;;  %v5608_v18 = vshll.u32 %v7404_v0, 16  ;;  %2069 = vst.msk [vmem:[#allocation2 + $0x10] sm:$0xff] %vm2066_vm11, %v2023_v16  ;;  %v2425_v56 = vor.u32 %v2424_v8, %v2420_v5  ;;  %v7426_v13 = vld [vmem:[%s11535_s0 + $0x168] sm:$0xf] }
 0x145   :  { %v5600_v27 = vrot.slane %v5598_v63, 5  ;;  %v2601_v29 = vshrl.u32 %v6854_v7, 16  ;;  %v2604_v42 = vshll.u32 %v6854_v7, 16  ;;  %v5595_v35 = vor.u32 %v5594_v36, %v5591_v58  ;;  %v7427_v39 = vld [vmem:[%s11535_s0 + $0x16c] sm:$0xf] }
 0x146   :  { %2042 = vrot.lane.b32.xlu0 %v6766_v44, %s7730_s18  ;;  %v2421_v34 = vsel %vm7779_vm2, %v2416_v28, %v2420_v5  ;;  %v5604_v53 = vrot.slane %v5602_v9, 4  ;;  %v5610_v37 = vrot.slane %v5608_v18, 5  ;;  %v4946_v46 = vpop.permute.xlu0 %4945  ;;  %v2426_v47 = vrot.slane %v2425_v56, 4  ;;  %v7428_v19 = vld [vmem:[%s11535_s0 + $0x170] sm:$0x1] }
 0x147   :  { %v2603_v61 = vrot.slane %v2601_v29, 4  ;;  %v2606_v31 = vrot.slane %v2604_v42, 5  ;;  %v2610_v54 = vshll.u32 %v6855_v26, 16  ;;  %4985 = vst.msk [vmem:[#allocation2 + $0x40] sm:$0xff] %vm1745_vm10, %v4946_v46  ;;  %v5250_v59 = vpop.permute.xlu1 %5249  ;;  %v5596_v32 = vrot.slane %v5595_v35, 4 }
 0x148   :  { %5432 = vrot.lane.b32.xlu1 %v7659_v20, %s7731_s23  ;;  %v5605_v43 = vor.u32 %v5604_v53, %v5600_v27  ;;  %v2614_v45 = vshrl.u32 %v6855_v26, 16  ;;  %v2620_v12 = vshll.u32 %v6856_v24, 16  ;;  %v2431_v33 = vsel %vm7779_vm2, %v2426_v47, %v2430_v14  ;;  %5297 = vst.msk [vmem:[#allocation2] sm:$0xff] %vm2066_vm11, %v5250_v59  ;;  %v7466_v38 = vld [vmem:[%s11535_s0 + $0x108] sm:$0xe] }
 0x149   :  { %v2607_v52 = vor.u32 %v2606_v31, %v2603_v61  ;;  %v2612_v55 = vrot.slane %v2610_v54, 5  ;;  %v6934_v11 = vrot.slane %v6894_v4, 9  ;;  %v6870_v21 = vcombine.low %v2421_v34, %v2431_v33  ;;  %v7661_v20 = vld [vmem:[%s11535_s0 + $0x168] sm:$0xff]   ;;  %v7468_v49 = vld [vmem:[%s11535_s0 + $0x110] sm:$0x1] }
 0x14a   :  { %5269 = vrot.lane.b32.xlu0 %v7342_v1, %s7730_s18  ;;  %v5601_v44 = vsel %vm7779_vm2, %v5596_v32, %v5600_v27  ;;  %v5606_v60 = vrot.slane %v5605_v43, 4  ;;  %v2616_v2 = vrot.slane %v2614_v45, 4  ;;  %v2039_v62 = vpop.permute.xlu0 %2038  ;;  %v2622_v23 = vrot.slane %v2620_v12, 5  ;;  %v7467_v1 = vld [vmem:[%s11535_s0 + $0x10c] sm:$0xf] }
 0x14b   :  { %v2608_v30 = vrot.slane %v2607_v52, 4  ;;  %v2935_v41 = vrot.slane %v6895_v17, 5  ;;  %v2938_v15 = vrot.slane %v6896_v50, 5  ;;  %2077 = vst.msk [vmem:[#allocation2 + $0x50] sm:$0xff] %vm2066_vm11, %v2039_v62  ;;  %v2204_v57 = vpop.permute.xlu1 %2203  ;;  %v5781_v0 = vshrl.u32 %v7426_v13, 16 }
 0x14c   :  { %2752 = vrot.lane.b32.xlu1 %v6870_v21, %s7732_s10  ;;  %v5611_v25 = vsel %vm7779_vm2, %v5606_v60, %v5610_v37  ;;  %v2617_v40 = vor.u32 %v2616_v2, %v2612_v55  ;;  %v5784_v3 = vshll.u32 %v7426_v13, 16  ;;  %2250 = vst.msk [vmem:[#allocation2 + $0x10] sm:$0xff] %vm2247_vm12, %v2204_v57  ;;  %v5790_v63 = vshll.u32 %v7427_v39, 16  ;;  %v6918_v26 = vld [vmem:[%s11535_s0 + $0xa8] sm:$0xe] }
 0x14d   :  { %v7446_v48 = vcombine.low %v5601_v44, %v5611_v25  ;;  %v2613_v5 = vsel %vm7779_vm2, %v2608_v30, %v2612_v55  ;;  %v2936_v6 = vsel %vm8004_vm5, %v6934_v11, %v2935_v41  ;;  %v2937_v7 = vrot.slane %v2935_v41, 4  ;;  %v6919_v24 = vld [vmem:[%s11535_s0 + $0xac] sm:$0xf]  ;;  %v6920_v34 = vld [vmem:[%s11535_s0 + $0xb0] sm:$0x1] }
 0x14e   :  { %2223 = vrot.lane.b32.xlu0 %v7660_v51, %s7731_s23  ;;  %v2618_v8 = vrot.slane %v2617_v40, 4  ;;  %v5783_v14 = vrot.slane %v5781_v0, 4  ;;  %v5786_v58 = vrot.slane %v5784_v3, 5  ;;  %v5266_v16 = vpop.permute.xlu0 %5265  ;;  %v5794_v36 = vshrl.u32 %v7427_v39, 16  ;;  %v7021_v46 = vld [vmem:[%s11535_s0 + $0xfc] sm:$0xf] }
 0x14f   :  { %v2939_v28 = vsel %vm8004_vm5, %v2937_v7, %v2938_v15  ;;  %v5800_v9 = vshll.u32 %v7428_v19, 16  ;;  %v7510_v18 = vrot.slane %v7466_v38, 9  ;;  %5305 = vst.msk [vmem:[#allocation2 + $0x40] sm:$0xff] %vm2066_vm11, %v5266_v16  ;;  %v5792_v42 = vrot.slane %v5790_v63, 5  ;;  %v5429_v4 = vpop.permute.xlu1 %5428  ;;  %v7022_v59 = vld [vmem:[%s11535_s0 + $0x100] sm:$0xf] }
 0x150   :  { %5976 = vrot.lane.b32.xlu1 %v7446_v48, %s7732_s10  ;;  %v2623_v56 = vsel %vm7779_vm2, %v2618_v8, %v2622_v23  ;;  %v6950_v27 = vcombine.low %v2936_v6, %v2939_v28  ;;  %v5787_v29 = vor.u32 %v5786_v58, %v5783_v14  ;;  %v5796_v53 = vrot.slane %v5794_v36, 4  ;;  %5476 = vst.msk [vmem:[#allocation2] sm:$0xff] %vm2247_vm12, %v5429_v4  ;;  %v7023_v11 = vld [vmem:[%s11535_s0 + $0x104] sm:$0x1]  ;;  %v7490_v21 = vld [vmem:[%s11535_s0 + $0x168] sm:$0xe] }
 0x151   :  { %v6878_v35 = vcombine.low %v2613_v5, %v2623_v56  ;;  %v5802_v37 = vrot.slane %v5800_v9, 5  ;;  %v6148_v17 = vrot.slane %v7467_v1, 5  ;;  %v6151_v61 = vrot.slane %v7468_v49, 5  ;;  %v7491_v19 = vld [vmem:[%s11535_s0 + $0x16c] sm:$0xf] }
 0x152   :  { %5448 = vrot.lane.b32.xlu0 %v7661_v20, %s7731_s23  ;;  %v5788_v47 = vrot.slane %v5787_v29, 4  ;;  %v6942_v31 = vrot.slane %v6918_v26, 9  ;;  %v2991_v54 = vrot.slane %v6919_v24, 5  ;;  %v5797_v32 = vor.u32 %v5796_v53, %v5792_v42  ;;  %v2220_v43 = vpop.permute.xlu0 %2219  ;;  %v7492_v15 = vld [vmem:[%s11535_s0 + $0x170] sm:$0x1] }
 0x153   :  { %v6149_v45 = vsel %vm8004_vm5, %v7510_v18, %v6148_v17  ;;  %v6150_v12 = vrot.slane %v6148_v17, 4  ;;  %v2994_v50 = vrot.slane %v6920_v34, 5  ;;  %2258 = vst.msk [vmem:[#allocation2 + $0x50] sm:$0xff] %vm2247_vm12, %v2220_v43  ;;  %v2749_v55 = vpop.permute.xlu1 %2748  ;;  %v3527_v13 = vshrl.u32 %v7021_v46, 16  ;;  %v7085_v38 = vld [vmem:[%s11535_s0 + $0xfc] sm:$0xe] }
 0x154   :  { %3073 = vrot.lane.b32.xlu1 %v6950_v27, %s7733_s24  ;;  %v5793_v51 = vsel %vm7779_vm2, %v5788_v47, %v5792_v42  ;;  %v9968_v33 = vsel %vm8004_vm5, %v6942_v31, %v2991_v54  ;;  %v2993_v52 = vrot.slane %v2991_v54, 4  ;;  %v5798_v44 = vrot.slane %v5797_v32, 4  ;;  %2795 = vst.msk [vmem:[#allocation2 + $0x10] sm:$0xff] %vm2792_vm13, %v2749_v55  ;;  %v7086_v1 = vld [vmem:[%s11535_s0 + $0x100] sm:$0xf] }
 0x155   :  { %v6152_v60 = vsel %vm8004_vm5, %v6150_v12, %v6151_v61  ;;  %v3530_v2 = vshll.u32 %v7021_v46, 16  ;;  %v3536_v39 = vshll.u32 %v7022_v59, 16  ;;  %v3529_v23 = vrot.slane %v3527_v13, 4  ;;  %v7087_v20 = vld [vmem:[%s11535_s0 + $0x104] sm:$0x1] }
 0x156   :  { %2768 = vrot.lane.b32.xlu0 %v6878_v35, %s7732_s10  ;;  %v7526_v62 = vcombine.low %v6149_v45, %v6152_v60  ;;  %v2995_v30 = vsel %vm8004_vm5, %v2993_v52, %v2994_v50  ;;  %v3540_v41 = vshrl.u32 %v7022_v59, 16  ;;  %v5803_v25 = vsel %vm7779_vm2, %v5798_v44, %v5802_v37  ;;  %v5445_v57 = vpop.permute.xlu0 %5444  ;;  %v7045_v8 = vld [vmem:[%s11535_s0 + $0x15c] sm:$0xf]  ;;  %v7046_v18 = vld [vmem:[%s11535_s0 + $0x160] sm:$0xf] }
 0x157   :  { %v6958_v40 = vcombine.low %v9968_v33, %v2995_v30  ;;  %v3532_v0 = vrot.slane %v3530_v2, 5  ;;  %v3538_v3 = vrot.slane %v3536_v39, 5  ;;  %v7454_v48 = vcombine.low %v5793_v51, %v5803_v25  ;;  %5484 = vst.msk [vmem:[#allocation2 + $0x40] sm:$0xff] %vm2247_vm12, %v5445_v57  ;;  %v5973_v49 = vpop.permute.xlu1 %5972  ;;  %v7047_v42 = vld [vmem:[%s11535_s0 + $0x164] sm:$0x1]  ;;  %v7673_v30 = vld [vmem:[%s11535_s0 + $0xf0] sm:$0xff]  }
 0x158   :  { %6296 = vrot.lane.b32.xlu1 %v7526_v62, %s7733_s24  ;;  %v3542_v5 = vrot.slane %v3540_v41, 4  ;;  %v3546_v6 = vshll.u32 %v7023_v11, 16  ;;  %v7518_v7 = vrot.slane %v7490_v21, 9  ;;  %v6204_v58 = vrot.slane %v7491_v19, 5  ;;  %6020 = vst.msk [vmem:[#allocation2] sm:$0xff] %vm2792_vm13, %v5973_v49 }
 0x159   :  { %v3533_v14 = vor.u32 %v3532_v0, %v3529_v23  ;;  %v6207_v63 = vrot.slane %v7492_v15, 5  ;;  %v7127_v26 = vrot.slane %v7085_v38, 9  ;;  %v4069_v36 = vrot.slane %v7086_v1, 5  ;;  %v7109_v34 = vld [vmem:[%s11535_s0 + $0x15c] sm:$0xe] }
 0x15a   :  { %5992 = vrot.lane.b32.xlu0 %v7454_v48, %s7732_s10  ;;  %v3543_v16 = vor.u32 %v3542_v5, %v3538_v3  ;;  %v3548_v28 = vrot.slane %v3546_v6, 5  ;;  %v4072_v9 = vrot.slane %v7087_v20, 5  ;;  %v6205_v56 = vsel %vm8004_vm5, %v7518_v7, %v6204_v58  ;;  %v2765_v29 = vpop.permute.xlu0 %2764  ;;  %v7110_v35 = vld [vmem:[%s11535_s0 + $0x160] sm:$0xf]  ;;  %v7111_v61 = vld [vmem:[%s11535_s0 + $0x164] sm:$0x1] }
 0x15b   :  { %v3534_v24 = vrot.slane %v3533_v14, 4  ;;  %v6206_v27 = vrot.slane %v6204_v58, 4  ;;  %v3719_v4 = vshrl.u32 %v7045_v8, 16  ;;  %2803 = vst.msk [vmem:[#allocation2 + $0x50] sm:$0xff] %vm2792_vm13, %v2765_v29  ;;  %v4070_v37 = vsel %vm8004_vm5, %v7127_v26, %v4069_v36  ;;  %v3070_v47 = vpop.permute.xlu1 %3069  ;;  %v6665_v31 = vld [vmem:[%s11535_s0 + $0xa8] sm:$0xf] }
 0x15c   :  { %v3544_v53 = vrot.slane %v3543_v16, 4  ;;  %v4071_v17 = vrot.slane %v4069_v36, 4  ;;  %v3722_v46 = vshll.u32 %v7045_v8, 16  ;;  %v3728_v43 = vshll.u32 %v7046_v18, 16  ;;  %3116 = vst.msk [vmem:[#allocation2 + $0x10] sm:$0xff] %vm3113_vm14, %v3070_v47 }
 0x15d   :  { %v3539_v54 = vsel %vm7779_vm2, %v3534_v24, %v3538_v3  ;;  %v6208_v59 = vsel %vm8004_vm5, %v6206_v27, %v6207_v63  ;;  %v3721_v32 = vrot.slane %v3719_v4, 4  ;;  %v6666_v33 = vld [vmem:[%s11535_s0 + $0xac] sm:$0xf]  ;;  %v3732_v13 = vshrl.u32 %v7046_v18, 16  ;;  %v6667_v44 = vld [vmem:[%s11535_s0 + $0xb0] sm:$0x1] }
 0x15e   :  { %3089 = vrot.lane.b32.xlu0 %v6958_v40, %s7733_s24  ;;  %v3549_v45 = vsel %vm7779_vm2, %v3544_v53, %v3548_v28  ;;  %v7534_v12 = vcombine.low %v6205_v56, %v6208_v59  ;;  %v4073_v50 = vsel %vm8004_vm5, %v4071_v17, %v4072_v9  ;;  %v3724_v51 = vrot.slane %v3722_v46, 5  ;;  %v5989_v21 = vpop.permute.xlu0 %5988  ;;  %v7237_v6 = vld [vmem:[%s11535_s0 + $0x168] sm:$0xf]  ;;  %v7238_v63 = vld [vmem:[%s11535_s0 + $0x16c] sm:$0xf] }
 0x15f   :  { %v7063_v52 = vcombine.low %v3539_v54, %v3549_v45  ;;  %v7143_v55 = vcombine.low %v4070_v37, %v4073_v50  ;;  %v3730_v11 = vrot.slane %v3728_v43, 5  ;;  %v3738_v2 = vshll.u32 %v7047_v42, 16  ;;  %6028 = vst.msk [vmem:[#allocation2 + $0x40] sm:$0xff] %vm2792_vm13, %v5989_v21  ;;  %v6293_v62 = vpop.permute.xlu1 %6292  ;;  %v7662_v28 = vld [vmem:[%s11535_s0 + $0x108] sm:$0xff]   ;;  %v7239_v27 = vld [vmem:[%s11535_s0 + $0x170] sm:$0x1] }
 0x160   :  { %v3725_v60 = vor.u32 %v3724_v51, %v3721_v32  ;;  %v7135_v39 = vrot.slane %v7109_v34, 9  ;;  %v4125_v19 = vrot.slane %v7110_v35, 5  ;;  %v3734_v23 = vrot.slane %v3732_v13, 4  ;;  %6340 = vst.msk [vmem:[#allocation2] sm:$0xff] %vm3113_vm14, %v6293_v62  ;;  %v7213_v17 = vld [vmem:[%s11535_s0 + $0x108] sm:$0xf] }
 0x161   :  { %3892 = vrot.lane.b32.xlu1 %v7063_v52, %s7726_s9  ;;  %v4128_v41 = vrot.slane %v7111_v61, 5  ;;  %v1578_v15 = vshrl.u32 %v6665_v31, 16  ;;  %v1581_v38 = vshll.u32 %v6665_v31, 16  ;;  %v3740_v40 = vrot.slane %v3738_v2, 5  ;;  %v7214_v54 = vld [vmem:[%s11535_s0 + $0x10c] sm:$0xf] }
 0x162   :  { %6312 = vrot.lane.b32.xlu0 %v7534_v12, %s7733_s24  ;;  %v3726_v25 = vrot.slane %v3725_v60, 4  ;;  %v10055_v57 = vsel %vm8004_vm5, %v7135_v39, %v4125_v19  ;;  %v4127_v0 = vrot.slane %v4125_v19, 4  ;;  %v3735_v3 = vor.u32 %v3734_v23, %v3730_v11  ;;  %v3086_v1 = vpop.permute.xlu0 %3085  ;;  %v7672_v32 = vld [vmem:[%s11535_s0 + $0x150] sm:$0xff]   ;;  %v6730_v21 = vld [vmem:[%s11535_s0 + $0xac] sm:$0xf] }
 0x163   :  { %v1580_v20 = vrot.slane %v1578_v15, 4  ;;  %v1583_v48 = vrot.slane %v1581_v38, 5  ;;  %v1587_v5 = vshll.u32 %v6666_v33, 16  ;;  %3124 = vst.msk [vmem:[#allocation2 + $0x50] sm:$0xff] %vm3113_vm14, %v3086_v1  ;;  %v1591_v8 = vshrl.u32 %v6666_v33, 16  ;;  %v3889_v58 = vpop.permute.xlu1 %3888  ;;  %v10070_v26 = vld [vmem:[#allocation2 + $0x10] sm:$0xff] }
 0x164   :  { %v3731_v7 = vsel %vm7779_vm2, %v3726_v25, %v3730_v11  ;;  %v10064_v49 = vsel %vm8004_vm5, %v4127_v0, %v4128_v41  ;;  %v1597_v14 = vshll.u32 %v6667_v44, 16  ;;  %v3736_v16 = vrot.slane %v3735_v3, 4  ;;  %3935 = vst.msk [vmem:[#allocation2 + $0x8] sm:$0xff] %vm695_vm6, %v3889_v58  ;;  %v7215_v51 = vld [vmem:[%s11535_s0 + $0x110] sm:$0x1]  ;;  %v7663_v0 = vld [vmem:[%s11535_s0 + $0x168] sm:$0xff]  }
 0x165   :  { %4212 = vrot.lane.b32.xlu1 %v7143_v55, %s7727_s26  ;;  %v7151_v36 = vcombine.low %v10055_v57, %v10064_v49  ;;  %v1584_v9 = vor.u32 %v1583_v48, %v1580_v20  ;;  %v1589_v18 = vrot.slane %v1587_v5, 5  ;;  %3392 = vst.msk [vmem:[#allocation2 + $0x10] sm:$0xff] %vm147_vm7, %v7673_v30  ;;  %v1593_v24 = vrot.slane %v1591_v8, 4  ;;  %v6729_v33 = vld [vmem:[%s11535_s0 + $0xa8] sm:$0xe] }
 0x166   :  { %v1599_v56 = vrot.slane %v1597_v14, 5  ;;  %v4762_v29 = vshrl.u32 %v7237_v6, 16  ;;  %v4765_v42 = vshll.u32 %v7237_v6, 16  ;;  %v3741_v4 = vsel %vm7779_vm2, %v3736_v16, %v3740_v40  ;;  %v6309_v35 = vpop.permute.xlu0 %6308  ;;  %v6731_v30 = vld [vmem:[%s11535_s0 + $0xb0] sm:$0x1] }
 0x167   :  { %v1585_v34 = vrot.slane %v1584_v9, 4  ;;  %v4771_v53 = vshll.u32 %v7238_v63, 16  ;;  %v4775_v37 = vshrl.u32 %v7238_v63, 16  ;;  %v7071_v46 = vcombine.low %v3731_v7, %v3741_v4  ;;  %6348 = vst.msk [vmem:[#allocation2 + $0x40] sm:$0xff] %vm3113_vm14, %v6309_v35  ;;  %v4209_v59 = vpop.permute.xlu1 %4208  ;;  %v6705_v25 = vld [vmem:[%s11535_s0 + $0x48] sm:$0xe] }
 0x168   :  { %v1594_v47 = vor.u32 %v1593_v24, %v1589_v18  ;;  %v4764_v61 = vrot.slane %v4762_v29, 4  ;;  %v4767_v31 = vrot.slane %v4765_v42, 5  ;;  %v4781_v50 = vshll.u32 %v7239_v27, 16  ;;  %4255 = vst.msk [vmem:[#allocation2 + $0x8] sm:$0xff] %vm1019_vm8, %v4209_v59  ;;  %v6706_v48 = vld [vmem:[%s11535_s0 + $0x4c] sm:$0xf] }
 0x169   :  { %4391 = vrot.lane.b32.xlu1 %v7662_v28, %s7728_s28  ;;  %v1590_v43 = vsel %vm7779_vm2, %v1585_v34, %v1589_v18  ;;  %v4773_v45 = vrot.slane %v4771_v53, 5  ;;  %v4777_v12 = vrot.slane %v4775_v37, 4  ;;  %3908 = vrot.lane.b32.xlu0 %v7071_v46, %s7726_s9  ;;  %v4570_v11 = vshrl.u32 %v7213_v17, 16  ;;  %v6707_v8 = vld [vmem:[%s11535_s0 + $0x50] sm:$0x1] }
 0x16a   :  { %v1595_v52 = vrot.slane %v1594_v47, 4  ;;  %v4768_v55 = vor.u32 %v4767_v31, %v4764_v61  ;;  %v4573_v13 = vshll.u32 %v7213_v17, 16  ;;  %v4783_v60 = vrot.slane %v4781_v50, 5  ;;  %v3905_v19 = vpop.permute.xlu0 %3904  ;;  %v3141_v62 = vld [vmem:[#allocation2 + $0x50] sm:$0xff]  ;;  %v7301_v14 = vld [vmem:[%s11535_s0 + $0x168] sm:$0xe] }
 0x16b   :  { %v4778_v44 = vor.u32 %v4777_v12, %v4773_v45  ;;  %v4579_v2 = vshll.u32 %v7214_v54, 16  ;;  %v4583_v39 = vshrl.u32 %v7214_v54, 16  ;;  %v4572_v15 = vrot.slane %v4570_v11, 4  ;;  %3943 = vst.msk [vmem:[#allocation2 + $0x48] sm:$0xff] %vm695_vm6, %v3905_v19  ;;  %7582 = vmatprep.subr.msk.bf16.mxu0 %vm3147_vm15, %v3141_v62  ;;  %v4388_v40 = vpop.permute.xlu1 %4387  ;;  %v7302_v18 = vld [vmem:[%s11535_s0 + $0x16c] sm:$0xf] }
 0x16c   :  { %v1600_v23 = vsel %vm7779_vm2, %v1595_v52, %v1599_v56  ;;  %v4769_v41 = vrot.slane %v4768_v55, 4  ;;  %v4575_v38 = vrot.slane %v4573_v13, 5  ;;  %3400 = vst.msk [vmem:[#allocation2 + $0x50] sm:$0xff] %vm147_vm7, %v7672_v32  ;;  %v4589_v7 = vshll.u32 %v7215_v51, 16  ;;  %v7303_v24 = vld [vmem:[%s11535_s0 + $0x170] sm:$0x1] }
 0x16d   :  { %v6687_v57 = vcombine.low %v1590_v43, %v1600_v23  ;;  %v4779_v3 = vrot.slane %v4778_v44, 4  ;;  %v4581_v1 = vrot.slane %v4579_v2, 5  ;;  %v4585_v20 = vrot.slane %v4583_v39, 4  ;;  %4434 = vst.msk [vmem:[#allocation2 + $0x8] sm:$0xff] %vm1200_vm9, %v4388_v40  ;;  %4228 = vrot.lane.b32.xlu0 %v7151_v36, %s7727_s26  ;;  %v7277_v4 = vld [vmem:[%s11535_s0 + $0x108] sm:$0xe] }
 0x16e   :  { %v4774_v5 = vsel %vm7779_vm2, %v4769_v41, %v4773_v45  ;;  %v4576_v6 = vor.u32 %v4575_v38, %v4572_v15  ;;  %v6751_v49 = vrot.slane %v6729_v33, 9  ;;  %v1951_v16 = vrot.slane %v6730_v21, 5  ;;  %v4225_v36 = vpop.permute.xlu0 %4224  ;;  %v6365_v9 = vld [vmem:[#allocation2 + $0x40] sm:$0xff]  ;;  %v7278_v46 = vld [vmem:[%s11535_s0 + $0x10c] sm:$0xf] }
 0x16f   :  { %1723 = vrot.lane.b32.xlu1 %v6687_v57, %s7729_s15  ;;  %v4784_v58 = vsel %vm7779_vm2, %v4779_v3, %v4783_v60  ;;  %v4586_v63 = vor.u32 %v4585_v20, %v4581_v1  ;;  %v1954_v28 = vrot.slane %v6731_v30, 5  ;;  %v4591_v29 = vrot.slane %v4589_v7, 5  ;;  %4263 = vst.msk [vmem:[#allocation2 + $0x48] sm:$0xff] %vm1019_vm8, %v4225_v36  ;;  %7588 = vmatprep.subr.msk.bf16.mxu1 %vm3147_vm15, %v6365_v9  ;;  %v1720_v34 = vpop.permute.xlu1 %1719  ;;  %v7279_v59 = vld [vmem:[%s11535_s0 + $0x110] sm:$0x1]  ;;  %v6357_v50 = vld [vmem:[#allocation2] sm:$0xff] }
 0x170   :  { %v7263_v56 = vcombine.low %v4774_v5, %v4784_v58  ;;  %v4577_v27 = vrot.slane %v4576_v6, 4  ;;  %v6743_v42 = vrot.slane %v6705_v25, 9  ;;  %v1952_v53 = vsel %vm8004_vm5, %v6751_v49, %v1951_v16  ;;  %1757 = vst.msk [vmem:[#allocation2 + $0x58] sm:$0xff] %vm1745_vm10, %v1720_v34  ;;  %v6857_v13 = vld [vmem:[%s11535_s0 + $0xb4] sm:$0xf] }
 0x171   :  { %v4587_v35 = vrot.slane %v4586_v63, 4  ;;  %v1953_v37 = vrot.slane %v1951_v16, 4  ;;  %v1895_v17 = vrot.slane %v6706_v48, 5  ;;  %4407 = vrot.lane.b32.xlu0 %v7663_v0, %s7728_s28  ;;  %v1898_v61 = vrot.slane %v6707_v8, 5  ;;  %v6858_v21 = vld [vmem:[%s11535_s0 + $0xb8] sm:$0xf] }
 0x172   :  { %v4582_v47 = vsel %vm7779_vm2, %v4577_v27, %v4581_v1  ;;  %v3158_v31 = vsel %vm3147_vm15, %v10070_v26, 0  ;;  %v7327_v54 = vrot.slane %v7301_v14, 9  ;;  %v4404_v26 = vpop.permute.xlu0 %4403  ;;  %v5168_v52 = vrot.slane %v7302_v18, 5  ;;  %v6859_v19 = vld [vmem:[%s11535_s0 + $0xbc] sm:$0x1]  ;;  %v7666_v18 = vld [vmem:[%s11535_s0 + $0xb4] sm:$0xff]  }
 0x173   :  { %4951 = vrot.lane.b32.xlu1 %v7263_v56, %s7729_s15  ;;  %v4592_v32 = vsel %vm7779_vm2, %v4587_v35, %v4591_v29  ;;  %v1955_v43 = vsel %vm8004_vm5, %v1953_v37, %v1954_v28  ;;  %v1896_v45 = vsel %vm8004_vm5, %v6743_v42, %v1895_v17  ;;  %v1897_v12 = vrot.slane %v1895_v17, 4  ;;  %7549 = vmatpush3.bf16.xpose.msra.mxu0 %v3158_v31  ;;  %v6833_v0 = vld [vmem:[%s11535_s0 + $0x54] sm:$0xf]  ;;  %v6834_v6 = vld [vmem:[%s11535_s0 + $0x58] sm:$0xf] }
 0x174   :  { %v7255_v51 = vcombine.low %v4582_v47, %v4592_v32  ;;  %v6767_v33 = vcombine.low %v1952_v53, %v1955_v43  ;;  %v5171_v55 = vrot.slane %v7303_v24, 5  ;;  %4442 = vst.msk [vmem:[#allocation2 + $0x48] sm:$0xff] %vm1200_vm9, %v4404_v26  ;;  %v4948_v11 = vpop.permute.xlu1 %4947  ;;  %v7319_v60 = vrot.slane %v7277_v4, 9  ;;  %v6835_v58 = vld [vmem:[%s11535_s0 + $0x5c] sm:$0x1]  ;;  %v7667_v4 = vld [vmem:[%s11535_s0 + $0x54] sm:$0xff]  }
 0x175   :  { %v1899_v44 = vsel %vm8004_vm5, %v1897_v12, %v1898_v61  ;;  %v5112_v2 = vrot.slane %v7278_v46, 5  ;;  %v5115_v39 = vrot.slane %v7279_v59, 5  ;;  %4986 = vst.msk [vmem:[#allocation2 + $0x48] sm:$0xff] %vm1745_vm10, %v4948_v11  ;;  %v5169_v30 = vsel %vm8004_vm5, %v7327_v54, %v5168_v52  ;;  %v7429_v63 = vld [vmem:[%s11535_s0 + $0x174] sm:$0xf] }
 0x176   :  { %4935 = vrot.lane.b32.xlu0 %v7255_v51, %s7729_s15  ;;  %v6759_v62 = vcombine.low %v1896_v45, %v1899_v44  ;;  %v5170_v23 = vrot.slane %v5168_v52, 4  ;;  %v6377_v41 = vsel %vm3147_vm15, %v6357_v50, 0  ;;  %v2625_v40 = vshrl.u32 %v6857_v13, 16  ;;  %v7430_v17 = vld [vmem:[%s11535_s0 + $0x178] sm:$0xf] }
 0x177   :  { %2044 = vrot.lane.b32.xlu1 %v6767_v33, %s7730_s18  ;;  %v5113_v15 = vsel %vm8004_vm5, %v7319_v60, %v5112_v2  ;;  %v5114_v38 = vrot.slane %v5112_v2, 4  ;;  %7563 = vmatpush3.bf16.xpose.msra.mxu1 %v6377_v41  ;;  %v4932_v25 = vpop.permute.xlu0 %4931  ;;  %v2628_v57 = vshll.u32 %v6857_v13, 16  ;;  %v2634_v20 = vshll.u32 %v6858_v21, 16  ;;  %v7668_v47 = vld [vmem:[%s11535_s0 + $0x174] sm:$0xff]   ;;  %v7431_v32 = vld [vmem:[%s11535_s0 + $0x17c] sm:$0x1] }
 0x178   :  { %v5172_v3 = vsel %vm8004_vm5, %v5170_v23, %v5171_v55  ;;  %4978 = vst.msk [vmem:[#allocation2 + $0x8] sm:$0xff] %vm1745_vm10, %v4932_v25  ;;  %v2041_v1 = vpop.permute.xlu1 %2040  ;;  %v2638_v48 = vshrl.u32 %v6858_v21, 16  ;;  %v2644_v5 = vshll.u32 %v6859_v19, 16  ;;  %v2627_v8 = vrot.slane %v2625_v40, 4  ;;  %v7405_v26 = vld [vmem:[%s11535_s0 + $0x114] sm:$0xf] }
 0x179   :  { %v7343_v7 = vcombine.low %v5169_v30, %v5172_v3  ;;  %v5116_v49 = vsel %vm8004_vm5, %v5114_v38, %v5115_v39  ;;  %2078 = vst.msk [vmem:[#allocation2 + $0x58] sm:$0xff] %vm2066_vm11, %v2041_v1  ;;  %v2630_v14 = vrot.slane %v2628_v57, 5  ;;  %v2636_v28 = vrot.slane %v2634_v20, 5  ;;  %v7406_v13 = vld [vmem:[%s11535_s0 + $0x118] sm:$0xf] }
 0x17a   :  { %2028 = vrot.lane.b32.xlu0 %v6759_v62, %s7730_s18  ;;  %v7335_v16 = vcombine.low %v5113_v15, %v5116_v49  ;;  %v2640_v36 = vrot.slane %v2638_v48, 4  ;;  %v2646_v9 = vrot.slane %v2644_v5, 5  ;;  %v2433_v27 = vshrl.u32 %v6833_v0, 16  ;;  %v7669_v19 = vld [vmem:[%s11535_s0 + $0x114] sm:$0xff]   ;;  %v7407_v40 = vld [vmem:[%s11535_s0 + $0x11c] sm:$0x1] }
 0x17b   :  { %5271 = vrot.lane.b32.xlu1 %v7343_v7, %s7730_s18  ;;  %v2025_v24 = vpop.permute.xlu0 %2024  ;;  %v2631_v56 = vor.u32 %v2630_v14, %v2627_v8  ;;  %v2436_v29 = vshll.u32 %v6833_v0, 16  ;;  %v2442_v42 = vshll.u32 %v6834_v6, 16  ;;  %v2446_v35 = vshrl.u32 %v6834_v6, 16  ;;  %v6921_v5 = vld [vmem:[%s11535_s0 + $0xb4] sm:$0xe] }
 0x17c   :  { %2070 = vst.msk [vmem:[#allocation2 + $0x18] sm:$0xff] %vm2066_vm11, %v2025_v24  ;;  %v2641_v34 = vor.u32 %v2640_v36, %v2636_v28  ;;  %v2452_v53 = vshll.u32 %v6835_v58, 16  ;;  %v5268_v37 = vpop.permute.xlu1 %5267  ;;  %v5805_v46 = vshrl.u32 %v7429_v63, 16  ;;  %v2435_v31 = vrot.slane %v2433_v27, 4  ;;  %v6922_v6 = vld [vmem:[%s11535_s0 + $0xb8] sm:$0xf] }
 0x17d   :  { %v2632_v61 = vrot.slane %v2631_v56, 4  ;;  %v2438_v54 = vrot.slane %v2436_v29, 5  ;;  %v2444_v59 = vrot.slane %v2442_v42, 5  ;;  %5306 = vst.msk [vmem:[#allocation2 + $0x48] sm:$0xff] %vm2066_vm11, %v5268_v37  ;;  %v2448_v45 = vrot.slane %v2446_v35, 4 }
 0x17e   :  { %5255 = vrot.lane.b32.xlu0 %v7335_v16, %s7730_s18  ;;  %v2642_v43 = vrot.slane %v2641_v34, 4  ;;  %v2454_v12 = vrot.slane %v2452_v53, 5  ;;  %v5807_v50 = vrot.slane %v5805_v46, 4  ;;  %v5808_v55 = vshll.u32 %v7429_v63, 16  ;;  %v6923_v58 = vld [vmem:[%s11535_s0 + $0xbc] sm:$0x1] }
 0x17f   :  { %2225 = vrot.lane.b32.xlu1 %v7666_v18, %s7731_s23  ;;  %v2637_v51 = vsel %vm7779_vm2, %v2632_v61, %v2636_v28  ;;  %v2439_v33 = vor.u32 %v2438_v54, %v2435_v31  ;;  %v5252_v52 = vpop.permute.xlu0 %5251  ;;  %v5814_v11 = vshll.u32 %v7430_v17, 16  ;;  %v2449_v44 = vor.u32 %v2448_v45, %v2444_v59  ;;  %v6897_v63 = vld [vmem:[%s11535_s0 + $0x54] sm:$0xe]  ;;  %v6898_v24 = vld [vmem:[%s11535_s0 + $0x58] sm:$0xf] }
 0x180   :  { %v2647_v21 = vsel %vm7779_vm2, %v2642_v43, %v2646_v9  ;;  %5298 = vst.msk [vmem:[#allocation2 + $0x8] sm:$0xff] %vm2066_vm11, %v5252_v52  ;;  %v5818_v60 = vshrl.u32 %v7430_v17, 16  ;;  %v5824_v2 = vshll.u32 %v7431_v32, 16  ;;  %v2222_v39 = vpop.permute.xlu1 %2221  ;;  %v5810_v23 = vrot.slane %v5808_v55, 5  ;;  %v6899_v56 = vld [vmem:[%s11535_s0 + $0x5c] sm:$0x1] }
 0x181   :  { %v6879_v62 = vcombine.low %v2637_v51, %v2647_v21  ;;  %v2440_v30 = vrot.slane %v2439_v33, 4  ;;  %v5816_v41 = vrot.slane %v5814_v11, 5  ;;  %2259 = vst.msk [vmem:[#allocation2 + $0x58] sm:$0xff] %vm2247_vm12, %v2222_v39  ;;  %v2450_v15 = vrot.slane %v2449_v44, 4  ;;  %v7493_v27 = vld [vmem:[%s11535_s0 + $0x174] sm:$0xe] }
 0x182   :  { %2209 = vrot.lane.b32.xlu0 %v7667_v4, %s7731_s23  ;;  %v5820_v38 = vrot.slane %v5818_v60, 4  ;;  %v5826_v25 = vrot.slane %v5824_v2, 5  ;;  %v5613_v57 = vshrl.u32 %v7405_v26, 16  ;;  %v5811_v3 = vor.u32 %v5810_v23, %v5807_v50  ;;  %v7494_v35 = vld [vmem:[%s11535_s0 + $0x178] sm:$0xf] }
 0x183   :  { %5450 = vrot.lane.b32.xlu1 %v7668_v47, %s7731_s23  ;;  %v2445_v0 = vsel %vm7779_vm2, %v2440_v30, %v2444_v59  ;;  %v5616_v1 = vshll.u32 %v7405_v26, 16  ;;  %v5622_v20 = vshll.u32 %v7406_v13, 16  ;;  %v2206_v48 = vpop.permute.xlu0 %2205  ;;  %v2455_v7 = vsel %vm7779_vm2, %v2450_v15, %v2454_v12  ;;  %v7495_v32 = vld [vmem:[%s11535_s0 + $0x17c] sm:$0x1]  ;;  %v7469_v51 = vld [vmem:[%s11535_s0 + $0x114] sm:$0xe] }
 0x184   :  { %v5821_v49 = vor.u32 %v5820_v38, %v5816_v41  ;;  %v5615_v8 = vrot.slane %v5613_v57, 4  ;;  %v5626_v14 = vshrl.u32 %v7406_v13, 16  ;;  %2251 = vst.msk [vmem:[#allocation2 + $0x18] sm:$0xff] %vm2247_vm12, %v2206_v48  ;;  %v5447_v16 = vpop.permute.xlu1 %5446  ;;  %v6871_v28 = vcombine.low %v2445_v0, %v2455_v7  ;;  %v7470_v13 = vld [vmem:[%s11535_s0 + $0x118] sm:$0xf] }
 0x185   :  { %v5812_v36 = vrot.slane %v5811_v3, 4  ;;  %v5618_v9 = vrot.slane %v5616_v1, 5  ;;  %v5624_v18 = vrot.slane %v5622_v20, 5  ;;  %5485 = vst.msk [vmem:[#allocation2 + $0x48] sm:$0xff] %vm2247_vm12, %v5447_v16  ;;  %v5632_v4 = vshll.u32 %v7407_v40, 16 }
 0x186   :  { %5434 = vrot.lane.b32.xlu0 %v7669_v19, %s7731_s23  ;;  %v5822_v29 = vrot.slane %v5821_v49, 4  ;;  %v5628_v42 = vrot.slane %v5626_v14, 4  ;;  %v6943_v34 = vrot.slane %v6921_v5, 9  ;;  %v2998_v17 = vrot.slane %v6922_v6, 5  ;;  %v7471_v39 = vld [vmem:[%s11535_s0 + $0x11c] sm:$0x1] }
 0x187   :  { %2770 = vrot.lane.b32.xlu1 %v6879_v62, %s7732_s10  ;;  %v5817_v53 = vsel %vm7779_vm2, %v5812_v36, %v5816_v41  ;;  %v5619_v37 = vor.u32 %v5618_v9, %v5615_v8  ;;  %v3001_v46 = vrot.slane %v6923_v58, 5  ;;  %v5431_v47 = vpop.permute.xlu0 %5430  ;;  %v5634_v54 = vrot.slane %v5632_v4, 5  ;;  %v7048_v62 = vld [vmem:[%s11535_s0 + $0x168] sm:$0xf]  ;;  %v7049_v38 = vld [vmem:[%s11535_s0 + $0x16c] sm:$0xf] }
 0x188   :  { %v5827_v61 = vsel %vm7779_vm2, %v5822_v29, %v5826_v25  ;;  %v5629_v31 = vor.u32 %v5628_v42, %v5624_v18  ;;  %v6935_v59 = vrot.slane %v6897_v63, 9  ;;  %5477 = vst.msk [vmem:[#allocation2 + $0x8] sm:$0xff] %vm2247_vm12, %v5431_v47  ;;  %v2767_v43 = vpop.permute.xlu1 %2766  ;;  %v2999_v50 = vsel %vm8004_vm5, %v6943_v34, %v2998_v17  ;;  %v7050_v1 = vld [vmem:[%s11535_s0 + $0x170] sm:$0x1]  ;;  %v7024_v7 = vld [vmem:[%s11535_s0 + $0x108] sm:$0xf] }
 0x189   :  { %v7455_v45 = vcombine.low %v5817_v53, %v5827_v61  ;;  %v5620_v12 = vrot.slane %v5619_v37, 4  ;;  %v3000_v26 = vrot.slane %v2998_v17, 4  ;;  %2804 = vst.msk [vmem:[#allocation2 + $0x58] sm:$0xff] %vm2792_vm13, %v2767_v43  ;;  %v2942_v52 = vrot.slane %v6898_v24, 5  ;;  %v7025_v63 = vld [vmem:[%s11535_s0 + $0x10c] sm:$0xf] }
 0x18a   :  { %2754 = vrot.lane.b32.xlu0 %v6871_v28, %s7732_s10  ;;  %v5630_v33 = vrot.slane %v5629_v31, 4  ;;  %v2945_v55 = vrot.slane %v6899_v56, 5  ;;  %v7519_v11 = vrot.slane %v7493_v27, 9  ;;  %v6211_v60 = vrot.slane %v7494_v35, 5  ;;  %v7026_v24 = vld [vmem:[%s11535_s0 + $0x110] sm:$0x1] }
 0x18b   :  { %5994 = vrot.lane.b32.xlu1 %v7455_v45, %s7732_s10  ;;  %v5625_v21 = vsel %vm7779_vm2, %v5620_v12, %v5624_v18  ;;  %v3002_v44 = vsel %vm8004_vm5, %v3000_v26, %v3001_v46  ;;  %v6214_v2 = vrot.slane %v7495_v32, 5  ;;  %v2751_v19 = vpop.permute.xlu0 %2750  ;;  %v2943_v41 = vsel %vm8004_vm5, %v6935_v59, %v2942_v52  ;;  %v7112_v56 = vld [vmem:[%s11535_s0 + $0x168] sm:$0xe]  ;;  %v7113_v35 = vld [vmem:[%s11535_s0 + $0x16c] sm:$0xf] }
 0x18c   :  { %v5635_v30 = vsel %vm7779_vm2, %v5630_v33, %v5634_v54  ;;  %v6959_v23 = vcombine.low %v2999_v50, %v3002_v44  ;;  %v2944_v15 = vrot.slane %v2942_v52, 4  ;;  %2796 = vst.msk [vmem:[#allocation2 + $0x18] sm:$0xff] %vm2792_vm13, %v2751_v19  ;;  %v5991_v25 = vpop.permute.xlu1 %5990  ;;  %v6212_v57 = vsel %vm8004_vm5, %v7519_v11, %v6211_v60  ;;  %v7114_v53 = vld [vmem:[%s11535_s0 + $0x170] sm:$0x1]  ;;  %v7088_v61 = vld [vmem:[%s11535_s0 + $0x108] sm:$0xe] }
 0x18d   :  { %v7447_v40 = vcombine.low %v5625_v21, %v5635_v30  ;;  %v6213_v0 = vrot.slane %v6211_v60, 4  ;;  %v7511_v3 = vrot.slane %v7469_v51, 9  ;;  %6029 = vst.msk [vmem:[#allocation2 + $0x48] sm:$0xff] %vm2792_vm13, %v5991_v25  ;;  %v6155_v48 = vrot.slane %v7470_v13, 5  ;;  %v7089_v51 = vld [vmem:[%s11535_s0 + $0x10c] sm:$0xf] }
 0x18e   :  { %v2946_v20 = vsel %vm8004_vm5, %v2944_v15, %v2945_v55  ;;  %v6158_v5 = vrot.slane %v7471_v39, 5  ;;  %v3743_v6 = vshrl.u32 %v7048_v62, 16  ;;  %v3746_v14 = vshll.u32 %v7048_v62, 16  ;;  %v7090_v33 = vld [vmem:[%s11535_s0 + $0x110] sm:$0x1]  ;;  %v7681_v44 = vld [vmem:[%s11535_s0 + $0x15c] sm:$0xff]  }
 0x18f   :  { %5978 = vrot.lane.b32.xlu0 %v7447_v40, %s7732_s10  ;;  %3091 = vrot.lane.b32.xlu1 %v6959_v23, %s7733_s24  ;;  %v6951_v49 = vcombine.low %v2943_v41, %v2946_v20  ;;  %v6215_v8 = vsel %vm8004_vm5, %v6213_v0, %v6214_v2  ;;  %v3752_v58 = vshll.u32 %v7049_v38, 16  ;;  %v5975_v16 = vpop.permute.xlu0 %5974  ;;  %v6156_v36 = vsel %vm8004_vm5, %v7511_v3, %v6155_v48  ;;  %v7216_v62 = vld [vmem:[%s11535_s0 + $0x114] sm:$0xf]  ;;  %v7217_v25 = vld [vmem:[%s11535_s0 + $0x118] sm:$0xf] }
 0x190   :  { %v7535_v28 = vcombine.low %v6212_v57, %v6215_v8  ;;  %v6157_v9 = vrot.slane %v6155_v48, 4  ;;  %v3745_v18 = vrot.slane %v3743_v6, 4  ;;  %6021 = vst.msk [vmem:[#allocation2 + $0x8] sm:$0xff] %vm2792_vm13, %v5975_v16  ;;  %v3088_v27 = vpop.permute.xlu1 %3087  ;;  %v3748_v29 = vrot.slane %v3746_v14, 5  ;;  %v7680_v48 = vld [vmem:[%s11535_s0 + $0xfc] sm:$0xff]  }
 0x191   :  { %v3754_v42 = vrot.slane %v3752_v58, 5  ;;  %v3756_v4 = vshrl.u32 %v7049_v38, 16  ;;  %v3762_v34 = vshll.u32 %v7050_v1, 16  ;;  %3125 = vst.msk [vmem:[#allocation2 + $0x58] sm:$0xff] %vm3113_vm14, %v3088_v27  ;;  %v3551_v17 = vshrl.u32 %v7024_v7, 16 }
 0x192   :  { %v6159_v37 = vsel %vm8004_vm5, %v6157_v9, %v6158_v5  ;;  %v3554_v46 = vshll.u32 %v7024_v7, 16  ;;  %v3560_v47 = vshll.u32 %v7025_v63, 16  ;;  %v3749_v54 = vor.u32 %v3748_v29, %v3745_v18  ;;  %v7218_v1 = vld [vmem:[%s11535_s0 + $0x11c] sm:$0x1]  ;;  %v6668_v16 = vld [vmem:[%s11535_s0 + $0xb4] sm:$0xf] }
 0x193   :  { %3075 = vrot.lane.b32.xlu0 %v6951_v49, %s7733_s24  ;;  %6314 = vrot.lane.b32.xlu1 %v7535_v28, %s7733_s24  ;;  %v7527_v31 = vcombine.low %v6156_v36, %v6159_v37  ;;  %v3758_v59 = vrot.slane %v3756_v4, 4  ;;  %v3764_v32 = vrot.slane %v3762_v34, 5  ;;  %v3072_v43 = vpop.permute.xlu0 %3071  ;;  %v3553_v45 = vrot.slane %v3551_v17, 4  ;;  %v6669_v4 = vld [vmem:[%s11535_s0 + $0xb8] sm:$0xf] }
 0x194   :  { %v3556_v12 = vrot.slane %v3554_v46, 5  ;;  %v3562_v50 = vrot.slane %v3560_v47, 5  ;;  %v3564_v26 = vshrl.u32 %v7025_v63, 16  ;;  %3117 = vst.msk [vmem:[#allocation2 + $0x18] sm:$0xff] %vm3113_vm14, %v3072_v43  ;;  %v6311_v52 = vpop.permute.xlu1 %6310  ;;  %v3750_v55 = vrot.slane %v3749_v54, 4 }
 0x195   :  { %v3759_v11 = vor.u32 %v3758_v59, %v3754_v42  ;;  %v3570_v13 = vshll.u32 %v7026_v24, 16  ;;  %v7136_v21 = vrot.slane %v7112_v56, 9  ;;  %6349 = vst.msk [vmem:[#allocation2 + $0x48] sm:$0xff] %vm3113_vm14, %v6311_v52  ;;  %v4132_v39 = vrot.slane %v7113_v35, 5  ;;  %v6670_v17 = vld [vmem:[%s11535_s0 + $0xbc] sm:$0x1] }
 0x196   :  { %v3557_v60 = vor.u32 %v3556_v12, %v3553_v45  ;;  %v3566_v2 = vrot.slane %v3564_v26, 4  ;;  %v4135_v19 = vrot.slane %v7114_v53, 5  ;;  %v3755_v30 = vsel %vm7779_vm2, %v3750_v55, %v3754_v42  ;;  %v6709_v43 = vld [vmem:[%s11535_s0 + $0x58] sm:$0xf] }
 0x197   :  { %6298 = vrot.lane.b32.xlu0 %v7527_v31, %s7733_s24  ;;  %v3760_v23 = vrot.slane %v3759_v11, 4  ;;  %v3572_v41 = vrot.slane %v3570_v13, 5  ;;  %v7128_v15 = vrot.slane %v7088_v61, 9  ;;  %v6295_v38 = vpop.permute.xlu0 %6294  ;;  %v4133_v0 = vsel %vm8004_vm5, %v7136_v21, %v4132_v39  ;;  %v6708_v61 = vld [vmem:[%s11535_s0 + $0x54] sm:$0xe] }
 0x198   :  { %v3558_v40 = vrot.slane %v3557_v60, 4  ;;  %v3567_v57 = vor.u32 %v3566_v2, %v3562_v50  ;;  %v4134_v3 = vrot.slane %v4132_v39, 4  ;;  %6341 = vst.msk [vmem:[#allocation2 + $0x8] sm:$0xff] %vm3113_vm14, %v6295_v38  ;;  %v3142_v20 = vld [vmem:[#allocation2 + $0x58] sm:$0xff]  ;;  %v4076_v6 = vrot.slane %v7089_v51, 5 }
 0x199   :  { %v3765_v5 = vsel %vm7779_vm2, %v3760_v23, %v3764_v32  ;;  %v4079_v7 = vrot.slane %v7090_v33, 5  ;;  %v4594_v49 = vshrl.u32 %v7216_v62, 16  ;;  %7583 = vmatprep.subr.msk.bf16.mxu0 %vm3147_vm15, %v3142_v20  ;;  %3401 = vst.msk [vmem:[#allocation2 + $0x58] sm:$0xff] %vm147_vm7, %v7681_v44  ;;  %v4597_v27 = vshll.u32 %v7216_v62, 16  ;;  %v7670_v51 = vld [vmem:[%s11535_s0 + $0x174] sm:$0xff]  }
 0x19a   :  { %v7072_v8 = vcombine.low %v3755_v30, %v3765_v5  ;;  %v3563_v14 = vsel %vm7779_vm2, %v3558_v40, %v3562_v50  ;;  %v3568_v58 = vrot.slane %v3567_v57, 4  ;;  %v4136_v63 = vsel %vm8004_vm5, %v4134_v3, %v4135_v19  ;;  %v6710_v21 = vld [vmem:[%s11535_s0 + $0x5c] sm:$0x1]  ;;  %v7240_v19 = vld [vmem:[%s11535_s0 + $0x174] sm:$0xf] }
 0x19b   :  { %v7152_v28 = vcombine.low %v4133_v0, %v4136_v63  ;;  %v4077_v36 = vsel %vm8004_vm5, %v7128_v15, %v4076_v6  ;;  %v4078_v9 = vrot.slane %v4076_v6, 4  ;;  %v4596_v18 = vrot.slane %v4594_v49, 4  ;;  %v10402_v24 = vld [vmem:[#allocation2 + $0x18] sm:$0xff]  ;;  %v7280_v49 = vld [vmem:[%s11535_s0 + $0x114] sm:$0xe] }
 0x19c   :  { %3910 = vrot.lane.b32.xlu1 %v7072_v8, %s7726_s9  ;;  %v3573_v56 = vsel %vm7779_vm2, %v3568_v58, %v3572_v41  ;;  %v4603_v29 = vshll.u32 %v7217_v25, 16  ;;  %v4607_v42 = vshrl.u32 %v7217_v25, 16  ;;  %v6366_v34 = vld [vmem:[#allocation2 + $0x48] sm:$0xff]  ;;  %3393 = vst.msk [vmem:[#allocation2 + $0x18] sm:$0xff] %vm147_vm7, %v7680_v48  ;;  %v4613_v37 = vshll.u32 %v7218_v1, 16  ;;  %v7671_v38 = vld [vmem:[%s11535_s0 + $0x114] sm:$0xff]  }
 0x19d   :  { %v7064_v35 = vcombine.low %v3563_v14, %v3573_v56  ;;  %v4080_v53 = vsel %vm8004_vm5, %v4078_v9, %v4079_v7  ;;  %v1602_v46 = vshrl.u32 %v6668_v16, 16  ;;  %v3907_v47 = vpop.permute.xlu1 %3906  ;;  %7589 = vmatprep.subr.msk.bf16.mxu1 %vm3147_vm15, %v6366_v34  ;;  %v4599_v54 = vrot.slane %v4597_v27, 5  ;;  %v7241_v3 = vld [vmem:[%s11535_s0 + $0x178] sm:$0xf]  ;;  %v7242_v5 = vld [vmem:[%s11535_s0 + $0x17c] sm:$0x1] }
 0x19e   :  { %v7144_v31 = vcombine.low %v4077_v36, %v4080_v53  ;;  %v4605_v59 = vrot.slane %v4603_v29, 5  ;;  %v4609_v32 = vrot.slane %v4607_v42, 4  ;;  %3944 = vst.msk [vmem:[#allocation2 + $0x50] sm:$0xff] %vm695_vm6, %v3907_v47  ;;  %v4615_v45 = vrot.slane %v4613_v37, 5  ;;  %v6732_v29 = vld [vmem:[%s11535_s0 + $0xb4] sm:$0xe] }
 0x19f   :  { %3894 = vrot.lane.b32.xlu0 %v7064_v35, %s7726_s9  ;;  %v1604_v12 = vrot.slane %v1602_v46, 4  ;;  %v1605_v50 = vshll.u32 %v6668_v16, 16  ;;  %v1611_v26 = vshll.u32 %v6669_v4, 16  ;;  %v4600_v33 = vor.u32 %v4599_v54, %v4596_v18  ;;  %v7281_v16 = vld [vmem:[%s11535_s0 + $0x118] sm:$0xf] }
 0x1a0   :  { %4230 = vrot.lane.b32.xlu1 %v7152_v28, %s7727_s26  ;;  %v4610_v52 = vor.u32 %v4609_v32, %v4605_v59  ;;  %v1615_v55 = vshrl.u32 %v6669_v4, 16  ;;  %v1621_v11 = vshll.u32 %v6670_v17, 16  ;;  %v3891_v13 = vpop.permute.xlu0 %3890  ;;  %v6744_v2 = vrot.slane %v6708_v61, 9  ;;  %v7282_v28 = vld [vmem:[%s11535_s0 + $0x11c] sm:$0x1] }
 0x1a1   :  { %v1607_v44 = vrot.slane %v1605_v50, 5  ;;  %v1613_v60 = vrot.slane %v1611_v26, 5  ;;  %3936 = vst.msk [vmem:[#allocation2 + $0x10] sm:$0xff] %vm695_vm6, %v3891_v13  ;;  %v1902_v39 = vrot.slane %v6709_v43, 5  ;;  %v4227_v62 = vpop.permute.xlu1 %4226  ;;  %v4601_v30 = vrot.slane %v4600_v33, 4 }
 0x1a2   :  { %v4611_v23 = vrot.slane %v4610_v52, 4  ;;  %v1617_v41 = vrot.slane %v1615_v55, 4  ;;  %v1623_v15 = vrot.slane %v1621_v11, 5  ;;  %4264 = vst.msk [vmem:[#allocation2 + $0x50] sm:$0xff] %vm1019_vm8, %v4227_v62  ;;  %v1905_v0 = vrot.slane %v6710_v21, 5 }
 0x1a3   :  { %4214 = vrot.lane.b32.xlu0 %v7144_v31, %s7727_s26  ;;  %v1608_v25 = vor.u32 %v1607_v44, %v1604_v12  ;;  %v1903_v40 = vsel %vm8004_vm5, %v6744_v2, %v1902_v39  ;;  %v1904_v57 = vrot.slane %v1902_v39, 4  ;;  %v4606_v1 = vsel %vm7779_vm2, %v4601_v30, %v4605_v59  ;;  %v6733_v53 = vld [vmem:[%s11535_s0 + $0xb8] sm:$0xf]  ;;  %v6734_v61 = vld [vmem:[%s11535_s0 + $0xbc] sm:$0x1]  ;;  %v6358_v31 = vld [vmem:[#allocation2 + $0x8] sm:$0xff] }
 0x1a4   :  { %4409 = vrot.lane.b32.xlu1 %v7670_v51, %s7728_s28  ;;  %v4616_v20 = vsel %vm7779_vm2, %v4611_v23, %v4615_v45  ;;  %v1618_v48 = vor.u32 %v1617_v41, %v1613_v60  ;;  %v4786_v6 = vshrl.u32 %v7240_v19, 16  ;;  %v4211_v7 = vpop.permute.xlu0 %4210  ;;  %v4789_v63 = vshll.u32 %v7240_v19, 16  ;;  %v7304_v12 = vld [vmem:[%s11535_s0 + $0x174] sm:$0xe]  ;;  %v7306_v52 = vld [vmem:[%s11535_s0 + $0x17c] sm:$0x1] }
 0x1a5   :  { %v7256_v8 = vcombine.low %v4606_v1, %v4616_v20  ;;  %v1609_v14 = vrot.slane %v1608_v25, 4  ;;  %v1906_v58 = vsel %vm8004_vm5, %v1904_v57, %v1905_v0  ;;  %4256 = vst.msk [vmem:[#allocation2 + $0x10] sm:$0xff] %vm1019_vm8, %v4211_v7  ;;  %v4406_v36 = vpop.permute.xlu1 %4405  ;;  %v4795_v27 = vshll.u32 %v7241_v3, 16  ;;  %v6837_v25 = vld [vmem:[%s11535_s0 + $0x64] sm:$0xf] }
 0x1a6   :  { %v1619_v9 = vrot.slane %v1618_v48, 4  ;;  %v6760_v18 = vcombine.low %v1903_v40, %v1906_v58  ;;  %v4788_v56 = vrot.slane %v4786_v6, 4  ;;  %4443 = vst.msk [vmem:[#allocation2 + $0x50] sm:$0xff] %vm1200_vm9, %v4406_v36  ;;  %v4791_v4 = vrot.slane %v4789_v63, 5  ;;  %v6838_v1 = vld [vmem:[%s11535_s0 + $0x68] sm:$0x1] }
 0x1a7   :  { %4393 = vrot.lane.b32.xlu0 %v7671_v38, %s7728_s28  ;;  %v1614_v42 = vsel %vm7779_vm2, %v1609_v14, %v1613_v60  ;;  %v4799_v34 = vshrl.u32 %v7241_v3, 16  ;;  %v4805_v35 = vshll.u32 %v7242_v5, 16  ;;  %v4797_v17 = vrot.slane %v4795_v27, 5  ;;  %v6836_v60 = vld [vmem:[%s11535_s0 + $0x60] sm:$0xf] }
 0x1a8   :  { %4937 = vrot.lane.b32.xlu1 %v7256_v8, %s7729_s15  ;;  %v1624_v37 = vsel %vm7779_vm2, %v1619_v9, %v1623_v15  ;;  %v3161_v46 = vsel %vm3147_vm15, %v10402_v24, 0  ;;  %v7320_v47 = vrot.slane %v7280_v49, 9  ;;  %v4390_v54 = vpop.permute.xlu0 %4389  ;;  %v4792_v32 = vor.u32 %v4791_v4, %v4788_v56  ;;  %v7305_v24 = vld [vmem:[%s11535_s0 + $0x178] sm:$0xf]  ;;  %v7408_v48 = vld [vmem:[%s11535_s0 + $0x120] sm:$0xf] }
 0x1a9   :  { %v6688_v59 = vcombine.low %v1614_v42, %v1624_v37  ;;  %v4801_v43 = vrot.slane %v4799_v34, 4  ;;  %v4807_v45 = vrot.slane %v4805_v35, 5  ;;  %7551 = vmatpush3.bf16.xpose.msra.mxu0 %v3161_v46  ;;  %4435 = vst.msk [vmem:[#allocation2 + $0x10] sm:$0xff] %vm1200_vm9, %v4390_v54  ;;  %v5119_v50 = vrot.slane %v7281_v16, 5  ;;  %v7409_v8 = vld [vmem:[%s11535_s0 + $0x124] sm:$0xf] }
 0x1aa   :  { %v5122_v26 = vrot.slane %v7282_v28, 5  ;;  %v6752_v51 = vrot.slane %v6732_v29, 9  ;;  %v1958_v33 = vrot.slane %v6733_v53, 5  ;;  %v4934_v55 = vpop.permute.xlu1 %4933  ;;  %v4793_v11 = vrot.slane %v4792_v32, 4  ;;  %v7674_v58 = vld [vmem:[%s11535_s0 + $0x60] sm:$0xff]  }
 0x1ab   :  { %1725 = vrot.lane.b32.xlu0 %v6688_v59, %s7729_s15  ;;  %v4802_v13 = vor.u32 %v4801_v43, %v4797_v17  ;;  %v1961_v21 = vrot.slane %v6734_v61, 5  ;;  %v6380_v44 = vsel %vm3147_vm15, %v6358_v31, 0  ;;  %4979 = vst.msk [vmem:[#allocation2 + $0x10] sm:$0xff] %vm1745_vm10, %v4934_v55  ;;  %v5120_v2 = vsel %vm8004_vm5, %v7320_v47, %v5119_v50  ;;  %v7410_v56 = vld [vmem:[%s11535_s0 + $0x128] sm:$0x1] }
 0x1ac   :  { %2030 = vrot.lane.b32.xlu1 %v6760_v18, %s7730_s18  ;;  %v5121_v39 = vrot.slane %v5119_v50, 4  ;;  %v1959_v19 = vsel %vm8004_vm5, %v6752_v51, %v1958_v33  ;;  %v1960_v62 = vrot.slane %v1958_v33, 4  ;;  %7565 = vmatpush3.bf16.xpose.msra.mxu1 %v6380_v44  ;;  %v1722_v30 = vpop.permute.xlu0 %1721  ;;  %v4798_v23 = vsel %vm7779_vm2, %v4793_v11, %v4797_v17  ;;  %v6860_v53 = vld [vmem:[%s11535_s0 + $0xc0] sm:$0xf]  ;;  %v6861_v61 = vld [vmem:[%s11535_s0 + $0xc4] sm:$0xf] }
 0x1ad   :  { %v4803_v41 = vrot.slane %v4802_v13, 4  ;;  %v7328_v15 = vrot.slane %v7304_v12, 9  ;;  %v5175_v38 = vrot.slane %v7305_v24, 5  ;;  %1758 = vst.msk [vmem:[#allocation2 + $0x60] sm:$0xff] %vm1745_vm10, %v1722_v30  ;;  %v5178_v0 = vrot.slane %v7306_v52, 5  ;;  %v7675_v12 = vld [vmem:[%s11535_s0 + $0x120] sm:$0xff]  }
 0x1ae   :  { %v5123_v40 = vsel %vm8004_vm5, %v5121_v39, %v5122_v26  ;;  %v1962_v57 = vsel %vm8004_vm5, %v1960_v62, %v1961_v21  ;;  %v2027_v3 = vpop.permute.xlu1 %2026  ;;  %v2457_v20 = vshrl.u32 %v6836_v60, 16  ;;  %v2460_v28 = vshll.u32 %v6836_v60, 16  ;;  %v6900_v33 = vld [vmem:[%s11535_s0 + $0x60] sm:$0xe]  ;;  %v6901_v44 = vld [vmem:[%s11535_s0 + $0x64] sm:$0xf] }
 0x1af   :  { %v4808_v5 = vsel %vm7779_vm2, %v4803_v41, %v4807_v45  ;;  %v7336_v6 = vcombine.low %v5120_v2, %v5123_v40  ;;  %v6768_v7 = vcombine.low %v1959_v19, %v1962_v57  ;;  %v10525_v49 = vsel %vm8004_vm5, %v7328_v15, %v5175_v38  ;;  %2071 = vst.msk [vmem:[#allocation2 + $0x20] sm:$0xff] %vm2066_vm11, %v2027_v3  ;;  %v6862_v45 = vld [vmem:[%s11535_s0 + $0xc8] sm:$0x1]  ;;  %v7432_v30 = vld [vmem:[%s11535_s0 + $0x180] sm:$0xf] }
 0x1b0   :  { %v7264_v14 = vcombine.low %v4798_v23, %v4808_v5  ;;  %v5177_v63 = vrot.slane %v5175_v38, 4  ;;  %v2459_v16 = vrot.slane %v2457_v20, 4  ;;  %v2466_v36 = vshll.u32 %v6837_v25, 16  ;;  %v6902_v62 = vld [vmem:[%s11535_s0 + $0x68] sm:$0x1] }
 0x1b1   :  { %5257 = vrot.lane.b32.xlu1 %v7336_v6, %s7730_s18  ;;  %v2470_v9 = vshrl.u32 %v6837_v25, 16  ;;  %v2476_v18 = vshll.u32 %v6838_v1, 16  ;;  %v5637_v27 = vshrl.u32 %v7408_v48, 16  ;;  %v2462_v42 = vrot.slane %v2460_v28, 5  ;;  %v7676_v1 = vld [vmem:[%s11535_s0 + $0xc0] sm:$0xff]  }
 0x1b2   :  { %4953 = vrot.lane.b32.xlu0 %v7264_v14, %s7729_s15  ;;  %v5179_v29 = vsel %vm8004_vm5, %v5177_v63, %v5178_v0  ;;  %v5254_v4 = vpop.permute.xlu1 %5253  ;;  %v5640_v34 = vshll.u32 %v7408_v48, 16  ;;  %v5646_v35 = vshll.u32 %v7409_v8, 16  ;;  %v2468_v17 = vrot.slane %v2466_v36, 5 }
 0x1b3   :  { %v7344_v37 = vcombine.low %v10525_v49, %v5179_v29  ;;  %v2472_v46 = vrot.slane %v2470_v9, 4  ;;  %v2478_v47 = vrot.slane %v2476_v18, 5  ;;  %5299 = vst.msk [vmem:[#allocation2 + $0x10] sm:$0xff] %vm2066_vm11, %v5254_v4  ;;  %v2463_v54 = vor.u32 %v2462_v42, %v2459_v16  ;;  %v7434_v16 = vld [vmem:[%s11535_s0 + $0x188] sm:$0x1]  ;;  %v7677_v29 = vld [vmem:[%s11535_s0 + $0x180] sm:$0xff]  }
 0x1b4   :  { %v4950_v31 = vpop.permute.xlu0 %4949  ;;  %v5639_v59 = vrot.slane %v5637_v27, 4  ;;  %v5642_v32 = vrot.slane %v5640_v34, 5  ;;  %v10549_v43 = vrot.slane %v5646_v35, 5  ;;  %v5650_v50 = vshrl.u32 %v7409_v8, 16  ;;  %v7472_v27 = vld [vmem:[%s11535_s0 + $0x120] sm:$0xe] }
 0x1b5   :  { %2211 = vrot.lane.b32.xlu1 %v7674_v58, %s7731_s23  ;;  %4987 = vst.msk [vmem:[#allocation2 + $0x50] sm:$0xff] %vm1745_vm10, %v4950_v31  ;;  %v2473_v24 = vor.u32 %v2472_v46, %v2468_v17  ;;  %v5656_v26 = vshll.u32 %v7410_v56, 16  ;;  %v2649_v51 = vshrl.u32 %v6860_v53, 16  ;;  %v2464_v52 = vrot.slane %v2463_v54, 4 }
 0x1b6   :  { %2046 = vrot.lane.b32.xlu0 %v6768_v7, %s7730_s18  ;;  %v5643_v55 = vor.u32 %v5642_v32, %v5639_v59  ;;  %v2652_v11 = vshll.u32 %v6860_v53, 16  ;;  %v2658_v13 = vshll.u32 %v6861_v61, 16  ;;  %v2208_v21 = vpop.permute.xlu1 %2207  ;;  %v5652_v2 = vrot.slane %v5650_v50, 4  ;;  %v7433_v7 = vld [vmem:[%s11535_s0 + $0x184] sm:$0xf] }
 0x1b7   :  { %v2474_v60 = vrot.slane %v2473_v24, 4  ;;  %v5658_v39 = vrot.slane %v5656_v26, 5  ;;  %v2651_v19 = vrot.slane %v2649_v51, 4  ;;  %2252 = vst.msk [vmem:[#allocation2 + $0x20] sm:$0xff] %vm2247_vm12, %v2208_v21  ;;  %v2469_v23 = vsel %vm7779_vm2, %v2464_v52, %v2468_v17  ;;  %v7473_v53 = vld [vmem:[%s11535_s0 + $0x124] sm:$0xf] }
 0x1b8   :  { %v2043_v41 = vpop.permute.xlu0 %2042  ;;  %v5644_v15 = vrot.slane %v5643_v55, 4  ;;  %v2654_v38 = vrot.slane %v2652_v11, 5  ;;  %v10575_v25 = vrot.slane %v2658_v13, 5  ;;  %v5653_v57 = vor.u32 %v5652_v2, %v10549_v43  ;;  %v6926_v52 = vld [vmem:[%s11535_s0 + $0xc8] sm:$0x1] }
 0x1b9   :  { %5436 = vrot.lane.b32.xlu1 %v7675_v12, %s7731_s23  ;;  %v2479_v40 = vsel %vm7779_vm2, %v2474_v60, %v2478_v47  ;;  %2079 = vst.msk [vmem:[#allocation2 + $0x60] sm:$0xff] %vm2066_vm11, %v2043_v41  ;;  %v2662_v0 = vshrl.u32 %v6861_v61, 16  ;;  %v2668_v3 = vshll.u32 %v6862_v45, 16  ;;  %v6936_v6 = vrot.slane %v6900_v33, 9  ;;  %v6924_v45 = vld [vmem:[%s11535_s0 + $0xc0] sm:$0xe] }
 0x1ba   :  { %5273 = vrot.lane.b32.xlu0 %v7344_v37, %s7730_s18  ;;  %v6872_v20 = vcombine.low %v2469_v23, %v2479_v40  ;;  %v5649_v48 = vsel %vm7779_vm2, %v5644_v15, %v10549_v43  ;;  %v2655_v5 = vor.u32 %v2654_v38, %v2651_v19  ;;  %v5433_v49 = vpop.permute.xlu1 %5432  ;;  %v5654_v8 = vrot.slane %v5653_v57, 4  ;;  %v7474_v37 = vld [vmem:[%s11535_s0 + $0x128] sm:$0x1]  ;;  %v6925_v33 = vld [vmem:[%s11535_s0 + $0xc4] sm:$0xf] }
 0x1bb   :  { %v2664_v14 = vrot.slane %v2662_v0, 4  ;;  %v2670_v58 = vrot.slane %v2668_v3, 5  ;;  %v2949_v63 = vrot.slane %v6901_v44, 5  ;;  %5478 = vst.msk [vmem:[#allocation2 + $0x10] sm:$0xff] %vm2247_vm12, %v5433_v49  ;;  %v2952_v9 = vrot.slane %v6902_v62, 5 }
 0x1bc   :  { %v2656_v28 = vrot.slane %v2655_v5, 4  ;;  %v5270_v36 = vpop.permute.xlu0 %5269  ;;  %v5829_v18 = vshrl.u32 %v7432_v30, 16  ;;  %v5832_v56 = vshll.u32 %v7432_v30, 16  ;;  %v5659_v42 = vsel %vm7779_vm2, %v5654_v8, %v5658_v39  ;;  %v7027_v44 = vld [vmem:[%s11535_s0 + $0x114] sm:$0xf] }
 0x1bd   :  { %2756 = vrot.lane.b32.xlu1 %v6872_v20, %s7732_s10  ;;  %v2665_v4 = vor.u32 %v2664_v14, %v10575_v25  ;;  %5307 = vst.msk [vmem:[#allocation2 + $0x50] sm:$0xff] %vm2066_vm11, %v5270_v36  ;;  %v2950_v34 = vsel %vm8004_vm5, %v6936_v6, %v2949_v63  ;;  %v2951_v35 = vrot.slane %v2949_v63, 4  ;;  %v7448_v17 = vcombine.low %v5649_v48, %v5659_v42  ;;  %v7028_v62 = vld [vmem:[%s11535_s0 + $0x118] sm:$0xf]  ;;  %v7496_v40 = vld [vmem:[%s11535_s0 + $0x180] sm:$0xe] }
 0x1be   :  { %2227 = vrot.lane.b32.xlu0 %v7676_v1, %s7731_s23  ;;  %v2661_v46 = vsel %vm7779_vm2, %v2656_v28, %v10575_v25  ;;  %v5831_v47 = vrot.slane %v5829_v18, 4  ;;  %v5834_v61 = vrot.slane %v5832_v56, 5  ;;  %v2753_v31 = vpop.permute.xlu1 %2752  ;;  %v5838_v32 = vshll.u32 %v7433_v7, 16  ;;  %v7029_v25 = vld [vmem:[%s11535_s0 + $0x11c] sm:$0x1] }
 0x1bf   :  { %v2666_v54 = vrot.slane %v2665_v4, 4  ;;  %v2953_v59 = vsel %vm8004_vm5, %v2951_v35, %v2952_v9  ;;  %v5842_v43 = vshrl.u32 %v7433_v7, 16  ;;  %2797 = vst.msk [vmem:[#allocation2 + $0x20] sm:$0xff] %vm2792_vm13, %v2753_v31  ;;  %v5848_v50 = vshll.u32 %v7434_v16, 16  ;;  %v7497_v48 = vld [vmem:[%s11535_s0 + $0x184] sm:$0xf] }
 0x1c0   :  { %v6952_v12 = vcombine.low %v2950_v34, %v2953_v59  ;;  %v5835_v24 = vor.u32 %v5834_v61, %v5831_v47  ;;  %v2224_v26 = vpop.permute.xlu0 %2223  ;;  %v7512_v51 = vrot.slane %v7472_v27, 9  ;;  %v5840_v11 = vrot.slane %v5838_v32, 5  ;;  %v7498_v8 = vld [vmem:[%s11535_s0 + $0x188] sm:$0x1]  ;;  %v7091_v28 = vld [vmem:[%s11535_s0 + $0x114] sm:$0xe] }
 0x1c1   :  { %5980 = vrot.lane.b32.xlu1 %v7448_v17, %s7732_s10  ;;  %v2671_v55 = vsel %vm7779_vm2, %v2666_v54, %v2670_v58  ;;  %v5844_v13 = vrot.slane %v5842_v43, 4  ;;  %2260 = vst.msk [vmem:[#allocation2 + $0x60] sm:$0xff] %vm2247_vm12, %v2224_v26  ;;  %v6162_v21 = vrot.slane %v7473_v53, 5  ;;  %v5850_v39 = vrot.slane %v5848_v50, 5  ;;  %v7092_v36 = vld [vmem:[%s11535_s0 + $0x118] sm:$0xf] }
 0x1c2   :  { %5452 = vrot.lane.b32.xlu0 %v7677_v29, %s7731_s23  ;;  %v6880_v60 = vcombine.low %v2661_v46, %v2671_v55  ;;  %v5836_v2 = vrot.slane %v5835_v24, 4  ;;  %v6165_v19 = vrot.slane %v7474_v37, 5  ;;  %v5977_v30 = vpop.permute.xlu1 %5976  ;;  %v6944_v38 = vrot.slane %v6924_v45, 9  ;;  %v7093_v42 = vld [vmem:[%s11535_s0 + $0x11c] sm:$0x1]  ;;  %v7689_v59 = vld [vmem:[%s11535_s0 + $0x108] sm:$0xff]  }
 0x1c3   :  { %v5845_v23 = vor.u32 %v5844_v13, %v5840_v11  ;;  %v6163_v41 = vsel %vm8004_vm5, %v7512_v51, %v6162_v21  ;;  %v6164_v15 = vrot.slane %v6162_v21, 4  ;;  %6022 = vst.msk [vmem:[#allocation2 + $0x10] sm:$0xff] %vm2792_vm13, %v5977_v30  ;;  %v3005_v0 = vrot.slane %v6925_v33, 5  ;;  %v7051_v4 = vld [vmem:[%s11535_s0 + $0x174] sm:$0xf] }
 0x1c4   :  { %v5841_v57 = vsel %vm7779_vm2, %v5836_v2, %v5840_v11  ;;  %v3008_v3 = vrot.slane %v6926_v52, 5  ;;  %v5449_v1 = vpop.permute.xlu0 %5448  ;;  %v3575_v20 = vshrl.u32 %v7027_v44, 16  ;;  %v3578_v7 = vshll.u32 %v7027_v44, 16  ;;  %v7052_v54 = vld [vmem:[%s11535_s0 + $0x178] sm:$0xf] }
 0x1c5   :  { %3077 = vrot.lane.b32.xlu1 %v6952_v12, %s7733_s24  ;;  %v5846_v5 = vrot.slane %v5845_v23, 4  ;;  %v6166_v6 = vsel %vm8004_vm5, %v6164_v15, %v6165_v19  ;;  %5486 = vst.msk [vmem:[#allocation2 + $0x50] sm:$0xff] %vm2247_vm12, %v5449_v1  ;;  %v3584_v49 = vshll.u32 %v7028_v62, 16  ;;  %v3006_v58 = vsel %vm8004_vm5, %v6944_v38, %v3005_v0  ;;  %v7053_v52 = vld [vmem:[%s11535_s0 + $0x17c] sm:$0x1] }
 0x1c6   :  { %2772 = vrot.lane.b32.xlu0 %v6880_v60, %s7732_s10  ;;  %v7528_v14 = vcombine.low %v6163_v41, %v6166_v6  ;;  %v3007_v63 = vrot.slane %v3005_v0, 4  ;;  %v3577_v16 = vrot.slane %v3575_v20, 4  ;;  %v3074_v9 = vpop.permute.xlu1 %3073  ;;  %v3580_v56 = vrot.slane %v3578_v7, 5  ;;  %v7116_v30 = vld [vmem:[%s11535_s0 + $0x178] sm:$0xf] }
 0x1c7   :  { %v5851_v18 = vsel %vm7779_vm2, %v5846_v5, %v5850_v39  ;;  %v3586_v27 = vrot.slane %v3584_v49, 5  ;;  %v3588_v29 = vshrl.u32 %v7028_v62, 16  ;;  %3118 = vst.msk [vmem:[#allocation2 + $0x20] sm:$0xff] %vm3113_vm14, %v3074_v9  ;;  %v3594_v53 = vshll.u32 %v7029_v25, 16  ;;  %v7115_v62 = vld [vmem:[%s11535_s0 + $0x174] sm:$0xe] }
 0x1c8   :  { %v7456_v34 = vcombine.low %v5841_v57, %v5851_v18  ;;  %v3009_v35 = vsel %vm8004_vm5, %v3007_v63, %v3008_v3  ;;  %v7520_v37 = vrot.slane %v7496_v40, 9  ;;  %v2769_v17 = vpop.permute.xlu0 %2768  ;;  %v3581_v47 = vor.u32 %v3580_v56, %v3577_v16  ;;  %v7117_v25 = vld [vmem:[%s11535_s0 + $0x17c] sm:$0x1]  ;;  %v6671_v20 = vld [vmem:[%s11535_s0 + $0xc0] sm:$0xf] }
 0x1c9   :  { %6300 = vrot.lane.b32.xlu1 %v7528_v14, %s7733_s24  ;;  %v6960_v46 = vcombine.low %v3006_v58, %v3009_v35  ;;  %v3590_v61 = vrot.slane %v3588_v29, 4  ;;  %v6218_v31 = vrot.slane %v7497_v48, 5  ;;  %2805 = vst.msk [vmem:[#allocation2 + $0x60] sm:$0xff] %vm2792_vm13, %v2769_v17  ;;  %v3596_v32 = vrot.slane %v3594_v53, 5  ;;  %v6672_v48 = vld [vmem:[%s11535_s0 + $0xc4] sm:$0xf] }
 0x1ca   :  { %5996 = vrot.lane.b32.xlu0 %v7456_v34, %s7732_s10  ;;  %v6221_v43 = vrot.slane %v7498_v8, 5  ;;  %v7129_v45 = vrot.slane %v7091_v28, 9  ;;  %v4083_v12 = vrot.slane %v7092_v36, 5  ;;  %v6297_v24 = vpop.permute.xlu1 %6296  ;;  %v3582_v50 = vrot.slane %v3581_v47, 4  ;;  %v6673_v36 = vld [vmem:[%s11535_s0 + $0xc8] sm:$0x1] }
 0x1cb   :  { %v3591_v26 = vor.u32 %v3590_v61, %v3586_v27  ;;  %v6219_v51 = vsel %vm8004_vm5, %v7520_v37, %v6218_v31  ;;  %v6220_v33 = vrot.slane %v6218_v31, 4  ;;  %6342 = vst.msk [vmem:[#allocation2 + $0x10] sm:$0xff] %vm3113_vm14, %v6297_v24  ;;  %v4086_v13 = vrot.slane %v7093_v42, 5  ;;  %v7243_v35 = vld [vmem:[%s11535_s0 + $0x180] sm:$0xf] }
 0x1cc   :  { %v4084_v55 = vsel %vm8004_vm5, %v7129_v45, %v4083_v12  ;;  %v4085_v11 = vrot.slane %v4083_v12, 4  ;;  %v3767_v21 = vshrl.u32 %v7051_v4, 16  ;;  %v5993_v44 = vpop.permute.xlu0 %5992  ;;  %v3587_v60 = vsel %vm7779_vm2, %v3582_v50, %v3586_v27  ;;  %v7244_v61 = vld [vmem:[%s11535_s0 + $0x184] sm:$0xf] }
 0x1cd   :  { %v3592_v2 = vrot.slane %v3591_v26, 4  ;;  %v6222_v39 = vsel %vm8004_vm5, %v6220_v33, %v6221_v43  ;;  %v3770_v19 = vshll.u32 %v7051_v4, 16  ;;  %6030 = vst.msk [vmem:[#allocation2 + $0x50] sm:$0xff] %vm2792_vm13, %v5993_v44  ;;  %v3776_v38 = vshll.u32 %v7052_v54, 16  ;;  %v7688_v43 = vld [vmem:[%s11535_s0 + $0x168] sm:$0xff]   ;;  %v7678_v45 = vld [vmem:[%s11535_s0 + $0x120] sm:$0xff]  }
 0x1ce   :  { %3093 = vrot.lane.b32.xlu0 %v6960_v46, %s7733_s24  ;;  %v7536_v23 = vcombine.low %v6219_v51, %v6222_v39  ;;  %v4087_v41 = vsel %vm8004_vm5, %v4085_v11, %v4086_v13  ;;  %v3769_v15 = vrot.slane %v3767_v21, 4  ;;  %v10717_v40 = vld [vmem:[#allocation2 + $0x20] sm:$0xff]  ;;  %v3780_v1 = vshrl.u32 %v7052_v54, 16  ;;  %v7245_v26 = vld [vmem:[%s11535_s0 + $0x188] sm:$0x1] }
 0x1cf   :  { %v3597_v57 = vsel %vm7779_vm2, %v3592_v2, %v3596_v32  ;;  %v7145_v0 = vcombine.low %v4084_v55, %v4087_v41  ;;  %v3772_v3 = vrot.slane %v3770_v19, 5  ;;  %3394 = vst.msk [vmem:[#allocation2 + $0x20] sm:$0xff] %vm147_vm7, %v7689_v59  ;;  %v3778_v6 = vrot.slane %v3776_v38, 5  ;;  %v7219_v13 = vld [vmem:[%s11535_s0 + $0x120] sm:$0xf] }
 0x1d0   :  { %v7065_v5 = vcombine.low %v3587_v60, %v3597_v57  ;;  %v3786_v7 = vshll.u32 %v7053_v52, 16  ;;  %v7137_v49 = vrot.slane %v7115_v62, 9  ;;  %v3090_v8 = vpop.permute.xlu0 %3089  ;;  %v3782_v58 = vrot.slane %v3780_v1, 4  ;;  %v7220_v19 = vld [vmem:[%s11535_s0 + $0x124] sm:$0xf] }
 0x1d1   :  { %v3773_v14 = vor.u32 %v3772_v3, %v3769_v15  ;;  %v4139_v63 = vrot.slane %v7116_v30, 5  ;;  %v4142_v16 = vrot.slane %v7117_v25, 5  ;;  %3126 = vst.msk [vmem:[#allocation2 + $0x60] sm:$0xff] %vm3113_vm14, %v3090_v8  ;;  %v1626_v9 = vshrl.u32 %v6671_v20, 16  ;;  %v7221_v38 = vld [vmem:[%s11535_s0 + $0x128] sm:$0x1] }
 0x1d2   :  { %3896 = vrot.lane.b32.xlu1 %v7065_v5, %s7726_s9  ;;  %6316 = vrot.lane.b32.xlu0 %v7536_v23, %s7733_s24  ;;  %v3788_v28 = vrot.slane %v3786_v7, 5  ;;  %v1629_v18 = vshll.u32 %v6671_v20, 16  ;;  %v1635_v56 = vshll.u32 %v6672_v48, 16  ;;  %v3783_v29 = vor.u32 %v3782_v58, %v3778_v6  ;;  %v6735_v1 = vld [vmem:[%s11535_s0 + $0xc0] sm:$0xe] }
 0x1d3   :  { %v3774_v27 = vrot.slane %v3773_v14, 4  ;;  %v10736_v42 = vsel %vm8004_vm5, %v7137_v49, %v4139_v63  ;;  %v4141_v4 = vrot.slane %v4139_v63, 4  ;;  %v3893_v34 = vpop.permute.xlu1 %3892  ;;  %v1628_v53 = vrot.slane %v1626_v9, 4  ;;  %v6736_v7 = vld [vmem:[%s11535_s0 + $0xc4] sm:$0xf] }
 0x1d4   :  { %v1631_v37 = vrot.slane %v1629_v18, 5  ;;  %v1637_v17 = vrot.slane %v1635_v56, 5  ;;  %v1639_v46 = vshrl.u32 %v6672_v48, 16  ;;  %3937 = vst.msk [vmem:[#allocation2 + $0x18] sm:$0xff] %vm695_vm6, %v3893_v34  ;;  %v6313_v47 = vpop.permute.xlu0 %6312  ;;  %v3784_v54 = vrot.slane %v3783_v29, 4 }
 0x1d5   :  { %v3779_v31 = vsel %vm7779_vm2, %v3774_v27, %v3778_v6  ;;  %v4143_v59 = vsel %vm8004_vm5, %v4141_v4, %v4142_v16  ;;  %v1645_v32 = vshll.u32 %v6673_v36, 16  ;;  %6350 = vst.msk [vmem:[#allocation2 + $0x50] sm:$0xff] %vm3113_vm14, %v6313_v47  ;;  %v4810_v51 = vshrl.u32 %v7243_v35, 16  ;;  %v6711_v29 = vld [vmem:[%s11535_s0 + $0x60] sm:$0xe] }
 0x1d6   :  { %4216 = vrot.lane.b32.xlu1 %v7145_v0, %s7727_s26  ;;  %v7153_v12 = vcombine.low %v10736_v42, %v4143_v59  ;;  %v1632_v24 = vor.u32 %v1631_v37, %v1628_v53  ;;  %v1641_v50 = vrot.slane %v1639_v46, 4  ;;  %v3789_v33 = vsel %vm7779_vm2, %v3784_v54, %v3788_v28  ;;  %v6737_v28 = vld [vmem:[%s11535_s0 + $0xc8] sm:$0x1]  ;;  %v7679_v42 = vld [vmem:[%s11535_s0 + $0x180] sm:$0xff]  }
 0x1d7   :  { %v1647_v52 = vrot.slane %v1645_v32, 5  ;;  %v4813_v55 = vshll.u32 %v7243_v35, 16  ;;  %v4819_v11 = vshll.u32 %v7244_v61, 16  ;;  %v4213_v21 = vpop.permute.xlu1 %4212  ;;  %v7073_v44 = vcombine.low %v3779_v31, %v3789_v33  ;;  %v6712_v37 = vld [vmem:[%s11535_s0 + $0x64] sm:$0xf] }
 0x1d8   :  { %v1633_v60 = vrot.slane %v1632_v24, 4  ;;  %v1642_v2 = vor.u32 %v1641_v50, %v1637_v17  ;;  %v4812_v39 = vrot.slane %v4810_v51, 4  ;;  %4257 = vst.msk [vmem:[#allocation2 + $0x18] sm:$0xff] %vm1019_vm8, %v4213_v21  ;;  %v3143_v62 = vld [vmem:[#allocation2 + $0x60] sm:$0xff]  ;;  %v4823_v41 = vshrl.u32 %v7244_v61, 16 }
 0x1d9   :  { %v4815_v30 = vrot.slane %v4813_v55, 5  ;;  %v4821_v23 = vrot.slane %v4819_v11, 5  ;;  %v4829_v15 = vshll.u32 %v7245_v26, 16  ;;  %7584 = vmatprep.subr.msk.bf16.mxu0 %vm3147_vm15, %v3143_v62  ;;  %3402 = vst.msk [vmem:[#allocation2 + $0x60] sm:$0xff] %vm147_vm7, %v7688_v43  ;;  %3912 = vrot.lane.b32.xlu0 %v7073_v44, %s7726_s9  ;;  %v4618_v0 = vshrl.u32 %v7219_v13, 16 }
 0x1da   :  { %4395 = vrot.lane.b32.xlu1 %v7678_v45, %s7728_s28  ;;  %v1638_v25 = vsel %vm7779_vm2, %v1633_v60, %v1637_v17  ;;  %v1643_v57 = vrot.slane %v1642_v2, 4  ;;  %v4621_v3 = vshll.u32 %v7219_v13, 16  ;;  %v4825_v48 = vrot.slane %v4823_v41, 4  ;;  %v6713_v31 = vld [vmem:[%s11535_s0 + $0x68] sm:$0x1] }
 0x1db   :  { %v4816_v20 = vor.u32 %v4815_v30, %v4812_v39  ;;  %v4831_v5 = vrot.slane %v4829_v15, 5  ;;  %v4627_v6 = vshll.u32 %v7220_v19, 16  ;;  %v4392_v49 = vpop.permute.xlu1 %4391  ;;  %v4620_v14 = vrot.slane %v4618_v0, 4  ;;  %v3909_v16 = vpop.permute.xlu0 %3908  ;;  %v7307_v51 = vld [vmem:[%s11535_s0 + $0x180] sm:$0xe] }
 0x1dc   :  { %v1648_v8 = vsel %vm7779_vm2, %v1643_v57, %v1647_v52  ;;  %v4623_v58 = vrot.slane %v4621_v3, 5  ;;  %v4631_v63 = vshrl.u32 %v7220_v19, 16  ;;  %4436 = vst.msk [vmem:[#allocation2 + $0x18] sm:$0xff] %vm1200_vm9, %v4392_v49  ;;  %v6367_v36 = vld [vmem:[#allocation2 + $0x50] sm:$0xff]  ;;  %v4826_v56 = vor.u32 %v4825_v48, %v4821_v23  ;;  %v7308_v33 = vld [vmem:[%s11535_s0 + $0x184] sm:$0xf] }
 0x1dd   :  { %v6689_v9 = vcombine.low %v1638_v25, %v1648_v8  ;;  %v4817_v18 = vrot.slane %v4816_v20, 4  ;;  %v4629_v27 = vrot.slane %v4627_v6, 5  ;;  %3945 = vst.msk [vmem:[#allocation2 + $0x58] sm:$0xff] %vm695_vm6, %v3909_v16  ;;  %7590 = vmatprep.subr.msk.bf16.mxu1 %vm3147_vm15, %v6367_v36  ;;  %4232 = vrot.lane.b32.xlu0 %v7153_v12, %s7727_s26  ;;  %v4637_v35 = vshll.u32 %v7221_v38, 16  ;;  %v7309_v44 = vld [vmem:[%s11535_s0 + $0x188] sm:$0x1] }
 0x1de   :  { %v4624_v4 = vor.u32 %v4623_v58, %v4620_v14  ;;  %v4633_v34 = vrot.slane %v4631_v63, 4  ;;  %v6753_v53 = vrot.slane %v6735_v1, 9  ;;  %v4827_v46 = vrot.slane %v4826_v56, 4  ;;  %v7283_v60 = vld [vmem:[%s11535_s0 + $0x120] sm:$0xe]  ;;  %v6359_v57 = vld [vmem:[#allocation2 + $0x10] sm:$0xff] }
 0x1df   :  { %1727 = vrot.lane.b32.xlu1 %v6689_v9, %s7729_s15  ;;  %v4822_v17 = vsel %vm7779_vm2, %v4817_v18, %v4821_v23  ;;  %v1965_v47 = vrot.slane %v6736_v7, 5  ;;  %v1968_v61 = vrot.slane %v6737_v28, 5  ;;  %v4639_v32 = vrot.slane %v4637_v35, 5  ;;  %v4229_v45 = vpop.permute.xlu0 %4228  ;;  %v7284_v30 = vld [vmem:[%s11535_s0 + $0x124] sm:$0xf] }
 0x1e0   :  { %v4625_v54 = vrot.slane %v4624_v4, 4  ;;  %v4634_v59 = vor.u32 %v4633_v34, %v4629_v27  ;;  %v6745_v43 = vrot.slane %v6711_v29, 9  ;;  %v4832_v12 = vsel %vm7779_vm2, %v4827_v46, %v4831_v5  ;;  %4265 = vst.msk [vmem:[#allocation2 + $0x58] sm:$0xff] %vm1019_vm8, %v4229_v45  ;;  %v7285_v23 = vld [vmem:[%s11535_s0 + $0x128] sm:$0x1] }
 0x1e1   :  { %v1966_v24 = vsel %vm8004_vm5, %v6753_v53, %v1965_v47  ;;  %v1967_v50 = vrot.slane %v1965_v47, 4  ;;  %v1909_v26 = vrot.slane %v6712_v37, 5  ;;  %v1724_v52 = vpop.permute.xlu1 %1723  ;;  %4411 = vrot.lane.b32.xlu0 %v7679_v42, %s7728_s28  ;;  %v7265_v55 = vcombine.low %v4822_v17, %v4832_v12  ;;  %v6864_v6 = vld [vmem:[%s11535_s0 + $0xd0] sm:$0xf]  ;;  %v6865_v7 = vld [vmem:[%s11535_s0 + $0xd4] sm:$0x1] }
 0x1e2   :  { %v4630_v11 = vsel %vm7779_vm2, %v4625_v54, %v4629_v27  ;;  %v4635_v13 = vrot.slane %v4634_v59, 4  ;;  %v1912_v21 = vrot.slane %v6713_v31, 5  ;;  %1759 = vst.msk [vmem:[#allocation2 + $0x68] sm:$0xff] %vm1745_vm10, %v1724_v52  ;;  %v3164_v62 = vsel %vm3147_vm15, %v10717_v40, 0  ;;  %v6863_v40 = vld [vmem:[%s11535_s0 + $0xcc] sm:$0xf] }
 0x1e3   :  { %v1969_v2 = vsel %vm8004_vm5, %v1967_v50, %v1968_v61  ;;  %v1910_v39 = vsel %vm8004_vm5, %v6745_v43, %v1909_v26  ;;  %v1911_v19 = vrot.slane %v1909_v26, 4  ;;  %4955 = vrot.lane.b32.xlu1 %v7265_v55, %s7729_s15  ;;  %7553 = vmatpush3.bf16.xpose.msra.mxu0 %v3164_v62  ;;  %v7329_v38 = vrot.slane %v7307_v51, 9  ;;  %v4408_v0 = vpop.permute.xlu0 %4407  ;;  %v6839_v63 = vld [vmem:[%s11535_s0 + $0x6c] sm:$0xf]  ;;  %v6840_v17 = vld [vmem:[%s11535_s0 + $0x70] sm:$0xf] }
 0x1e4   :  { %v4640_v41 = vsel %vm7779_vm2, %v4635_v13, %v4639_v32  ;;  %v6769_v15 = vcombine.low %v1966_v24, %v1969_v2  ;;  %v5182_v25 = vrot.slane %v7308_v33, 5  ;;  %v5185_v20 = vrot.slane %v7309_v44, 5  ;;  %4444 = vst.msk [vmem:[#allocation2 + $0x58] sm:$0xff] %vm1200_vm9, %v4408_v0  ;;  %v6841_v31 = vld [vmem:[%s11535_s0 + $0x74] sm:$0x1]  ;;  %v7682_v32 = vld [vmem:[%s11535_s0 + $0xcc] sm:$0xff]  }
 0x1e5   :  { %v7257_v3 = vcombine.low %v4630_v11, %v4640_v41  ;;  %v1913_v1 = vsel %vm8004_vm5, %v1911_v19, %v1912_v21  ;;  %v7321_v48 = vrot.slane %v7283_v60, 9  ;;  %v4952_v5 = vpop.permute.xlu1 %4951  ;;  %v5126_v58 = vrot.slane %v7284_v30, 5  ;;  %v7435_v24 = vld [vmem:[%s11535_s0 + $0x18c] sm:$0xf]  ;;  %v7436_v55 = vld [vmem:[%s11535_s0 + $0x190] sm:$0xf] }
 0x1e6   :  { %v6761_v49 = vcombine.low %v1910_v39, %v1913_v1  ;;  %v5183_v8 = vsel %vm8004_vm5, %v7329_v38, %v5182_v25  ;;  %v5184_v14 = vrot.slane %v5182_v25, 4  ;;  %4988 = vst.msk [vmem:[#allocation2 + $0x58] sm:$0xff] %vm1745_vm10, %v4952_v5  ;;  %v5129_v16 = vrot.slane %v7285_v23, 5  ;;  %v7683_v11 = vld [vmem:[%s11535_s0 + $0x6c] sm:$0xff]   ;;  %v7437_v39 = vld [vmem:[%s11535_s0 + $0x194] sm:$0x1] }
 0x1e7   :  { %4939 = vrot.lane.b32.xlu0 %v7257_v3, %s7729_s15  ;;  %v6383_v28 = vsel %vm3147_vm15, %v6359_v57, 0  ;;  %v2673_v36 = vshrl.u32 %v6863_v40, 16  ;;  %v2676_v9 = vshll.u32 %v6863_v40, 16  ;;  %2048 = vrot.lane.b32.xlu1 %v6769_v15, %s7730_s18  ;;  %v5127_v56 = vsel %vm8004_vm5, %v7321_v48, %v5126_v58  ;;  %v7411_v41 = vld [vmem:[%s11535_s0 + $0x12c] sm:$0xf] }
 0x1e8   :  { %v5186_v18 = vsel %vm8004_vm5, %v5184_v14, %v5185_v20  ;;  %v5128_v27 = vrot.slane %v5126_v58, 4  ;;  %7567 = vmatpush3.bf16.xpose.msra.mxu1 %v6383_v28  ;;  %v4936_v29 = vpop.permute.xlu0 %4935  ;;  %v2682_v42 = vshll.u32 %v6864_v6, 16  ;;  %v2686_v37 = vshrl.u32 %v6864_v6, 16  ;;  %v7412_v0 = vld [vmem:[%s11535_s0 + $0x130] sm:$0xf] }
 0x1e9   :  { %v7345_v4 = vcombine.low %v5183_v8, %v5186_v18  ;;  %4980 = vst.msk [vmem:[#allocation2 + $0x18] sm:$0xff] %vm1745_vm10, %v4936_v29  ;;  %v2045_v34 = vpop.permute.xlu1 %2044  ;;  %v2675_v35 = vrot.slane %v2673_v36, 4  ;;  %v2678_v53 = vrot.slane %v2676_v9, 5  ;;  %v2692_v61 = vshll.u32 %v6865_v7, 16  ;;  %v7684_v40 = vld [vmem:[%s11535_s0 + $0x18c] sm:$0xff]  }
 0x1ea   :  { %v5130_v46 = vsel %vm8004_vm5, %v5128_v27, %v5129_v16  ;;  %2080 = vst.msk [vmem:[#allocation2 + $0x68] sm:$0xff] %vm2066_vm11, %v2045_v34  ;;  %v2684_v47 = vrot.slane %v2682_v42, 5  ;;  %v2481_v54 = vshrl.u32 %v6839_v63, 16  ;;  %v2688_v45 = vrot.slane %v2686_v37, 4  ;;  %v7413_v14 = vld [vmem:[%s11535_s0 + $0x134] sm:$0x1] }
 0x1eb   :  { %2032 = vrot.lane.b32.xlu0 %v6761_v49, %s7730_s18  ;;  %v7337_v59 = vcombine.low %v5127_v56, %v5130_v46  ;;  %v2679_v43 = vor.u32 %v2678_v53, %v2675_v35  ;;  %v2484_v12 = vshll.u32 %v6839_v63, 16  ;;  %5275 = vrot.lane.b32.xlu1 %v7345_v4, %s7730_s18  ;;  %v2694_v26 = vrot.slane %v2692_v61, 5  ;;  %v6927_v9 = vld [vmem:[%s11535_s0 + $0xcc] sm:$0xe]  ;;  %v6928_v18 = vld [vmem:[%s11535_s0 + $0xd0] sm:$0xf] }
 0x1ec   :  { %v2029_v50 = vpop.permute.xlu0 %2028  ;;  %v2483_v51 = vrot.slane %v2481_v54, 4  ;;  %v2490_v33 = vshll.u32 %v6840_v17, 16  ;;  %v2494_v52 = vshrl.u32 %v6840_v17, 16  ;;  %v2689_v21 = vor.u32 %v2688_v45, %v2684_v47  ;;  %v7685_v56 = vld [vmem:[%s11535_s0 + $0x12c] sm:$0xff]   ;;  %v6929_v34 = vld [vmem:[%s11535_s0 + $0xd4] sm:$0x1] }
 0x1ed   :  { %2072 = vst.msk [vmem:[#allocation2 + $0x28] sm:$0xff] %vm2066_vm11, %v2029_v50  ;;  %v2680_v13 = vrot.slane %v2679_v43, 4  ;;  %v2486_v44 = vrot.slane %v2484_v12, 5  ;;  %v2500_v60 = vshll.u32 %v6841_v31, 16  ;;  %v5272_v2 = vpop.permute.xlu1 %5271  ;;  %v5853_v30 = vshrl.u32 %v7435_v24, 16 }
 0x1ee   :  { %v2492_v19 = vrot.slane %v2490_v33, 5  ;;  %v2496_v62 = vrot.slane %v2494_v52, 4  ;;  %5308 = vst.msk [vmem:[#allocation2 + $0x58] sm:$0xff] %vm2066_vm11, %v5272_v2  ;;  %v5856_v23 = vshll.u32 %v7435_v24, 16  ;;  %v2690_v38 = vrot.slane %v2689_v21, 4 }
 0x1ef   :  { %5259 = vrot.lane.b32.xlu0 %v7337_v59, %s7730_s18  ;;  %v2685_v15 = vsel %vm7779_vm2, %v2680_v13, %v2684_v47  ;;  %v2487_v25 = vor.u32 %v2486_v44, %v2483_v51  ;;  %v2502_v57 = vrot.slane %v2500_v60, 5  ;;  %2229 = vrot.lane.b32.xlu1 %v7682_v32, %s7731_s23  ;;  %v5855_v20 = vrot.slane %v5853_v30, 4  ;;  %v6903_v47 = vld [vmem:[%s11535_s0 + $0x6c] sm:$0xe]  ;;  %v6904_v32 = vld [vmem:[%s11535_s0 + $0x70] sm:$0xf] }
 0x1f0   :  { %v2497_v3 = vor.u32 %v2496_v62, %v2492_v19  ;;  %v5256_v1 = vpop.permute.xlu0 %5255  ;;  %v5858_v48 = vrot.slane %v5856_v23, 5  ;;  %v5862_v5 = vshll.u32 %v7436_v55, 16  ;;  %v2695_v6 = vsel %vm7779_vm2, %v2690_v38, %v2694_v26  ;;  %v6905_v43 = vld [vmem:[%s11535_s0 + $0x74] sm:$0x1]  ;;  %v7499_v51 = vld [vmem:[%s11535_s0 + $0x18c] sm:$0xe] }
 0x1f1   :  { %v2488_v7 = vrot.slane %v2487_v25, 4  ;;  %5300 = vst.msk [vmem:[#allocation2 + $0x18] sm:$0xff] %vm2066_vm11, %v5256_v1  ;;  %v5866_v49 = vshrl.u32 %v7436_v55, 16  ;;  %v5872_v8 = vshll.u32 %v7437_v39, 16  ;;  %v2226_v58 = vpop.permute.xlu1 %2225  ;;  %v6881_v63 = vcombine.low %v2685_v15, %v2695_v6  ;;  %v7500_v33 = vld [vmem:[%s11535_s0 + $0x190] sm:$0xf] }
 0x1f2   :  { %v2498_v16 = vrot.slane %v2497_v3, 4  ;;  %v5859_v28 = vor.u32 %v5858_v48, %v5855_v20  ;;  %v5864_v36 = vrot.slane %v5862_v5, 5  ;;  %2261 = vst.msk [vmem:[#allocation2 + $0x68] sm:$0xff] %vm2247_vm12, %v2226_v58  ;;  %v5661_v4 = vshrl.u32 %v7411_v41, 16  ;;  %v7476_v5 = vld [vmem:[%s11535_s0 + $0x130] sm:$0xf] }
 0x1f3   :  { %2213 = vrot.lane.b32.xlu0 %v7683_v11, %s7731_s23  ;;  %v2493_v27 = vsel %vm7779_vm2, %v2488_v7, %v2492_v19  ;;  %v5868_v29 = vrot.slane %v5866_v49, 4  ;;  %v5874_v42 = vrot.slane %v5872_v8, 5  ;;  %5454 = vrot.lane.b32.xlu1 %v7684_v40, %s7731_s23  ;;  %v5664_v37 = vshll.u32 %v7411_v41, 16  ;;  %v7501_v41 = vld [vmem:[%s11535_s0 + $0x194] sm:$0x1] }
 0x1f4   :  { %v2503_v35 = vsel %vm7779_vm2, %v2498_v16, %v2502_v57  ;;  %v5860_v53 = vrot.slane %v5859_v28, 4  ;;  %v5670_v17 = vshll.u32 %v7412_v0, 16  ;;  %v2210_v46 = vpop.permute.xlu0 %2209  ;;  %v5663_v54 = vrot.slane %v5661_v4, 4  ;;  %v7475_v40 = vld [vmem:[%s11535_s0 + $0x12c] sm:$0xe] }
 0x1f5   :  { %v6873_v61 = vcombine.low %v2493_v27, %v2503_v35  ;;  %v5869_v31 = vor.u32 %v5868_v29, %v5864_v36  ;;  %v5674_v59 = vshrl.u32 %v7412_v0, 16  ;;  %2253 = vst.msk [vmem:[#allocation2 + $0x28] sm:$0xff] %vm2247_vm12, %v2210_v46  ;;  %v5451_v45 = vpop.permute.xlu1 %5450  ;;  %v5666_v24 = vrot.slane %v5664_v37, 5  ;;  %v7055_v4 = vld [vmem:[%s11535_s0 + $0x184] sm:$0xf] }
 0x1f6   :  { %v5865_v12 = vsel %vm7779_vm2, %v5860_v53, %v5864_v36  ;;  %v5672_v50 = vrot.slane %v5670_v17, 5  ;;  %v5680_v26 = vshll.u32 %v7413_v14, 16  ;;  %5487 = vst.msk [vmem:[#allocation2 + $0x58] sm:$0xff] %vm2247_vm12, %v5451_v45  ;;  %v6945_v11 = vrot.slane %v6927_v9, 9  ;;  %v7477_v14 = vld [vmem:[%s11535_s0 + $0x134] sm:$0x1] }
 0x1f7   :  { %5438 = vrot.lane.b32.xlu0 %v7685_v56, %s7731_s23  ;;  %v5870_v52 = vrot.slane %v5869_v31, 4  ;;  %v5676_v55 = vrot.slane %v5674_v59, 4  ;;  %v3012_v13 = vrot.slane %v6928_v18, 5  ;;  %2774 = vrot.lane.b32.xlu1 %v6881_v63, %s7732_s10  ;;  %v5667_v21 = vor.u32 %v5666_v24, %v5663_v54  ;;  %v7054_v63 = vld [vmem:[%s11535_s0 + $0x180] sm:$0xf] }
 0x1f8   :  { %v5682_v44 = vrot.slane %v5680_v26, 5  ;;  %v3015_v60 = vrot.slane %v6929_v34, 5  ;;  %v6937_v2 = vrot.slane %v6903_v47, 9  ;;  %v5435_v39 = vpop.permute.xlu0 %5434  ;;  %v2956_v57 = vrot.slane %v6904_v32, 5  ;;  %v7056_v34 = vld [vmem:[%s11535_s0 + $0x188] sm:$0x1] }
 0x1f9   :  { %v5875_v19 = vsel %vm7779_vm2, %v5870_v52, %v5874_v42  ;;  %v5677_v62 = vor.u32 %v5676_v55, %v5672_v50  ;;  %v3013_v30 = vsel %vm8004_vm5, %v6945_v11, %v3012_v13  ;;  %v3014_v23 = vrot.slane %v3012_v13, 4  ;;  %5479 = vst.msk [vmem:[#allocation2 + $0x18] sm:$0xff] %vm2247_vm12, %v5435_v39  ;;  %v2771_v15 = vpop.permute.xlu1 %2770  ;;  %v7030_v46 = vld [vmem:[%s11535_s0 + $0x120] sm:$0xf]  ;;  %v7031_v59 = vld [vmem:[%s11535_s0 + $0x124] sm:$0xf] }
 0x1fa   :  { %v7457_v38 = vcombine.low %v5865_v12, %v5875_v19  ;;  %v5668_v25 = vrot.slane %v5667_v21, 4  ;;  %v2959_v0 = vrot.slane %v6905_v43, 5  ;;  %2806 = vst.msk [vmem:[#allocation2 + $0x68] sm:$0xff] %vm2792_vm13, %v2771_v15  ;;  %v7521_v20 = vrot.slane %v7499_v51, 9  ;;  %v7032_v32 = vld [vmem:[%s11535_s0 + $0x128] sm:$0x1] }
 0x1fb   :  { %2758 = vrot.lane.b32.xlu0 %v6873_v61, %s7732_s10  ;;  %v5678_v3 = vrot.slane %v5677_v62, 4  ;;  %v3016_v1 = vsel %vm8004_vm5, %v3014_v23, %v3015_v60  ;;  %v6225_v48 = vrot.slane %v7500_v33, 5  ;;  %v2957_v49 = vsel %vm8004_vm5, %v6937_v2, %v2956_v57  ;;  %v7118_v26 = vld [vmem:[%s11535_s0 + $0x180] sm:$0xe]  ;;  %v7119_v13 = vld [vmem:[%s11535_s0 + $0x184] sm:$0xf] }
 0x1fc   :  { %5998 = vrot.lane.b32.xlu1 %v7457_v38, %s7732_s10  ;;  %v5673_v6 = vsel %vm7779_vm2, %v5668_v25, %v5672_v50  ;;  %v6961_v7 = vcombine.low %v3013_v30, %v3016_v1  ;;  %v2958_v8 = vrot.slane %v2956_v57, 4  ;;  %v2755_v58 = vpop.permute.xlu0 %2754  ;;  %v6228_v9 = vrot.slane %v7501_v41, 5  ;;  %v7120_v39 = vld [vmem:[%s11535_s0 + $0x188] sm:$0x1]  ;;  %v7094_v41 = vld [vmem:[%s11535_s0 + $0x120] sm:$0xe] }
 0x1fd   :  { %v5683_v16 = vsel %vm7779_vm2, %v5678_v3, %v5682_v44  ;;  %v6226_v28 = vsel %vm8004_vm5, %v7521_v20, %v6225_v48  ;;  %v6227_v36 = vrot.slane %v6225_v48, 4  ;;  %2798 = vst.msk [vmem:[#allocation2 + $0x28] sm:$0xff] %vm2792_vm13, %v2755_v58  ;;  %v5995_v18 = vpop.permute.xlu1 %5994  ;;  %v7513_v29 = vrot.slane %v7475_v40, 9 }
 0x1fe   :  { %v7449_v56 = vcombine.low %v5673_v6, %v5683_v16  ;;  %v2960_v27 = vsel %vm8004_vm5, %v2958_v8, %v2959_v0  ;;  %v6169_v42 = vrot.slane %v7476_v5, 5  ;;  %6031 = vst.msk [vmem:[#allocation2 + $0x58] sm:$0xff] %vm2792_vm13, %v5995_v18  ;;  %v6172_v37 = vrot.slane %v7477_v14, 5  ;;  %v7095_v0 = vld [vmem:[%s11535_s0 + $0x124] sm:$0xf] }
 0x1ff   :  { %v6953_v35 = vcombine.low %v2957_v49, %v2960_v27  ;;  %v6229_v53 = vsel %vm8004_vm5, %v6227_v36, %v6228_v9  ;;  %v3791_v17 = vshrl.u32 %v7054_v63, 16  ;;  %v3794_v54 = vshll.u32 %v7054_v63, 16  ;;  %v7096_v6 = vld [vmem:[%s11535_s0 + $0x128] sm:$0x1]  ;;  %v7246_v63 = vld [vmem:[%s11535_s0 + $0x18c] sm:$0xf] }
 0x200   :  { %5982 = vrot.lane.b32.xlu0 %v7449_v56, %s7732_s10  ;;  %3095 = vrot.lane.b32.xlu1 %v6961_v7, %s7733_s24  ;;  %v7537_v47 = vcombine.low %v6226_v28, %v6229_v53  ;;  %v6170_v61 = vsel %vm8004_vm5, %v7513_v29, %v6169_v42  ;;  %v6171_v31 = vrot.slane %v6169_v42, 4  ;;  %v3800_v45 = vshll.u32 %v7055_v4, 16  ;;  %v7697_v7 = vld [vmem:[%s11535_s0 + $0x174] sm:$0xff]   ;;  %v7247_v18 = vld [vmem:[%s11535_s0 + $0x190] sm:$0xf] }
 0x201   :  { %v3793_v43 = vrot.slane %v3791_v17, 4  ;;  %v3804_v12 = vshrl.u32 %v7055_v4, 16  ;;  %v3810_v24 = vshll.u32 %v7056_v34, 16  ;;  %v5979_v50 = vpop.permute.xlu0 %5978  ;;  %v3092_v51 = vpop.permute.xlu1 %3091  ;;  %v3796_v52 = vrot.slane %v3794_v54, 5  ;;  %v7248_v56 = vld [vmem:[%s11535_s0 + $0x194] sm:$0x1] }
 0x202   :  { %v6173_v33 = vsel %vm8004_vm5, %v6171_v31, %v6172_v37  ;;  %v3599_v55 = vshrl.u32 %v7030_v46, 16  ;;  %v3602_v11 = vshll.u32 %v7030_v46, 16  ;;  %6023 = vst.msk [vmem:[#allocation2 + $0x18] sm:$0xff] %vm2792_vm13, %v5979_v50  ;;  %v3802_v44 = vrot.slane %v3800_v45, 5  ;;  %v7223_v50 = vld [vmem:[%s11535_s0 + $0x130] sm:$0xf] }
 0x203   :  { %3127 = vst.msk [vmem:[#allocation2 + $0x68] sm:$0xff] %vm3113_vm14, %v3092_v51  ;;  %v7529_v21 = vcombine.low %v6170_v61, %v6173_v33  ;;  %v3806_v60 = vrot.slane %v3804_v12, 4  ;;  %v3812_v2 = vrot.slane %v3810_v24, 5  ;;  %v3797_v19 = vor.u32 %v3796_v52, %v3793_v43  ;;  %v7696_v61 = vld [vmem:[%s11535_s0 + $0x114] sm:$0xff]  }
 0x204   :  { %3079 = vrot.lane.b32.xlu0 %v6953_v35, %s7733_s24  ;;  %6318 = vrot.lane.b32.xlu1 %v7537_v47, %s7733_s24  ;;  %v3601_v62 = vrot.slane %v3599_v55, 4  ;;  %v3604_v30 = vrot.slane %v3602_v11, 5  ;;  %v3608_v23 = vshll.u32 %v7031_v59, 16  ;;  %v3612_v38 = vshrl.u32 %v7031_v59, 16  ;;  %v7222_v35 = vld [vmem:[%s11535_s0 + $0x12c] sm:$0xf] }
 0x205   :  { %v3807_v15 = vor.u32 %v3806_v60, %v3802_v44  ;;  %v3618_v25 = vshll.u32 %v7032_v32, 16  ;;  %v7138_v57 = vrot.slane %v7118_v26, 9  ;;  %v3076_v40 = vpop.permute.xlu0 %3075  ;;  %v6315_v3 = vpop.permute.xlu1 %6314  ;;  %v3798_v1 = vrot.slane %v3797_v19, 4  ;;  %v7224_v52 = vld [vmem:[%s11535_s0 + $0x134] sm:$0x1] }
 0x206   :  { %v3605_v20 = vor.u32 %v3604_v30, %v3601_v62  ;;  %v3610_v48 = vrot.slane %v3608_v23, 5  ;;  %v4146_v5 = vrot.slane %v7119_v13, 5  ;;  %3119 = vst.msk [vmem:[#allocation2 + $0x28] sm:$0xff] %vm3113_vm14, %v3076_v40  ;;  %6351 = vst.msk [vmem:[#allocation2 + $0x58] sm:$0xff] %vm3113_vm14, %v6315_v3  ;;  %v3614_v8 = vrot.slane %v3612_v38, 4 }
 0x207   :  { %v3808_v49 = vrot.slane %v3807_v15, 4  ;;  %v3620_v14 = vrot.slane %v3618_v25, 5  ;;  %v4149_v58 = vrot.slane %v7120_v39, 5  ;;  %v3803_v16 = vsel %vm7779_vm2, %v3798_v1, %v3802_v44  ;;  %v7310_v19 = vld [vmem:[%s11535_s0 + $0x18c] sm:$0xe] }
 0x208   :  { %6302 = vrot.lane.b32.xlu0 %v7529_v21, %s7733_s24  ;;  %v3606_v28 = vrot.slane %v3605_v20, 4  ;;  %v4147_v36 = vsel %vm8004_vm5, %v7138_v57, %v4146_v5  ;;  %v4148_v9 = vrot.slane %v4146_v5, 4  ;;  %v3615_v29 = vor.u32 %v3614_v8, %v3610_v48  ;;  %v7311_v62 = vld [vmem:[%s11535_s0 + $0x190] sm:$0xf]  ;;  %v7312_v38 = vld [vmem:[%s11535_s0 + $0x194] sm:$0x1] }
 0x209   :  { %v3813_v27 = vsel %vm7779_vm2, %v3808_v49, %v3812_v2  ;;  %v7130_v42 = vrot.slane %v7094_v41, 9  ;;  %v4090_v4 = vrot.slane %v7095_v0, 5  ;;  %v6299_v34 = vpop.permute.xlu0 %6298  ;;  %v4093_v47 = vrot.slane %v7096_v6, 5  ;;  %v7686_v25 = vld [vmem:[%s11535_s0 + $0x18c] sm:$0xff]  }
 0x20a   :  { %v3144_v53 = vld [vmem:[#allocation2 + $0x68] sm:$0xff]  ;;  %v7074_v37 = vcombine.low %v3803_v16, %v3813_v27  ;;  %v3611_v17 = vsel %vm7779_vm2, %v3606_v28, %v3610_v48  ;;  %v4150_v46 = vsel %vm8004_vm5, %v4148_v9, %v4149_v58  ;;  %6343 = vst.msk [vmem:[#allocation2 + $0x18] sm:$0xff] %vm3113_vm14, %v6299_v34  ;;  %v3616_v31 = vrot.slane %v3615_v29, 4  ;;  %v7287_v49 = vld [vmem:[%s11535_s0 + $0x130] sm:$0xf] }
 0x20b   :  { %7585 = vmatprep.subr.msk.bf16.mxu0 %vm3147_vm15, %v3144_v53  ;;  %3403 = vst.msk [vmem:[#allocation2 + $0x68] sm:$0xff] %vm147_vm7, %v7697_v7  ;;  %v7154_v54 = vcombine.low %v4147_v36, %v4150_v46  ;;  %v4091_v59 = vsel %vm8004_vm5, %v7130_v42, %v4090_v4  ;;  %v4092_v32 = vrot.slane %v4090_v4, 4  ;;  %v4834_v43 = vshrl.u32 %v7246_v63, 16  ;;  %v7286_v1 = vld [vmem:[%s11535_s0 + $0x12c] sm:$0xe] }
 0x20c   :  { %3914 = vrot.lane.b32.xlu1 %v7074_v37, %s7726_s9  ;;  %v4837_v45 = vshll.u32 %v7246_v63, 16  ;;  %v4843_v12 = vshll.u32 %v7247_v18, 16  ;;  %v4847_v24 = vshrl.u32 %v7247_v18, 16  ;;  %v3621_v26 = vsel %vm7779_vm2, %v3616_v31, %v3620_v14  ;;  %v7288_v16 = vld [vmem:[%s11535_s0 + $0x134] sm:$0x1]  ;;  %v7687_v36 = vld [vmem:[%s11535_s0 + $0x12c] sm:$0xff]  }
 0x20d   :  { %v4094_v51 = vsel %vm8004_vm5, %v4092_v32, %v4093_v47  ;;  %v4853_v33 = vshll.u32 %v7248_v56, 16  ;;  %v4642_v55 = vshrl.u32 %v7222_v35, 16  ;;  %v11087_v11 = vld [vmem:[#allocation2 + $0x28] sm:$0xff]  ;;  %v6368_v13 = vld [vmem:[#allocation2 + $0x58] sm:$0xff]  ;;  %v7066_v21 = vcombine.low %v3611_v17, %v3621_v26 }
 0x20e   :  { %v7146_v44 = vcombine.low %v4091_v59, %v4094_v51  ;;  %v4836_v60 = vrot.slane %v4834_v43, 4  ;;  %v4839_v2 = vrot.slane %v4837_v45, 5  ;;  %v3911_v39 = vpop.permute.xlu1 %3910  ;;  %7591 = vmatprep.subr.msk.bf16.mxu1 %vm3147_vm15, %v6368_v13  ;;  %3395 = vst.msk [vmem:[#allocation2 + $0x28] sm:$0xff] %vm147_vm7, %v7696_v61  ;;  %v4845_v30 = vrot.slane %v4843_v12, 5  ;;  %v7439_v53 = vld [vmem:[%s11535_s0 + $0x19c] sm:$0xf] }
 0x20f   :  { %v4849_v23 = vrot.slane %v4847_v24, 4  ;;  %v4855_v41 = vrot.slane %v4853_v33, 5  ;;  %v4644_v15 = vrot.slane %v4642_v55, 4  ;;  %3946 = vst.msk [vmem:[#allocation2 + $0x60] sm:$0xff] %vm695_vm6, %v3911_v39  ;;  %3898 = vrot.lane.b32.xlu0 %v7066_v21, %s7726_s9  ;;  %v4645_v0 = vshll.u32 %v7222_v35, 16 }
 0x210   :  { %4234 = vrot.lane.b32.xlu1 %v7154_v54, %s7727_s26  ;;  %v4840_v57 = vor.u32 %v4839_v2, %v4836_v60  ;;  %v4651_v40 = vshll.u32 %v7223_v50, 16  ;;  %v4655_v3 = vshrl.u32 %v7223_v50, 16  ;;  %v4661_v48 = vshll.u32 %v7224_v52, 16  ;;  %v7438_v35 = vld [vmem:[%s11535_s0 + $0x198] sm:$0xf] }
 0x211   :  { %v4850_v20 = vor.u32 %v4849_v23, %v4845_v30  ;;  %v3895_v5 = vpop.permute.xlu0 %3894  ;;  %v7330_v6 = vrot.slane %v7310_v19, 9  ;;  %v5189_v7 = vrot.slane %v7311_v62, 5  ;;  %v4647_v14 = vrot.slane %v4645_v0, 5  ;;  %v6360_v31 = vld [vmem:[#allocation2 + $0x18] sm:$0xff]  ;;  %v7440_v54 = vld [vmem:[%s11535_s0 + $0x1a0] sm:$0x1] }
 0x212   :  { %v4841_v8 = vrot.slane %v4840_v57, 4  ;;  %v4653_v58 = vrot.slane %v4651_v40, 5  ;;  %v4657_v63 = vrot.slane %v4655_v3, 4  ;;  %3938 = vst.msk [vmem:[#allocation2 + $0x20] sm:$0xff] %vm695_vm6, %v3895_v5  ;;  %v4231_v28 = vpop.permute.xlu1 %4230  ;;  %v4663_v18 = vrot.slane %v4661_v48, 5 }
 0x213   :  { %v4851_v9 = vrot.slane %v4850_v20, 4  ;;  %v5190_v56 = vsel %vm8004_vm5, %v7330_v6, %v5189_v7  ;;  %v5191_v27 = vrot.slane %v5189_v7, 4  ;;  %4266 = vst.msk [vmem:[#allocation2 + $0x60] sm:$0xff] %vm1019_vm8, %v4231_v28  ;;  %4218 = vrot.lane.b32.xlu0 %v7146_v44, %s7727_s26  ;;  %v4648_v42 = vor.u32 %v4647_v14, %v4644_v15  ;;  %v7414_v21 = vld [vmem:[%s11535_s0 + $0x138] sm:$0xf] }
 0x214   :  { %4413 = vrot.lane.b32.xlu1 %v7686_v25, %s7728_s28  ;;  %v4846_v29 = vsel %vm7779_vm2, %v4841_v8, %v4845_v30  ;;  %v4658_v4 = vor.u32 %v4657_v63, %v4653_v58  ;;  %v5192_v34 = vrot.slane %v7312_v38, 5  ;;  %v7322_v17 = vrot.slane %v7286_v1, 9  ;;  %v7416_v62 = vld [vmem:[%s11535_s0 + $0x140] sm:$0x1]  ;;  %v7502_v30 = vld [vmem:[%s11535_s0 + $0x198] sm:$0xe] }
 0x215   :  { %v4856_v37 = vsel %vm7779_vm2, %v4851_v9, %v4855_v41  ;;  %v5133_v46 = vrot.slane %v7287_v49, 5  ;;  %v5136_v47 = vrot.slane %v7288_v16, 5  ;;  %v4215_v61 = vpop.permute.xlu0 %4214  ;;  %v4649_v32 = vrot.slane %v4648_v42, 4  ;;  %v7690_v41 = vld [vmem:[%s11535_s0 + $0x198] sm:$0xff]   ;;  %v7504_v48 = vld [vmem:[%s11535_s0 + $0x1a0] sm:$0x1] }
 0x216   :  { %v7266_v59 = vcombine.low %v4846_v29, %v4856_v37  ;;  %v4659_v43 = vrot.slane %v4658_v4, 4  ;;  %v5193_v45 = vsel %vm8004_vm5, %v5191_v27, %v5192_v34  ;;  %4258 = vst.msk [vmem:[#allocation2 + $0x20] sm:$0xff] %vm1019_vm8, %v4215_v61  ;;  %v4410_v12 = vpop.permute.xlu1 %4409  ;;  %v3167_v51 = vsel %vm3147_vm15, %v11087_v11, 0  ;;  %v7415_v11 = vld [vmem:[%s11535_s0 + $0x13c] sm:$0xf] }
 0x217   :  { %v7346_v24 = vcombine.low %v5190_v56, %v5193_v45  ;;  %v5134_v50 = vsel %vm8004_vm5, %v7322_v17, %v5133_v46  ;;  %v5135_v26 = vrot.slane %v5133_v46, 4  ;;  %4445 = vst.msk [vmem:[#allocation2 + $0x60] sm:$0xff] %vm1200_vm9, %v4410_v12  ;;  %4397 = vrot.lane.b32.xlu0 %v7687_v36, %s7728_s28  ;;  %v4654_v33 = vsel %vm7779_vm2, %v4649_v32, %v4653_v58  ;;  %v7503_v0 = vld [vmem:[%s11535_s0 + $0x19c] sm:$0xf]  ;;  %v7478_v8 = vld [vmem:[%s11535_s0 + $0x138] sm:$0xe] }
 0x218   :  { %4957 = vrot.lane.b32.xlu1 %v7266_v59, %s7729_s15  ;;  %v4664_v52 = vsel %vm7779_vm2, %v4659_v43, %v4663_v18  ;;  %v6386_v55 = vsel %vm3147_vm15, %v6360_v31, 0  ;;  %v5877_v13 = vshrl.u32 %v7438_v35, 16  ;;  %7555 = vmatpush3.bf16.xpose.msra.mxu0 %v3167_v51  ;;  %v5880_v39 = vshll.u32 %v7438_v35, 16  ;;  %v7479_v36 = vld [vmem:[%s11535_s0 + $0x13c] sm:$0xf] }
 0x219   :  { %v7258_v44 = vcombine.low %v4654_v33, %v4664_v52  ;;  %v5137_v60 = vsel %vm8004_vm5, %v5135_v26, %v5136_v47  ;;  %7569 = vmatpush3.bf16.xpose.msra.mxu1 %v6386_v55  ;;  %v4394_v2 = vpop.permute.xlu0 %4393  ;;  %v5886_v19 = vshll.u32 %v7439_v53, 16  ;;  %v5890_v38 = vshrl.u32 %v7439_v53, 16  ;;  %v7480_v29 = vld [vmem:[%s11535_s0 + $0x140] sm:$0x1]  ;;  %v7057_v37 = vld [vmem:[%s11535_s0 + $0x18c] sm:$0xf] }
 0x21a   :  { %v7338_v23 = vcombine.low %v5134_v50, %v5137_v60  ;;  %4437 = vst.msk [vmem:[#allocation2 + $0x20] sm:$0xff] %vm1200_vm9, %v4394_v2  ;;  %v5879_v15 = vrot.slane %v5877_v13, 4  ;;  %v5896_v25 = vshll.u32 %v7440_v54, 16  ;;  %v4938_v57 = vpop.permute.xlu1 %4937  ;;  %v5882_v40 = vrot.slane %v5880_v39, 5  ;;  %v7691_v17 = vld [vmem:[%s11535_s0 + $0x138] sm:$0xff]  }
 0x21b   :  { %v5888_v3 = vrot.slane %v5886_v19, 5  ;;  %v5685_v1 = vshrl.u32 %v7414_v21, 16  ;;  %v5688_v20 = vshll.u32 %v7414_v21, 16  ;;  %4981 = vst.msk [vmem:[#allocation2 + $0x20] sm:$0xff] %vm1745_vm10, %v4938_v57  ;;  %4941 = vrot.lane.b32.xlu0 %v7258_v44, %s7729_s15  ;;  %v5892_v5 = vrot.slane %v5890_v38, 4 }
 0x21c   :  { %5277 = vrot.lane.b32.xlu1 %v7346_v24, %s7730_s18  ;;  %v5898_v6 = vrot.slane %v5896_v25, 5  ;;  %v5694_v7 = vshll.u32 %v7415_v11, 16  ;;  %v5698_v49 = vshrl.u32 %v7415_v11, 16  ;;  %v5883_v14 = vor.u32 %v5882_v40, %v5879_v15  ;;  %v7058_v54 = vld [vmem:[%s11535_s0 + $0x190] sm:$0xf] }
 0x21d   :  { %v5687_v58 = vrot.slane %v5685_v1, 4  ;;  %v5690_v63 = vrot.slane %v5688_v20, 5  ;;  %v5704_v16 = vshll.u32 %v7416_v62, 16  ;;  %v1726_v28 = vpop.permute.xlu0 %1725  ;;  %v5893_v9 = vor.u32 %v5892_v5, %v5888_v3  ;;  %v7059_v12 = vld [vmem:[%s11535_s0 + $0x194] sm:$0x1] }
 0x21e   :  { %v5696_v18 = vrot.slane %v5694_v7, 5  ;;  %v5700_v56 = vrot.slane %v5698_v49, 4  ;;  %1760 = vst.msk [vmem:[#allocation2 + $0x70] sm:$0xff] %vm1745_vm10, %v1726_v28  ;;  %v7522_v27 = vrot.slane %v7502_v30, 9  ;;  %v2031_v42 = vpop.permute.xlu1 %2030  ;;  %v5884_v4 = vrot.slane %v5883_v14, 4 }
 0x21f   :  { %v5691_v34 = vor.u32 %v5690_v63, %v5687_v58  ;;  %v5706_v35 = vrot.slane %v5704_v16, 5  ;;  %v6232_v53 = vrot.slane %v7503_v0, 5  ;;  %2073 = vst.msk [vmem:[#allocation2 + $0x30] sm:$0xff] %vm2066_vm11, %v2031_v42  ;;  %5261 = vrot.lane.b32.xlu0 %v7338_v23, %s7730_s18  ;;  %v5894_v46 = vrot.slane %v5893_v9, 4  ;;  %v7033_v24 = vld [vmem:[%s11535_s0 + $0x12c] sm:$0xf] }
 0x220   :  { %5456 = vrot.lane.b32.xlu1 %v7690_v41, %s7731_s23  ;;  %v5701_v47 = vor.u32 %v5700_v56, %v5696_v18  ;;  %v6235_v61 = vrot.slane %v7504_v48, 5  ;;  %v7514_v31 = vrot.slane %v7478_v8, 9  ;;  %v5889_v59 = vsel %vm7779_vm2, %v5884_v4, %v5888_v3  ;;  %v7034_v11 = vld [vmem:[%s11535_s0 + $0x130] sm:$0xf]  ;;  %v7035_v30 = vld [vmem:[%s11535_s0 + $0x134] sm:$0x1] }
 0x221   :  { %v5692_v32 = vrot.slane %v5691_v34, 4  ;;  %v6233_v43 = vsel %vm8004_vm5, %v7522_v27, %v6232_v53  ;;  %v6234_v45 = vrot.slane %v6232_v53, 4  ;;  %v5899_v50 = vsel %vm7779_vm2, %v5894_v46, %v5898_v6  ;;  %v7121_v25 = vld [vmem:[%s11535_s0 + $0x18c] sm:$0xe]  ;;  %v7122_v57 = vld [vmem:[%s11535_s0 + $0x190] sm:$0xf] }
 0x222   :  { %v5702_v26 = vrot.slane %v5701_v47, 4  ;;  %v6176_v51 = vrot.slane %v7479_v36, 5  ;;  %v6179_v33 = vrot.slane %v7480_v29, 5  ;;  %v7458_v52 = vcombine.low %v5889_v59, %v5899_v50  ;;  %v7123_v7 = vld [vmem:[%s11535_s0 + $0x194] sm:$0x1] }
 0x223   :  { %v5697_v55 = vsel %vm7779_vm2, %v5692_v32, %v5696_v18  ;;  %v6236_v13 = vsel %vm8004_vm5, %v6234_v45, %v6235_v61  ;;  %v3815_v21 = vshrl.u32 %v7057_v37, 16  ;;  %v5258_v44 = vpop.permute.xlu1 %5257  ;;  %5440 = vrot.lane.b32.xlu0 %v7691_v17, %s7731_s23  ;;  %v3818_v15 = vshll.u32 %v7057_v37, 16  ;;  %v7097_v28 = vld [vmem:[%s11535_s0 + $0x12c] sm:$0xe]  ;;  %v7098_v27 = vld [vmem:[%s11535_s0 + $0x130] sm:$0xf] }
 0x224   :  { %v5707_v60 = vsel %vm7779_vm2, %v5702_v26, %v5706_v35  ;;  %v7538_v2 = vcombine.low %v6233_v43, %v6236_v13  ;;  %v6177_v39 = vsel %vm8004_vm5, %v7514_v31, %v6176_v51  ;;  %v6178_v19 = vrot.slane %v6176_v51, 4  ;;  %v4954_v62 = vpop.permute.xlu0 %4953  ;;  %5301 = vst.msk [vmem:[#allocation2 + $0x20] sm:$0xff] %vm2066_vm11, %v5258_v44  ;;  %6000 = vrot.lane.b32.xlu1 %v7458_v52, %s7732_s10  ;;  %v7099_v29 = vld [vmem:[%s11535_s0 + $0x134] sm:$0x1] }
 0x225   :  { %v7450_v23 = vcombine.low %v5697_v55, %v5707_v60  ;;  %4989 = vst.msk [vmem:[#allocation2 + $0x60] sm:$0xff] %vm1745_vm10, %v4954_v62  ;;  %v3817_v41 = vrot.slane %v3815_v21, 4  ;;  %v3824_v38 = vshll.u32 %v7058_v54, 16  ;;  %v3828_v40 = vshrl.u32 %v7058_v54, 16 }
 0x226   :  { %v6180_v0 = vsel %vm8004_vm5, %v6178_v19, %v6179_v33  ;;  %v3834_v3 = vshll.u32 %v7059_v12, 16  ;;  %v3623_v1 = vshrl.u32 %v7033_v24, 16  ;;  %v3820_v48 = vrot.slane %v3818_v15, 5 }
 0x227   :  { %v7530_v20 = vcombine.low %v6177_v39, %v6180_v0  ;;  %v3826_v5 = vrot.slane %v3824_v38, 5  ;;  %v3626_v6 = vshll.u32 %v7033_v24, 16  ;;  %v2212_v49 = vpop.permute.xlu1 %2211  ;;  %5984 = vrot.lane.b32.xlu0 %v7450_v23, %s7732_s10  ;;  %v3830_v8 = vrot.slane %v3828_v40, 4 }
 0x228   :  { %v3836_v14 = vrot.slane %v3834_v3, 5  ;;  %v3625_v58 = vrot.slane %v3623_v1, 4  ;;  %v3632_v63 = vshll.u32 %v7034_v11, 16  ;;  %v2047_v16 = vpop.permute.xlu0 %2046  ;;  %2254 = vst.msk [vmem:[#allocation2 + $0x30] sm:$0xff] %vm2247_vm12, %v2212_v49  ;;  %6320 = vrot.lane.b32.xlu1 %v7538_v2, %s7733_s24  ;;  %v3821_v36 = vor.u32 %v3820_v48, %v3817_v41 }
 0x229   :  { %v3628_v9 = vrot.slane %v3626_v6, 5  ;;  %v3636_v18 = vshrl.u32 %v7034_v11, 16  ;;  %v3642_v56 = vshll.u32 %v7035_v30, 16  ;;  %2081 = vst.msk [vmem:[#allocation2 + $0x70] sm:$0xff] %vm2066_vm11, %v2047_v16  ;;  %v3831_v42 = vor.u32 %v3830_v8, %v3826_v5 }
 0x22a   :  { %v3634_v4 = vrot.slane %v3632_v63, 5  ;;  %v7139_v34 = vrot.slane %v7121_v25, 9  ;;  %v4153_v35 = vrot.slane %v7122_v57, 5  ;;  %v3822_v53 = vrot.slane %v3821_v36, 4 }
 0x22b   :  { %v3629_v37 = vor.u32 %v3628_v9, %v3625_v58  ;;  %v3638_v17 = vrot.slane %v3636_v18, 4  ;;  %v3644_v46 = vrot.slane %v3642_v56, 5  ;;  %v5437_v47 = vpop.permute.xlu1 %5436 }
 0x22c   :  { %9 = vsyncpa [#allocation4], 0  ;;  %6304 = vrot.lane.b32.xlu0 %v7530_v20, %s7733_s24  ;;  %v3832_v61 = vrot.slane %v3831_v42, 4  ;;  %v4154_v31 = vsel %vm8004_vm5, %v7139_v34, %v4153_v35  ;;  %v4155_v54 = vrot.slane %v4153_v35, 4  ;;  %v4156_v59 = vrot.slane %v7123_v7, 5  ;;  %v5274_v32 = vpop.permute.xlu0 %5273  ;;  %5480 = vst.msk [vmem:[#allocation2 + $0x20] sm:$0xff] %vm2247_vm12, %v5437_v47 }
 0x22d   :  { %v3827_v43 = vsel %vm7779_vm2, %v3822_v53, %v3826_v5  ;;  %v3630_v45 = vrot.slane %v3629_v37, 4  ;;  %v3639_v12 = vor.u32 %v3638_v17, %v3634_v4  ;;  %v7131_v24 = vrot.slane %v7097_v28, 9  ;;  %5309 = vst.msk [vmem:[#allocation2 + $0x60] sm:$0xff] %vm2066_vm11, %v5274_v32  ;;  %v7249_v50 = vld [vmem:[%s11535_s0 + $0x198] sm:$0xf] }
 0x22e   :  { %v3837_v26 = vsel %vm7779_vm2, %v3832_v61, %v3836_v14  ;;  %v4157_v51 = vsel %vm8004_vm5, %v4155_v54, %v4156_v59  ;;  %v4097_v33 = vrot.slane %v7098_v27, 5  ;;  %v4100_v52 = vrot.slane %v7099_v29, 5  ;;  %v7250_v55 = vld [vmem:[%s11535_s0 + $0x19c] sm:$0xf]  ;;  %v7251_v13 = vld [vmem:[%s11535_s0 + $0x1a0] sm:$0x1] }
 0x22f   :  { %v7075_v21 = vcombine.low %v3827_v43, %v3837_v26  ;;  %v3635_v11 = vsel %vm7779_vm2, %v3630_v45, %v3634_v4  ;;  %v3640_v44 = vrot.slane %v3639_v12, 4  ;;  %v7155_v60 = vcombine.low %v4154_v31, %v4157_v51  ;;  %v2757_v2 = vpop.permute.xlu1 %2756  ;;  %v7225_v41 = vld [vmem:[%s11535_s0 + $0x138] sm:$0xf]  ;;  %v7226_v0 = vld [vmem:[%s11535_s0 + $0x13c] sm:$0xf] }
 0x230   :  { %v4098_v39 = vsel %vm8004_vm5, %v7131_v24, %v4097_v33  ;;  %v4099_v19 = vrot.slane %v4097_v33, 4  ;;  %v2228_v62 = vpop.permute.xlu0 %2227  ;;  %v4858_v30 = vshrl.u32 %v7249_v50, 16  ;;  %v4861_v23 = vshll.u32 %v7249_v50, 16  ;;  %2799 = vst.msk [vmem:[#allocation2 + $0x30] sm:$0xff] %vm2792_vm13, %v2757_v2  ;;  %v7227_v48 = vld [vmem:[%s11535_s0 + $0x140] sm:$0x1] }
 0x231   :  { %3916 = vrot.lane.b32.xlu1 %v7075_v21, %s7726_s9  ;;  %v3645_v15 = vsel %vm7779_vm2, %v3640_v44, %v3644_v46  ;;  %2262 = vst.msk [vmem:[#allocation2 + $0x70] sm:$0xff] %vm2247_vm12, %v2228_v62  ;;  %v4867_v38 = vshll.u32 %v7250_v55, 16  ;;  %v4871_v25 = vshrl.u32 %v7250_v55, 16  ;;  %v4877_v57 = vshll.u32 %v7251_v13, 16  ;;  %v7313_v5 = vld [vmem:[%s11535_s0 + $0x198] sm:$0xe] }
 0x232   :  { %v7067_v40 = vcombine.low %v3635_v11, %v3645_v15  ;;  %v4101_v3 = vsel %vm8004_vm5, %v4099_v19, %v4100_v52  ;;  %v4860_v1 = vrot.slane %v4858_v30, 4  ;;  %v4863_v20 = vrot.slane %v4861_v23, 5  ;;  %v7314_v14 = vld [vmem:[%s11535_s0 + $0x19c] sm:$0xf]  ;;  %v7315_v18 = vld [vmem:[%s11535_s0 + $0x1a0] sm:$0x1] }
 0x233   :  { %v7147_v6 = vcombine.low %v4098_v39, %v4101_v3  ;;  %v4869_v7 = vrot.slane %v4867_v38, 5  ;;  %v4873_v49 = vrot.slane %v4871_v25, 4  ;;  %v4879_v8 = vrot.slane %v4877_v57, 5  ;;  %v5981_v58 = vpop.permute.xlu1 %5980  ;;  %v7692_v56 = vld [vmem:[%s11535_s0 + $0x198] sm:$0xff]   ;;  %v7291_v59 = vld [vmem:[%s11535_s0 + $0x140] sm:$0x1] }
 0x234   :  { %3900 = vrot.lane.b32.xlu0 %v7067_v40, %s7726_s9  ;;  %v4864_v63 = vor.u32 %v4863_v20, %v4860_v1  ;;  %v4666_v16 = vshrl.u32 %v7225_v41, 16  ;;  %v4669_v28 = vshll.u32 %v7225_v41, 16  ;;  %v4675_v36 = vshll.u32 %v7226_v0, 16  ;;  %v5453_v9 = vpop.permute.xlu0 %5452  ;;  %6024 = vst.msk [vmem:[#allocation2 + $0x20] sm:$0xff] %vm2792_vm13, %v5981_v58  ;;  %v7289_v34 = vld [vmem:[%s11535_s0 + $0x138] sm:$0xe] }
 0x235   :  { %4236 = vrot.lane.b32.xlu1 %v7155_v60, %s7727_s26  ;;  %v4874_v27 = vor.u32 %v4873_v49, %v4869_v7  ;;  %v4679_v29 = vshrl.u32 %v7226_v0, 16  ;;  %v4685_v42 = vshll.u32 %v7227_v48, 16  ;;  %5488 = vst.msk [vmem:[#allocation2 + $0x60] sm:$0xff] %vm2247_vm12, %v5453_v9  ;;  %v7331_v4 = vrot.slane %v7313_v5, 9  ;;  %v7290_v46 = vld [vmem:[%s11535_s0 + $0x13c] sm:$0xf] }
 0x236   :  { %v4865_v35 = vrot.slane %v4864_v63, 4  ;;  %v4668_v53 = vrot.slane %v4666_v16, 4  ;;  %v4671_v37 = vrot.slane %v4669_v28, 5  ;;  %v4677_v17 = vrot.slane %v4675_v36, 5  ;;  %v7693_v43 = vld [vmem:[%s11535_s0 + $0x138] sm:$0xff]   ;;  %v7699_v3 = vld [vmem:[%s11535_s0 + $0x120] sm:$0xff]  }
 0x237   :  { %v4875_v47 = vrot.slane %v4874_v27, 4  ;;  %v4681_v61 = vrot.slane %v4679_v29, 4  ;;  %v4687_v31 = vrot.slane %v4685_v42, 5  ;;  %v5196_v54 = vrot.slane %v7314_v14, 5  ;;  %v3078_v32 = vpop.permute.xlu1 %3077  ;;  %v7441_v51 = vld [vmem:[%s11535_s0 + $0x1a4] sm:$0xf] }
 0x238   :  { %4220 = vrot.lane.b32.xlu0 %v7147_v6, %s7727_s26  ;;  %v4870_v45 = vsel %vm7779_vm2, %v4865_v35, %v4869_v7  ;;  %v4672_v12 = vor.u32 %v4671_v37, %v4668_v53  ;;  %v5199_v24 = vrot.slane %v7315_v18, 5  ;;  %v7323_v50 = vrot.slane %v7289_v34, 9  ;;  %v2773_v26 = vpop.permute.xlu0 %2772  ;;  %3120 = vst.msk [vmem:[#allocation2 + $0x30] sm:$0xff] %vm3113_vm14, %v3078_v32  ;;  %v7442_v2 = vld [vmem:[%s11535_s0 + $0x1a8] sm:$0xf] }
 0x239   :  { %4415 = vrot.lane.b32.xlu1 %v7692_v56, %s7728_s28  ;;  %v4880_v33 = vsel %vm7779_vm2, %v4875_v47, %v4879_v8  ;;  %v4682_v52 = vor.u32 %v4681_v61, %v4677_v17  ;;  %v5197_v55 = vsel %vm8004_vm5, %v7331_v4, %v5196_v54  ;;  %v5198_v13 = vrot.slane %v5196_v54, 4  ;;  %2807 = vst.msk [vmem:[#allocation2 + $0x70] sm:$0xff] %vm2792_vm13, %v2773_v26  ;;  %v7443_v62 = vld [vmem:[%s11535_s0 + $0x1ac] sm:$0x1]  ;;  %v7417_v40 = vld [vmem:[%s11535_s0 + $0x144] sm:$0xf] }
 0x23a   :  { %v7267_v21 = vcombine.low %v4870_v45, %v4880_v33  ;;  %v4673_v11 = vrot.slane %v4672_v12, 4  ;;  %v5140_v44 = vrot.slane %v7290_v46, 5  ;;  %v5143_v60 = vrot.slane %v7291_v59, 5  ;;  %v7418_v6 = vld [vmem:[%s11535_s0 + $0x148] sm:$0xf] }
 0x23b   :  { %v4683_v39 = vrot.slane %v4682_v52, 4  ;;  %v5200_v19 = vsel %vm8004_vm5, %v5198_v13, %v5199_v24  ;;  %v5901_v30 = vshrl.u32 %v7441_v51, 16  ;;  %v5904_v23 = vshll.u32 %v7441_v51, 16  ;;  %v6301_v41 = vpop.permute.xlu1 %6300  ;;  %v7419_v58 = vld [vmem:[%s11535_s0 + $0x14c] sm:$0x1]  ;;  %v7694_v28 = vld [vmem:[%s11535_s0 + $0x1a4] sm:$0xff]  }
 0x23c   :  { %4399 = vrot.lane.b32.xlu0 %v7693_v43, %s7728_s28  ;;  %v4678_v15 = vsel %vm7779_vm2, %v4673_v11, %v4677_v17  ;;  %v7347_v38 = vcombine.low %v5197_v55, %v5200_v19  ;;  %v5141_v25 = vsel %vm8004_vm5, %v7323_v50, %v5140_v44  ;;  %v5142_v57 = vrot.slane %v5140_v44, 4  ;;  %v5997_v0 = vpop.permute.xlu0 %5996  ;;  %6344 = vst.msk [vmem:[#allocation2 + $0x20] sm:$0xff] %vm3113_vm14, %v6301_v41  ;;  %v7505_v63 = vld [vmem:[%s11535_s0 + $0x1a4] sm:$0xe]  ;;  %v7506_v56 = vld [vmem:[%s11535_s0 + $0x1a8] sm:$0xf] }
 0x23d   :  { %4959 = vrot.lane.b32.xlu1 %v7267_v21, %s7729_s15  ;;  %v4688_v1 = vsel %vm7779_vm2, %v4683_v39, %v4687_v31  ;;  %6032 = vst.msk [vmem:[#allocation2 + $0x60] sm:$0xff] %vm2792_vm13, %v5997_v0  ;;  %v5903_v20 = vrot.slane %v5901_v30, 4  ;;  %v5906_v48 = vrot.slane %v5904_v23, 5  ;;  %v5910_v5 = vshll.u32 %v7442_v2, 16  ;;  %v7507_v53 = vld [vmem:[%s11535_s0 + $0x1ac] sm:$0x1] }
 0x23e   :  { %v7259_v7 = vcombine.low %v4678_v15, %v4688_v1  ;;  %v5144_v49 = vsel %vm8004_vm5, %v5142_v57, %v5143_v60  ;;  %v5914_v8 = vshrl.u32 %v7442_v2, 16  ;;  %v5920_v14 = vshll.u32 %v7443_v62, 16  ;;  %v7481_v61 = vld [vmem:[%s11535_s0 + $0x144] sm:$0xe]  ;;  %v7482_v43 = vld [vmem:[%s11535_s0 + $0x148] sm:$0xf] }
 0x23f   :  { %v7339_v16 = vcombine.low %v5141_v25, %v5144_v49  ;;  %v5907_v36 = vor.u32 %v5906_v48, %v5903_v20  ;;  %v5912_v9 = vrot.slane %v5910_v5, 5  ;;  %v5709_v18 = vshrl.u32 %v7417_v40, 16  ;;  %v3137_v27 = vld [vmem:[#allocation2 + $0x30] sm:$0xff]  ;;  %v7483_v50 = vld [vmem:[%s11535_s0 + $0x14c] sm:$0x1]  ;;  %v7695_v51 = vld [vmem:[%s11535_s0 + $0x144] sm:$0xff]  }
 0x240   :  { %4943 = vrot.lane.b32.xlu0 %v7259_v7, %s7729_s15  ;;  %v5916_v29 = vrot.slane %v5914_v8, 4  ;;  %v5922_v42 = vrot.slane %v5920_v14, 5  ;;  %v5712_v4 = vshll.u32 %v7417_v40, 16  ;;  %v5718_v34 = vshll.u32 %v7418_v6, 16  ;;  %v3094_v35 = vpop.permute.xlu0 %3093  ;;  %3396 = vst.msk [vmem:[#allocation2 + $0x30] sm:$0xff] %vm147_vm7, %v7699_v3  ;;  %v7698_v19 = vld [vmem:[%s11535_s0 + $0x180] sm:$0xff]  }
 0x241   :  { %5279 = vrot.lane.b32.xlu1 %v7347_v38, %s7730_s18  ;;  %v5908_v37 = vrot.slane %v5907_v36, 4  ;;  %v5711_v17 = vrot.slane %v5709_v18, 4  ;;  %v5722_v46 = vshrl.u32 %v7418_v6, 16  ;;  %v5728_v47 = vshll.u32 %v7419_v58, 16  ;;  %3128 = vst.msk [vmem:[#allocation2 + $0x70] sm:$0xff] %vm3113_vm14, %v3094_v35 }
 0x242   :  { %v5917_v31 = vor.u32 %v5916_v29, %v5912_v9  ;;  %v5714_v54 = vrot.slane %v5712_v4, 5  ;;  %v5720_v59 = vrot.slane %v5718_v34, 5  ;;  %v7523_v32 = vrot.slane %v7505_v63, 9  ;;  %v11398_v26 = vld [vmem:[%s11536_s1] sm:$0xf] }
 0x243   :  { %v5913_v45 = vsel %vm7779_vm2, %v5908_v37, %v5912_v9  ;;  %v5724_v12 = vrot.slane %v5722_v46, 4  ;;  %v6239_v24 = vrot.slane %v7506_v56, 5  ;;  %v5730_v55 = vrot.slane %v5728_v47, 5  ;;  %7560 = vmatprep.mubr.msk.bf16.mxu0 %vm3147_vm15, %v11398_v26  ;;  %v6361_v49 = vld [vmem:[#allocation2 + $0x20] sm:$0xff] }
 0x244   :  { %5263 = vrot.lane.b32.xlu0 %v7339_v16, %s7730_s18  ;;  %v5918_v33 = vrot.slane %v5917_v31, 4  ;;  %v5715_v52 = vor.u32 %v5714_v54, %v5711_v17  ;;  %v6242_v13 = vrot.slane %v7507_v53, 5  ;;  %v3897_v21 = vpop.permute.xlu1 %3896  ;;  %v6317_v11 = vpop.permute.xlu0 %6316  ;;  %v7515_v2 = vrot.slane %v7481_v61, 9  ;;  %v11436_v63 = vld [vmem:[%s11536_s1] sm:$0xf] }
 0x245   :  { %5458 = vrot.lane.b32.xlu1 %v7694_v28, %s7731_s23  ;;  %v5725_v44 = vor.u32 %v5724_v12, %v5720_v59  ;;  %v6241_v60 = vrot.slane %v6239_v24, 4  ;;  %v6183_v39 = vrot.slane %v7482_v43, 5  ;;  %3939 = vst.msk [vmem:[#allocation2 + $0x28] sm:$0xff] %vm695_vm6, %v3897_v21  ;;  %v6240_v23 = vsel %vm8004_vm5, %v7523_v32, %v6239_v24  ;;  %7578 = vmatprep.mubr.msk.bf16.mxu1 %vm3147_vm15, %v11436_v63 }
 0x246   :  { %6352 = vst.msk [vmem:[#allocation2 + $0x60] sm:$0xff] %vm3113_vm14, %v6317_v11  ;;  %v5923_v62 = vsel %vm7779_vm2, %v5918_v33, %v5922_v42  ;;  %v5716_v30 = vrot.slane %v5715_v52, 4  ;;  %v6186_v41 = vrot.slane %v7483_v50, 5  ;;  %v3170_v5 = vsel %vm3147_vm15, %v3137_v27, 0 }
 0x247   :  { %v7459_v15 = vcombine.low %v5913_v45, %v5923_v62  ;;  %v5726_v38 = vrot.slane %v5725_v44, 4  ;;  %v6243_v25 = vsel %vm8004_vm5, %v6241_v60, %v6242_v13  ;;  %v6185_v0 = vrot.slane %v6183_v39, 4  ;;  %v7701_v45 = vld [vmem:[%s11535_s0 + $0x12c] sm:$0xff]  }
 0x248   :  { %5442 = vrot.lane.b32.xlu0 %v7695_v51, %s7731_s23  ;;  %v5721_v57 = vsel %vm7779_vm2, %v5716_v30, %v5720_v59  ;;  %v4217_v40 = vpop.permute.xlu1 %4216  ;;  %v3145_v3 = vld [vmem:[#allocation2 + $0x70] sm:$0xff]  ;;  %v7539_v20 = vcombine.low %v6240_v23, %v6243_v25  ;;  %v6184_v48 = vsel %vm8004_vm5, %v7515_v2, %v6183_v39  ;;  %v6389_v10 = vsel %vm3147_vm15, %v6361_v49, 0 }
 0x249   :  { %6002 = vrot.lane.b32.xlu1 %v7459_v15, %s7732_s10  ;;  %v5731_v1 = vsel %vm7779_vm2, %v5726_v38, %v5730_v55  ;;  %4259 = vst.msk [vmem:[#allocation2 + $0x28] sm:$0xff] %vm1019_vm8, %v4217_v40  ;;  %7586 = vmatprep.subr.msk.bf16.mxu0 %vm3147_vm15, %v3145_v3  ;;  %v6187_v7 = vsel %vm8004_vm5, %v6185_v0, %v6186_v41  ;;  %v7700_v59 = vld [vmem:[%s11535_s0 + $0x18c] sm:$0xff]   ;;  %s7734_s0 = smov [#allocation3]  }
 0x24a   :  { %3404 = vst.msk [vmem:[#allocation2 + $0x70] sm:$0xff] %vm147_vm7, %v7698_v19  ;;  %v7451_v6 = vcombine.low %v5721_v57, %v5731_v1  ;;  %7557 = vmatpush3.bf16.xpose.msra.mxu0 %v3170_v5  ;;  %v7531_v22 = vcombine.low %v6184_v48, %v6187_v7  ;;  %s6494_s9 = sshll.u32 %s7734_s0, 4  ;;  %s6495_s9 = int_to_ptr.vmem [resolvable:$true] %s6494_s9 }
 0x24b   :  { %v3913_v8 = vpop.permute.xlu0 %3912  ;;  %s7702_s7 = scalar_lea.vmem %s6495_s9, 256  ;;  %p7707_p1 = scmp.lt.s32.totalorder %s6495_s9, %s6495_s9 }
 0x24c   :  { %5986 = vrot.lane.b32.xlu0 %v7451_v6, %s7732_s10  ;;  %v4396_v14 = vpop.permute.xlu1 %4395  ;;  %3947 = vst.msk [vmem:[#allocation2 + $0x68] sm:$0xff] %vm695_vm6, %v3913_v8  ;;  %p7703_p0 = scmp.ne.s32.totalorder %s6495_s9, %s7702_s7  ;;  %p7708_p2 = scmp.lt.s32.totalorder %s7702_s7, %s7702_s7 }
 0x24d   :  { %v6369_v58 = vld [vmem:[#allocation2 + $0x60] sm:$0xff]  ;;  %6322 = vrot.lane.b32.xlu1 %v7539_v20, %s7733_s24  ;;  %4438 = vst.msk [vmem:[#allocation2 + $0x28] sm:$0xff] %vm1200_vm9, %v4396_v14 }
 0x24e   :  { %7592 = vmatprep.subr.msk.bf16.mxu1 %vm3147_vm15, %v6369_v58  ;;  %p7709_p3 = por %p7708_p2, %p7707_p1 }
 0x24f   :  { %7571 = vmatpush3.bf16.xpose.msra.mxu1 %v6389_v10  ;;  %v4233_v16 = vpop.permute.xlu0 %4232 }
 0x250   :  { %6306 = vrot.lane.b32.xlu0 %v7531_v22, %s7733_s24  ;;  %4267 = vst.msk [vmem:[#allocation2 + $0x68] sm:$0xff] %vm1019_vm8, %v4233_v16  ;;  %p7710_p4 = pnand %p7709_p3, %p7703_p0 }
 0x251   :  { %v1728_v28 = vpop.permute.xlu1 %1727 }
 0x252   :  { %1761 = vst.msk [vmem:[#allocation2 + $0x78] sm:$0xff] %vm1745_vm10, %v1728_v28 }
 0x253   :  { %v4412_v36 = vpop.permute.xlu0 %4411 }
 0x254   :  { %4446 = vst.msk [vmem:[#allocation2 + $0x68] sm:$0xff] %vm1200_vm9, %v4412_v36 }
 0x255   :  { %v4956_v9 = vpop.permute.xlu1 %4955 }
 0x256   :  { %4990 = vst.msk [vmem:[#allocation2 + $0x68] sm:$0xff] %vm1745_vm10, %v4956_v9 }
 0x259   :  { %v4940_v18 = vpop.permute.xlu0 %4939  ;;  %v2049_v56 = vpop.permute.xlu1 %2048 }
 0x25a   :  { %4982 = vst.msk [vmem:[#allocation2 + $0x28] sm:$0xff] %vm1745_vm10, %v4940_v18 }
 0x25b   :  { %2082 = vst.msk [vmem:[#allocation2 + $0x78] sm:$0xff] %vm2066_vm11, %v2049_v56 }
 0x25d   :  { %v2033_v27 = vpop.permute.xlu0 %2032  ;;  %v5276_v29 = vpop.permute.xlu1 %5275 }
 0x25e   :  { %2074 = vst.msk [vmem:[#allocation2 + $0x38] sm:$0xff] %vm2066_vm11, %v2033_v27  ;;  %5310 = vst.msk [vmem:[#allocation2 + $0x68] sm:$0xff] %vm2066_vm11, %v5276_v29 }
 0x261   :  { %v5260_v42 = vpop.permute.xlu0 %5259  ;;  %v2230_v4 = vpop.permute.xlu1 %2229 }
 0x262   :  { %5302 = vst.msk [vmem:[#allocation2 + $0x28] sm:$0xff] %vm2066_vm11, %v5260_v42 }
 0x263   :  { %2263 = vst.msk [vmem:[#allocation2 + $0x78] sm:$0xff] %vm2247_vm12, %v2230_v4 }
 0x265   :  { %v2214_v34 = vpop.permute.xlu0 %2213  ;;  %v5455_v35 = vpop.permute.xlu1 %5454 }
 0x266   :  { %2255 = vst.msk [vmem:[#allocation2 + $0x38] sm:$0xff] %vm2247_vm12, %v2214_v34  ;;  %5489 = vst.msk [vmem:[#allocation2 + $0x68] sm:$0xff] %vm2247_vm12, %v5455_v35 }
 0x269   :  { %v5439_v53 = vpop.permute.xlu0 %5438  ;;  %v2775_v37 = vpop.permute.xlu1 %2774 }
 0x26a   :  { %5481 = vst.msk [vmem:[#allocation2 + $0x28] sm:$0xff] %vm2247_vm12, %v5439_v53 }
 0x26b   :  { %2808 = vst.msk [vmem:[#allocation2 + $0x78] sm:$0xff] %vm2792_vm13, %v2775_v37 }
 0x26d   :  { %v2759_v17 = vpop.permute.xlu0 %2758 }
 0x26e   :  { %2800 = vst.msk [vmem:[#allocation2 + $0x38] sm:$0xff] %vm2792_vm13, %v2759_v17  ;;  %v5999_v46 = vpop.permute.xlu1 %5998 }
 0x26f   :  { %6033 = vst.msk [vmem:[#allocation2 + $0x68] sm:$0xff] %vm2792_vm13, %v5999_v46 }
 0x272   :  { %v5983_v47 = vpop.permute.xlu0 %5982  ;;  %v3096_v61 = vpop.permute.xlu1 %3095 }
 0x273   :  { %6025 = vst.msk [vmem:[#allocation2 + $0x28] sm:$0xff] %vm2792_vm13, %v5983_v47 }
 0x274   :  { %3129 = vst.msk [vmem:[#allocation2 + $0x78] sm:$0xff] %vm3113_vm14, %v3096_v61 }
 0x276   :  { %v3080_v31 = vpop.permute.xlu0 %3079  ;;  %v6319_v54 = vpop.permute.xlu1 %6318 }
 0x277   :  { %3121 = vst.msk [vmem:[#allocation2 + $0x38] sm:$0xff] %vm3113_vm14, %v3080_v31  ;;  %6353 = vst.msk [vmem:[#allocation2 + $0x68] sm:$0xff] %vm3113_vm14, %v6319_v54 }
 0x27a   :  { %v6303_v32 = vpop.permute.xlu0 %6302 }
 0x27b   :  { %v3146_v43 = vld [vmem:[#allocation2 + $0x78] sm:$0xff]  ;;  %6345 = vst.msk [vmem:[#allocation2 + $0x28] sm:$0xff] %vm3113_vm14, %v6303_v32 }
 0x27c   :  { %7587 = vmatprep.subr.msk.bf16.mxu0 %vm3147_vm15, %v3146_v43  ;;  %3405 = vst.msk [vmem:[#allocation2 + $0x78] sm:$0xff] %vm147_vm7, %v7700_v59 }
 0x27e   :  { %v3915_v12 = vpop.permute.xlu1 %3914  ;;  %v3138_v24 = vld [vmem:[#allocation2 + $0x38] sm:$0xff]  ;;  %v6370_v50 = vld [vmem:[#allocation2 + $0x68] sm:$0xff] }
 0x27f   :  { %3948 = vst.msk [vmem:[#allocation2 + $0x70] sm:$0xff] %vm695_vm6, %v3915_v12  ;;  %v3173_v51 = vsel %vm3147_vm15, %v3138_v24, 0  ;;  %7593 = vmatprep.subr.msk.bf16.mxu1 %vm3147_vm15, %v6370_v50 }
 0x280   :  { %3397 = vst.msk [vmem:[#allocation2 + $0x38] sm:$0xff] %vm147_vm7, %v7701_v45  ;;  %7559 = vmatpush3.bf16.xpose.msra.mxu0 %v3173_v51 }
 0x281   :  { %v3899_v33 = vpop.permute.xlu0 %3898 }
 0x282   :  { %v4235_v52 = vpop.permute.xlu1 %4234  ;;  %v6362_v55 = vld [vmem:[#allocation2 + $0x28] sm:$0xff]  ;;  %3940 = vst.msk [vmem:[#allocation2 + $0x30] sm:$0xff] %vm695_vm6, %v3899_v33 }
 0x283   :  { %4268 = vst.msk [vmem:[#allocation2 + $0x70] sm:$0xff] %vm1019_vm8, %v4235_v52  ;;  %v6392_v13 = vsel %vm3147_vm15, %v6362_v55, 0 }
 0x284   :  { %7573 = vmatpush3.bf16.xpose.msra.mxu1 %v6392_v13 }
 0x285   :  { %v4219_v21 = vpop.permute.xlu0 %4218 }
 0x286   :  { %v4414_v11 = vpop.permute.xlu1 %4413  ;;  %4260 = vst.msk [vmem:[#allocation2 + $0x30] sm:$0xff] %vm1019_vm8, %v4219_v21 }
 0x287   :  { %4447 = vst.msk [vmem:[#allocation2 + $0x70] sm:$0xff] %vm1200_vm9, %v4414_v11  ;;  %7561 = vmatmul.mubr.msk.bf16.vlgmr.msra.gmra.mrb[0].mxu0 %vm3147_vm15, %v11398_v26 }
 0x289   :  { %v4398_v44 = vpop.permute.xlu0 %4397 }
 0x28a   :  { %v4958_v60 = vpop.permute.xlu1 %4957  ;;  %4439 = vst.msk [vmem:[#allocation2 + $0x30] sm:$0xff] %vm1200_vm9, %v4398_v44 }
 0x28b   :  { %4991 = vst.msk [vmem:[#allocation2 + $0x70] sm:$0xff] %vm1745_vm10, %v4958_v60 }
 0x28d   :  { %v4942_v2 = vpop.permute.xlu0 %4941 }
 0x28e   :  { %v5278_v39 = vpop.permute.xlu1 %5277  ;;  %4983 = vst.msk [vmem:[#allocation2 + $0x30] sm:$0xff] %vm1745_vm10, %v4942_v2 }
 0x28f   :  { %5311 = vst.msk [vmem:[#allocation2 + $0x70] sm:$0xff] %vm2066_vm11, %v5278_v39 }
 0x291   :  { %v5262_v19 = vpop.permute.xlu0 %5261 }
 0x292   :  { %v5457_v62 = vpop.permute.xlu1 %5456  ;;  %5303 = vst.msk [vmem:[#allocation2 + $0x30] sm:$0xff] %vm2066_vm11, %v5262_v19 }
 0x293   :  { %5490 = vst.msk [vmem:[#allocation2 + $0x70] sm:$0xff] %vm2247_vm12, %v5457_v62 }
 0x295   :  { %v5441_v30 = vpop.permute.xlu0 %5440 }
 0x296   :  { %5482 = vst.msk [vmem:[#allocation2 + $0x30] sm:$0xff] %vm2247_vm12, %v5441_v30  ;;  %v6001_v26 = vpop.permute.xlu1 %6000 }
 0x297   :  { %6034 = vst.msk [vmem:[#allocation2 + $0x70] sm:$0xff] %vm2792_vm13, %v6001_v26 }
 0x299   :  { %v5985_v23 = vpop.permute.xlu0 %5984 }
 0x29a   :  { %6026 = vst.msk [vmem:[#allocation2 + $0x30] sm:$0xff] %vm2792_vm13, %v5985_v23  ;;  %v6321_v41 = vpop.permute.xlu1 %6320 }
 0x29b   :  { %6354 = vst.msk [vmem:[#allocation2 + $0x70] sm:$0xff] %vm3113_vm14, %v6321_v41 }
 0x29e   :  { %v6305_v15 = vpop.permute.xlu0 %6304 }
 0x29f   :  { %6346 = vst.msk [vmem:[#allocation2 + $0x30] sm:$0xff] %vm3113_vm14, %v6305_v15 }
 0x2a2   :  { %v6371_v25 = vld [vmem:[#allocation2 + $0x70] sm:$0xff] }
 0x2a3   :  { %v3917_v38 = vpop.permute.xlu1 %3916  ;;  %7594 = vmatprep.subr.msk.bf16.mxu1 %vm3147_vm15, %v6371_v25 }
 0x2a4   :  { %3949 = vst.msk [vmem:[#allocation2 + $0x78] sm:$0xff] %vm695_vm6, %v3917_v38 }
 0x2a6   :  { %v3901_v57 = vpop.permute.xlu0 %3900  ;;  %v6363_v0 = vld [vmem:[#allocation2 + $0x30] sm:$0xff] }
 0x2a7   :  { %3941 = vst.msk [vmem:[#allocation2 + $0x38] sm:$0xff] %vm695_vm6, %v3901_v57  ;;  %v4237_v40 = vpop.permute.xlu1 %4236  ;;  %v6395_v3 = vsel %vm3147_vm15, %v6363_v0, 0 }
 0x2a8   :  { %4269 = vst.msk [vmem:[#allocation2 + $0x78] sm:$0xff] %vm1019_vm8, %v4237_v40  ;;  %7575 = vmatpush3.bf16.xpose.msra.mxu1 %v6395_v3 }
 0x2aa   :  { %v4221_v1 = vpop.permute.xlu0 %4220 }
 0x2ab   :  { %4261 = vst.msk [vmem:[#allocation2 + $0x38] sm:$0xff] %vm1019_vm8, %v4221_v1  ;;  %v4416_v20 = vpop.permute.xlu1 %4415 }
 0x2ac   :  { %4448 = vst.msk [vmem:[#allocation2 + $0x78] sm:$0xff] %vm1200_vm9, %v4416_v20 }
 0x2ae   :  { %v4400_v48 = vpop.permute.xlu0 %4399 }
 0x2af   :  { %4440 = vst.msk [vmem:[#allocation2 + $0x38] sm:$0xff] %vm1200_vm9, %v4400_v48  ;;  %v4960_v5 = vpop.permute.xlu1 %4959 }
 0x2b0   :  { %4992 = vst.msk [vmem:[#allocation2 + $0x78] sm:$0xff] %vm1745_vm10, %v4960_v5 }
 0x2b2   :  { %v4944_v6 = vpop.permute.xlu0 %4943 }
 0x2b3   :  { %4984 = vst.msk [vmem:[#allocation2 + $0x38] sm:$0xff] %vm1745_vm10, %v4944_v6  ;;  %v5280_v7 = vpop.permute.xlu1 %5279 }
 0x2b4   :  { %5312 = vst.msk [vmem:[#allocation2 + $0x78] sm:$0xff] %vm2066_vm11, %v5280_v7 }
 0x2b6   :  { %v5264_v49 = vpop.permute.xlu0 %5263 }
 0x2b7   :  { %5304 = vst.msk [vmem:[#allocation2 + $0x38] sm:$0xff] %vm2066_vm11, %v5264_v49  ;;  %v5459_v22 = vpop.permute.xlu1 %5458 }
 0x2b8   :  { %5491 = vst.msk [vmem:[#allocation2 + $0x78] sm:$0xff] %vm2247_vm12, %v5459_v22 }
 0x2ba   :  { %v5443_v8 = vpop.permute.xlu0 %5442 }
 0x2bb   :  { %5483 = vst.msk [vmem:[#allocation2 + $0x38] sm:$0xff] %vm2247_vm12, %v5443_v8  ;;  %v6003_v14 = vpop.permute.xlu1 %6002 }
 0x2bc   :  { %6035 = vst.msk [vmem:[#allocation2 + $0x78] sm:$0xff] %vm2792_vm13, %v6003_v14 }
 0x2be   :  { %v5987_v58 = vpop.permute.xlu0 %5986 }
 0x2bf   :  { %6027 = vst.msk [vmem:[#allocation2 + $0x38] sm:$0xff] %vm2792_vm13, %v5987_v58  ;;  %v6323_v10 = vpop.permute.xlu1 %6322 }
 0x2c0   :  { %6355 = vst.msk [vmem:[#allocation2 + $0x78] sm:$0xff] %vm3113_vm14, %v6323_v10 }
 0x2c2   :  { %v6307_v16 = vpop.permute.xlu0 %6306 }
 0x2c3   :  { %6347 = vst.msk [vmem:[#allocation2 + $0x38] sm:$0xff] %vm3113_vm14, %v6307_v16 }
 0x2c7   :  { %v6372_v28 = vld [vmem:[#allocation2 + $0x78] sm:$0xff] }
 0x2c8   :  { %7595 = vmatprep.subr.msk.bf16.mxu1 %vm3147_vm15, %v6372_v28 }
 0x2ca   :  { %v6364_v36 = vld [vmem:[#allocation2 + $0x38] sm:$0xff] }
 0x2cb   :  { %v6398_v9 = vsel %vm3147_vm15, %v6364_v36, 0 }
 0x2cc   :  { %7577 = vmatpush3.bf16.xpose.msra.mxu1 %v6398_v9 }
 0x2d3   :  { %7579 = vmatmul.mubr.msk.bf16.vlgmr.msra.gmra.mrb[0].mxu1 %vm3147_vm15, %v11436_v63 }
 0x35a   :  { %v3233_v18 = vpop.f32.mrb[0].mxu0 }
 0x35b   :  { %v3244_v56 = vmul.f32 %v3233_v18, %v3233_v18  ;;  %v3235_v27 = vpop.f32.mrb[1].mxu0 }
 0x35c   :  { %v3240_v29 = vadd.f32 %v3235_v27, %v3233_v18  ;;  %v3245_v42 = vmul.f32 %v3235_v27, %v3235_v27  ;;  %v7542_v4 = vpack.c.bf16 %v3235_v27, %v3233_v18  ;;  %v3237_v34 = vpop.f32.mrb[2].mxu0 }
 0x35d   :  { %v3238_v35 = vpop.f32.mrb[3].mxu0 }
 0x35e   :  { %3258 = vst [vmem:[#allocation3] sm:$0xff] %v7542_v4  ;;  %3241 = vadd.xlane.f32.xlu0 %v3240_v29  ;;  %v3246_v53 = vadd.f32 %v3245_v42, %v3244_v56 }
 0x360   :  { %3247 = vadd.xlane.f32.xlu1 %v3246_v53 }
 0x3a6   :  { %v6458_v37 = vpop.f32.mrb[0].mxu1 }
 0x3a7   :  { %v6469_v17 = vmul.f32 %v6458_v37, %v6458_v37  ;;  %v6460_v46 = vpop.f32.mrb[1].mxu1 }
 0x3a8   :  { %v6465_v47 = vadd.f32 %v6460_v46, %v6458_v37  ;;  %v6470_v61 = vmul.f32 %v6460_v46, %v6460_v46  ;;  %v7543_v31 = vpack.c.bf16 %v6460_v46, %v6458_v37  ;;  %v6462_v54 = vpop.f32.mrb[2].mxu1 }
 0x3a9   :  { %v6463_v63 = vpop.f32.mrb[3].mxu1 }
 0x3aa   :  { %6484 = vst [vmem:[#allocation3 + $0x8] sm:$0xff] %v7543_v31  ;;  %6466 = vadd.xlane.f32.xlu0 %v6465_v47  ;;  %v6471_v59 = vadd.f32 %v6470_v61, %v6469_v17 }
 0x3ae   :  { %6472 = vadd.xlane.f32.xlu0 %v6471_v59 }
 0x3af   :  { %7713 = shalt.err (!%p7710_p4)
}
 0x3b0   :  { %s7714_s12 = scalar_lea.hbm %s11537_s2, 256 }
 0x3b1   :  { %p7715_p5 = scmp.ne.s32.totalorder %s11537_s2, %s7714_s12  ;;  %p7718_p6 = scmp.lt.u32.totalorder %s7714_s12, %s11537_s2 }
 0x3b3   :  { %p7720_p7 = pnand %p7718_p6, %p7715_p5 }
 0x3b5   :  { %7723 = shalt.err (!%p7720_p7)
}
 0x3b6   :  { %s7735_s15 = smov 128   ;;  %vm6485_vm0 = vcmask 7168   ;;  %vm6487_vm1 = vcmask 15360  }
 0x3b7   :  { %6500 = dma.vmem_to_hbm [thread:$0]  %s6495_s9, 256, %s11537_s2, [#allocation4], %s7735_s15, %s7735_s15, %s7727_s26  }
 0x3eb   :  { %v3242_v32 = vpop.xlane.xlu0 %3241 }
 0x3ed   :  { %v3248_v45 = vpop.xlane.xlu1 %3247 }
 0x437   :  { %v6467_v43 = vpop.xlane.xlu0 %6466 }
 0x438   :  { %v6468_v24 = vadd.f32 %v6467_v43, %v3242_v32 }
 0x43b   :  { %v6473_v12 = vpop.xlane.xlu0 %6472 }
 0x43c   :  { %v6474_v50 = vadd.f32 %v6473_v12, %v3248_v45 }
 0x43e   :  { %v6486_v51 = vsel %vm6485_vm0, %v6468_v24, %v6474_v50 }
 0x43f   :  { %6488 = vst.msk [vmem:[%s11538_s3] sm:$0xff] %vm6487_vm1, %v6486_v51 }
 0x440   :  { %7724 = dma.done.wait [#allocation4], 256  }
 0x441   :  { %7725 = vsyncadd [#allocation4], 4294967040 }
 0x442   :  { %6508 = vsyncpa [#allocation4], 1 }

</bundles_post_ra>
